<compile_context>
chip_gen: v7x
topology: tpu7x:2x2x1
jax: 0.10.0
libtpu: 0.0.40
codegen_flags: <defaults>
</compile_context>

<pallas_src>
import numpy as np

import jax
import jax.numpy as jnp
from jax.experimental import pallas as pl
from jax.experimental.pallas import tpu as pltpu

_K = 5  # conv kernel size


# ------------------------------ Pallas kernel ------------------------------

def _lenet_kernel(s0_ref, s1_ref, s2_ref, s3_ref,
                  m1_ref, b1_ref, m2_ref, b2_ref,
                  f1_ref, f1b_ref, f2_ref, f2b_ref, f3_ref, f3b_ref,
                  o_ref):
    """Whole Net forward for ONE image per grid step.

    s*_ref : 4 row-phase slabs of the 32x32x3 image, each (1, 8, 96); the minor
             dim is (width, channel) flattened -> lane dense.
    m1_ref : (10, 96, 84)  banded conv1 weights, index = dj*5 + kh
    m2_ref : (10, 84, 80)  banded conv2 weights
    f1_ref : (5, 80, 120)  fc1 weights split per pooled row h (absorbs the
                           NCHW-order flatten of PyTorch's x.view(-1, 400))
    Conv + 2x2 maxpool is computed as: for each pool quadrant (di, dj), sum
    over kh of  row_slab @ banded_weight[dj, kh]; then max over quadrants.
    """
    slabs4 = (s0_ref[0], s1_ref[0], s2_ref[0], s3_ref[0])          # (8, 96) each

    # ---- conv1 + bias + ReLU + pool, emitted as two row-phase slabs (7, 84) ----
    pooled1 = []
    for ph in (0, 1):                       # row phase of the pooled output
        qmax = None
        for di in (0, 1):                   # pool quadrant (row)
            for dj in (0, 1):               # pool quadrant (col)
                acc = None
                for kh in range(_K):        # conv tap row
                    r = 2 * ph + di + kh
                    lhs = slabs4[r % 4][r // 4:r // 4 + 7, :]        # (7, 96)
                    t = jnp.dot(lhs, m1_ref[dj * _K + kh],
                                preferred_element_type=jnp.float32)  # (7, 84)
                    acc = t if acc is None else acc + t
                qmax = acc if qmax is None else jnp.maximum(qmax, acc)
        pooled1.append(jnp.maximum(qmax + b1_ref[...], 0.0))         # (7, 84)

    # ---- conv2 + bias + ReLU + pool -> (5, 80) == NHWC (5, 5, 16) flattened ----
    qmax = None
    for di in (0, 1):
        for dj in (0, 1):
            acc = None
            for kh in range(_K):
                r = di + kh
                lhs = pooled1[r % 2][r // 2:r // 2 + 5, :]           # (5, 84)
                t = jnp.dot(lhs, m2_ref[dj * _K + kh],
                            preferred_element_type=jnp.float32)      # (5, 80)
                acc = t if acc is None else acc + t
            qmax = acc if qmax is None else jnp.maximum(qmax, acc)
    pooled2 = jnp.maximum(qmax + b2_ref[...], 0.0)                   # (5, 80)

    # ---- fc1 (+ReLU): contract the 5 pooled rows against per-row weight slices
    z = None
    for h in range(5):
        t = jnp.dot(pooled2[h:h + 1, :], f1_ref[h],
                    preferred_element_type=jnp.float32)              # (1, 120)
        z = t if z is None else z + t
    z = jnp.maximum(z + f1b_ref[...], 0.0)
    # ---- fc2 (+ReLU), fc3 ----
    z = jnp.maximum(jnp.dot(z, f2_ref[...],
                            preferred_element_type=jnp.float32) + f2b_ref[...], 0.0)
    z = jnp.dot(z, f3_ref[...], preferred_element_type=jnp.float32) + f3b_ref[...]
    o_ref[...] = z[None].astype(o_ref.dtype)                         # (1, 1, 10)


# --------------------------- weight preparation ----------------------------

def init_params(key):
    """PyTorch-default-style init, weights stored in torch layouts."""
    ks = jax.random.split(key, 10)

    def uni(k, shape, fan_in):
        bound = 1.0 / np.sqrt(float(fan_in))
        return jax.random.uniform(k, shape, jnp.float32, -bound, bound)

    return {
        "conv1_w": uni(ks[0], (6, 3, 5, 5), 3 * 5 * 5),
        "conv1_b": uni(ks[1], (6,), 3 * 5 * 5),
        "conv2_w": uni(ks[2], (16, 6, 5, 5), 6 * 5 * 5),
        "conv2_b": uni(ks[3], (16,), 6 * 5 * 5),
        "fc1_w": uni(ks[4], (120, 400), 400),
        "fc1_b": uni(ks[5], (120,), 400),
        "fc2_w": uni(ks[6], (84, 120), 120),
        "fc2_b": uni(ks[7], (84,), 120),
        "fc3_w": uni(ks[8], (10, 84), 84),
        "fc3_b": uni(ks[9], (10,), 84),
    }


def _band_conv_weight(w, w_in, pow_out):
    """(O,Cin,5,5) torch conv weight -> (10, w_in*Cin, pow_out*O) banded matrices.

    m[dj*5+kh, w*Cin+c, q*O+o] = w[o, c, kh, w - 2q - dj]  (0 outside the tap),
    so conv+pool quadrant (di,dj) row-slab = sum_kh  input_rows @ m[dj*5+kh].
    """
    w = np.asarray(w)
    oc, cin, k, _ = w.shape
    m = np.zeros((2, k, w_in * cin, pow_out * oc), np.float32)
    for dj in range(2):
        for kh in range(k):
            for q in range(pow_out):
                for kw in range(k):
                    col = 2 * q + dj + kw
                    m[dj, kh, col * cin:(col + 1) * cin,
                      q * oc:(q + 1) * oc] = w[:, :, kh, kw].T
    return jnp.asarray(m.reshape(2 * k, w_in * cin, pow_out * oc))


def pack_params(raw):
    """One-time repack of torch-layout weights into kernel-ready VMEM layouts."""
    f1 = np.asarray(raw["fc1_w"]).reshape(120, 16, 5, 5)    # [o, c, h, w]
    f1 = f1.transpose(2, 3, 1, 0).reshape(5, 5 * 16, 120)   # [h][w*16 + c, o]
    return {
        "m1": _band_conv_weight(raw["conv1_w"], 32, 14),     # (10, 96, 84)
        "b1": jnp.asarray(np.tile(np.asarray(raw["conv1_b"]), 14)[None, :]),
        "m2": _band_conv_weight(raw["conv2_w"], 14, 5),      # (10, 84, 80)
        "b2": jnp.asarray(np.tile(np.asarray(raw["conv2_b"]), 5)[None, :]),
        "fc1": jnp.asarray(f1),                              # (5, 80, 120)
        "fc1_b": raw["fc1_b"].reshape(1, -1),
        "fc2": raw["fc2_w"].T,                               # (120, 84)
        "fc2_b": raw["fc2_b"].reshape(1, -1),
        "fc3": raw["fc3_w"].T,                               # (84, 10)
        "fc3_b": raw["fc3_b"].reshape(1, -1),
    }


# -------------------------------- forward ----------------------------------

def net_forward(packed, x_nchw):
    n, c, h, w = x_nchw.shape
    assert (c, h, w) == (3, 32, 32), "Net expects (N, 3, 32, 32) inputs"
    # Layout glue only (1x the input bytes): NHWC, then split the 32 image rows
    # into 4 row-phase slabs so conv+pool needs only contiguous in-kernel slices.
    x_nhwc = jnp.transpose(x_nchw, (0, 2, 3, 1)).astype(jnp.float32)
    slabs = [x_nhwc[:, m::4, :, :].reshape(n, 8, 96) for m in range(4)]

    worder = ("m1", "b1", "m2", "b2", "fc1", "fc1_b", "fc2", "fc2_b", "fc3", "fc3_b")
    weights = [packed[k] for k in worder]

    def full_spec(a):
        nd = a.ndim
        return pl.BlockSpec(a.shape, lambda i: (0,) * nd)   # resident in VMEM

    out = pl.pallas_call(
        _lenet_kernel,
        out_shape=jax.ShapeDtypeStruct((n, 1, 10), jnp.float32),
        grid=(n,),
        in_specs=([pl.BlockSpec((1, 8, 96), lambda i: (i, 0, 0))] * 4
                  + [full_spec(a) for a in weights]),
        out_specs=pl.BlockSpec((1, 1, 10), lambda i: (i, 0, 0)),
        compiler_params=pltpu.CompilerParams(
            dimension_semantics=("parallel",),
            vmem_limit_bytes=32 * 1024 * 1024,
        ),
    )(*slabs, *weights)
    return out[:, 0, :]


# ----------------------- plain-JAX reference (check) -----------------------

def _reference_forward(raw, x):
    hi = jax.lax.Precision.HIGHEST

    def conv(h, w, b):
        y = jax.lax.conv_general_dilated(
            h, w, (1, 1), "VALID",
            dimension_numbers=("NCHW", "OIHW", "NCHW"), precision=hi)
        return jax.nn.relu(y + b[None, :, None, None])

    def pool(h):
        return jax.lax.reduce_window(h, -jnp.inf, jax.lax.max,
                                     (1, 1, 2, 2), (1, 1, 2, 2), "VALID")

    h = pool(conv(x, raw["conv1_w"], raw["conv1_b"]))
    h = pool(conv(h, raw["conv2_w"], raw["conv2_b"]))
    h = h.reshape(x.shape[0], 400)                       # NCHW flatten, as torch
    h = jax.nn.relu(jnp.dot(h, raw["fc1_w"].T, precision=hi) + raw["fc1_b"])
    h = jax.nn.relu(jnp.dot(h, raw["fc2_w"].T, precision=hi) + raw["fc2_b"])
    return jnp.dot(h, raw["fc3_w"].T, precision=hi) + raw["fc3_b"]


if __name__ == "__main__":
    key = jax.random.PRNGKey(0)
    pkey, xkey = jax.random.split(key)
    raw = init_params(pkey)
    packed = pack_params(raw)
    x = jax.random.normal(xkey, (2, 3, 32, 32), jnp.float32)   # NCHW like PyTorch

    fwd = jax.jit(net_forward)
    out = jax.block_until_ready(fwd(packed, x))
    assert out.shape == (2, 10), out.shape

    ref = jax.block_until_ready(_reference_forward(raw, x))
    err = float(np.max(np.abs(np.asarray(out) - np.asarray(ref))))
    assert np.allclose(np.asarray(out), np.asarray(ref), rtol=2e-3, atol=2e-3), err
    print("KERNEL_OK")
</pallas_src>

<mosaic_0001>
module attributes {stable_mosaic.version = 11 : i64} {
  func.func @_lenet_kernel(%arg0: i32, %arg1: memref<1x8x96xf32, #tpu.memory_space<vmem>>, %arg2: memref<1x8x96xf32, #tpu.memory_space<vmem>>, %arg3: memref<1x8x96xf32, #tpu.memory_space<vmem>>, %arg4: memref<1x8x96xf32, #tpu.memory_space<vmem>>, %arg5: memref<10x96x84xf32, #tpu.memory_space<vmem>>, %arg6: memref<1x84xf32, #tpu.memory_space<vmem>>, %arg7: memref<10x84x80xf32, #tpu.memory_space<vmem>>, %arg8: memref<1x80xf32, #tpu.memory_space<vmem>>, %arg9: memref<5x80x120xf32, #tpu.memory_space<vmem>>, %arg10: memref<1x120xf32, #tpu.memory_space<vmem>>, %arg11: memref<120x84xf32, #tpu.memory_space<vmem>>, %arg12: memref<1x84xf32, #tpu.memory_space<vmem>>, %arg13: memref<84x10xf32, #tpu.memory_space<vmem>>, %arg14: memref<1x10xf32, #tpu.memory_space<vmem>>, %arg15: memref<1x1x10xf32, #tpu.memory_space<vmem>>) attributes {dimension_semantics = [#tpu.dimension_semantics<parallel>], iteration_bounds = array<i64: 2>, scalar_prefetch = 0 : i64, scratch_operands = 0 : i64, tpu.core_type = #tpu.core_type<tc>, window_params = [{transform_indices = @transform_0, window_bounds = array<i64: 1, 8, 96>}, {transform_indices = @transform_1, window_bounds = array<i64: 1, 8, 96>}, {transform_indices = @transform_2, window_bounds = array<i64: 1, 8, 96>}, {transform_indices = @transform_3, window_bounds = array<i64: 1, 8, 96>}, {pipeline_mode = #tpu.pipeline_mode<synchronous>, transform_indices = @transform_4, window_bounds = array<i64: 10, 96, 84>}, {pipeline_mode = #tpu.pipeline_mode<synchronous>, transform_indices = @transform_5, window_bounds = array<i64: 1, 84>}, {pipeline_mode = #tpu.pipeline_mode<synchronous>, transform_indices = @transform_6, window_bounds = array<i64: 10, 84, 80>}, {pipeline_mode = #tpu.pipeline_mode<synchronous>, transform_indices = @transform_7, window_bounds = array<i64: 1, 80>}, {pipeline_mode = #tpu.pipeline_mode<synchronous>, transform_indices = @transform_8, window_bounds = array<i64: 5, 80, 120>}, {pipeline_mode = #tpu.pipeline_mode<synchronous>, transform_indices = @transform_9, window_bounds = array<i64: 1, 120>}, {pipeline_mode = #tpu.pipeline_mode<synchronous>, transform_indices = @transform_10, window_bounds = array<i64: 120, 84>}, {pipeline_mode = #tpu.pipeline_mode<synchronous>, transform_indices = @transform_11, window_bounds = array<i64: 1, 84>}, {pipeline_mode = #tpu.pipeline_mode<synchronous>, transform_indices = @transform_12, window_bounds = array<i64: 84, 10>}, {pipeline_mode = #tpu.pipeline_mode<synchronous>, transform_indices = @transform_13, window_bounds = array<i64: 1, 10>}, {transform_indices = @transform_14, window_bounds = array<i64: 1, 1, 10>}]} {
    %c0 = arith.constant 0 : index
    %c0_0 = arith.constant 0 : index
    %c0_1 = arith.constant 0 : index
    %0 = vector.load %arg1[%c0, %c0_0, %c0_1] : memref<1x8x96xf32, #tpu.memory_space<vmem>>, vector<1x8x96xf32>
    %1 = vector.shape_cast %0 : vector<1x8x96xf32> to vector<8x96xf32>
    %c0_2 = arith.constant 0 : index
    %c0_3 = arith.constant 0 : index
    %c0_4 = arith.constant 0 : index
    %2 = vector.load %arg2[%c0_2, %c0_3, %c0_4] : memref<1x8x96xf32, #tpu.memory_space<vmem>>, vector<1x8x96xf32>
    %3 = vector.shape_cast %2 : vector<1x8x96xf32> to vector<8x96xf32>
    %c0_5 = arith.constant 0 : index
    %c0_6 = arith.constant 0 : index
    %c0_7 = arith.constant 0 : index
    %4 = vector.load %arg3[%c0_5, %c0_6, %c0_7] : memref<1x8x96xf32, #tpu.memory_space<vmem>>, vector<1x8x96xf32>
    %5 = vector.shape_cast %4 : vector<1x8x96xf32> to vector<8x96xf32>
    %c0_8 = arith.constant 0 : index
    %c0_9 = arith.constant 0 : index
    %c0_10 = arith.constant 0 : index
    %6 = vector.load %arg4[%c0_8, %c0_9, %c0_10] : memref<1x8x96xf32, #tpu.memory_space<vmem>>, vector<1x8x96xf32>
    %7 = vector.shape_cast %6 : vector<1x8x96xf32> to vector<8x96xf32>
    %8 = vector.extract_strided_slice %1 {offsets = [0, 0], sizes = [7, 96], strides = [1, 1]} : vector<8x96xf32> to vector<7x96xf32>
    %c0_11 = arith.constant 0 : index
    %c0_12 = arith.constant 0 : index
    %c0_13 = arith.constant 0 : index
    %9 = vector.load %arg5[%c0_11, %c0_12, %c0_13] : memref<10x96x84xf32, #tpu.memory_space<vmem>>, vector<1x96x84xf32>
    %10 = vector.shape_cast %9 : vector<1x96x84xf32> to vector<96x84xf32>
    %cst = arith.constant dense<0.000000e+00> : vector<7x84xf32>
    %11 = tpu.matmul %8, %10, %cst {dimension_numbers = #tpu.dot_dimension_numbers<[1], [0], [0], [1], [0, 0, 1, 1], [], []>} : vector<7x96xf32>, vector<96x84xf32>, vector<7x84xf32> -> vector<7x84xf32>
    %12 = vector.extract_strided_slice %3 {offsets = [0, 0], sizes = [7, 96], strides = [1, 1]} : vector<8x96xf32> to vector<7x96xf32>
    %c1 = arith.constant 1 : index
    %c0_14 = arith.constant 0 : index
    %c0_15 = arith.constant 0 : index
    %13 = vector.load %arg5[%c1, %c0_14, %c0_15] : memref<10x96x84xf32, #tpu.memory_space<vmem>>, vector<1x96x84xf32>
    %14 = vector.shape_cast %13 : vector<1x96x84xf32> to vector<96x84xf32>
    %cst_16 = arith.constant dense<0.000000e+00> : vector<7x84xf32>
    %15 = tpu.matmul %12, %14, %cst_16 {dimension_numbers = #tpu.dot_dimension_numbers<[1], [0], [0], [1], [0, 0, 1, 1], [], []>} : vector<7x96xf32>, vector<96x84xf32>, vector<7x84xf32> -> vector<7x84xf32>
    %16 = arith.addf %11, %15 : vector<7x84xf32>
    %17 = vector.extract_strided_slice %5 {offsets = [0, 0], sizes = [7, 96], strides = [1, 1]} : vector<8x96xf32> to vector<7x96xf32>
    %c2 = arith.constant 2 : index
    %c0_17 = arith.constant 0 : index
    %c0_18 = arith.constant 0 : index
    %18 = vector.load %arg5[%c2, %c0_17, %c0_18] : memref<10x96x84xf32, #tpu.memory_space<vmem>>, vector<1x96x84xf32>
    %19 = vector.shape_cast %18 : vector<1x96x84xf32> to vector<96x84xf32>
    %cst_19 = arith.constant dense<0.000000e+00> : vector<7x84xf32>
    %20 = tpu.matmul %17, %19, %cst_19 {dimension_numbers = #tpu.dot_dimension_numbers<[1], [0], [0], [1], [0, 0, 1, 1], [], []>} : vector<7x96xf32>, vector<96x84xf32>, vector<7x84xf32> -> vector<7x84xf32>
    %21 = arith.addf %16, %20 : vector<7x84xf32>
    %22 = vector.extract_strided_slice %7 {offsets = [0, 0], sizes = [7, 96], strides = [1, 1]} : vector<8x96xf32> to vector<7x96xf32>
    %c3 = arith.constant 3 : index
    %c0_20 = arith.constant 0 : index
    %c0_21 = arith.constant 0 : index
    %23 = vector.load %arg5[%c3, %c0_20, %c0_21] : memref<10x96x84xf32, #tpu.memory_space<vmem>>, vector<1x96x84xf32>
    %24 = vector.shape_cast %23 : vector<1x96x84xf32> to vector<96x84xf32>
    %cst_22 = arith.constant dense<0.000000e+00> : vector<7x84xf32>
    %25 = tpu.matmul %22, %24, %cst_22 {dimension_numbers = #tpu.dot_dimension_numbers<[1], [0], [0], [1], [0, 0, 1, 1], [], []>} : vector<7x96xf32>, vector<96x84xf32>, vector<7x84xf32> -> vector<7x84xf32>
    %26 = arith.addf %21, %25 : vector<7x84xf32>
    %27 = vector.extract_strided_slice %1 {offsets = [1, 0], sizes = [7, 96], strides = [1, 1]} : vector<8x96xf32> to vector<7x96xf32>
    %c4 = arith.constant 4 : index
    %c0_23 = arith.constant 0 : index
    %c0_24 = arith.constant 0 : index
    %28 = vector.load %arg5[%c4, %c0_23, %c0_24] : memref<10x96x84xf32, #tpu.memory_space<vmem>>, vector<1x96x84xf32>
    %29 = vector.shape_cast %28 : vector<1x96x84xf32> to vector<96x84xf32>
    %cst_25 = arith.constant dense<0.000000e+00> : vector<7x84xf32>
    %30 = tpu.matmul %27, %29, %cst_25 {dimension_numbers = #tpu.dot_dimension_numbers<[1], [0], [0], [1], [0, 0, 1, 1], [], []>} : vector<7x96xf32>, vector<96x84xf32>, vector<7x84xf32> -> vector<7x84xf32>
    %31 = arith.addf %26, %30 : vector<7x84xf32>
    %32 = vector.extract_strided_slice %1 {offsets = [0, 0], sizes = [7, 96], strides = [1, 1]} : vector<8x96xf32> to vector<7x96xf32>
    %c5 = arith.constant 5 : index
    %c0_26 = arith.constant 0 : index
    %c0_27 = arith.constant 0 : index
    %33 = vector.load %arg5[%c5, %c0_26, %c0_27] : memref<10x96x84xf32, #tpu.memory_space<vmem>>, vector<1x96x84xf32>
    %34 = vector.shape_cast %33 : vector<1x96x84xf32> to vector<96x84xf32>
    %cst_28 = arith.constant dense<0.000000e+00> : vector<7x84xf32>
    %35 = tpu.matmul %32, %34, %cst_28 {dimension_numbers = #tpu.dot_dimension_numbers<[1], [0], [0], [1], [0, 0, 1, 1], [], []>} : vector<7x96xf32>, vector<96x84xf32>, vector<7x84xf32> -> vector<7x84xf32>
    %36 = vector.extract_strided_slice %3 {offsets = [0, 0], sizes = [7, 96], strides = [1, 1]} : vector<8x96xf32> to vector<7x96xf32>
    %c6 = arith.constant 6 : index
    %c0_29 = arith.constant 0 : index
    %c0_30 = arith.constant 0 : index
    %37 = vector.load %arg5[%c6, %c0_29, %c0_30] : memref<10x96x84xf32, #tpu.memory_space<vmem>>, vector<1x96x84xf32>
    %38 = vector.shape_cast %37 : vector<1x96x84xf32> to vector<96x84xf32>
    %cst_31 = arith.constant dense<0.000000e+00> : vector<7x84xf32>
    %39 = tpu.matmul %36, %38, %cst_31 {dimension_numbers = #tpu.dot_dimension_numbers<[1], [0], [0], [1], [0, 0, 1, 1], [], []>} : vector<7x96xf32>, vector<96x84xf32>, vector<7x84xf32> -> vector<7x84xf32>
    %40 = arith.addf %35, %39 : vector<7x84xf32>
    %41 = vector.extract_strided_slice %5 {offsets = [0, 0], sizes = [7, 96], strides = [1, 1]} : vector<8x96xf32> to vector<7x96xf32>
    %c7 = arith.constant 7 : index
    %c0_32 = arith.constant 0 : index
    %c0_33 = arith.constant 0 : index
    %42 = vector.load %arg5[%c7, %c0_32, %c0_33] : memref<10x96x84xf32, #tpu.memory_space<vmem>>, vector<1x96x84xf32>
    %43 = vector.shape_cast %42 : vector<1x96x84xf32> to vector<96x84xf32>
    %cst_34 = arith.constant dense<0.000000e+00> : vector<7x84xf32>
    %44 = tpu.matmul %41, %43, %cst_34 {dimension_numbers = #tpu.dot_dimension_numbers<[1], [0], [0], [1], [0, 0, 1, 1], [], []>} : vector<7x96xf32>, vector<96x84xf32>, vector<7x84xf32> -> vector<7x84xf32>
    %45 = arith.addf %40, %44 : vector<7x84xf32>
    %46 = vector.extract_strided_slice %7 {offsets = [0, 0], sizes = [7, 96], strides = [1, 1]} : vector<8x96xf32> to vector<7x96xf32>
    %c8 = arith.constant 8 : index
    %c0_35 = arith.constant 0 : index
    %c0_36 = arith.constant 0 : index
    %47 = vector.load %arg5[%c8, %c0_35, %c0_36] : memref<10x96x84xf32, #tpu.memory_space<vmem>>, vector<1x96x84xf32>
    %48 = vector.shape_cast %47 : vector<1x96x84xf32> to vector<96x84xf32>
    %cst_37 = arith.constant dense<0.000000e+00> : vector<7x84xf32>
    %49 = tpu.matmul %46, %48, %cst_37 {dimension_numbers = #tpu.dot_dimension_numbers<[1], [0], [0], [1], [0, 0, 1, 1], [], []>} : vector<7x96xf32>, vector<96x84xf32>, vector<7x84xf32> -> vector<7x84xf32>
    %50 = arith.addf %45, %49 : vector<7x84xf32>
    %51 = vector.extract_strided_slice %1 {offsets = [1, 0], sizes = [7, 96], strides = [1, 1]} : vector<8x96xf32> to vector<7x96xf32>
    %c9 = arith.constant 9 : index
    %c0_38 = arith.constant 0 : index
    %c0_39 = arith.constant 0 : index
    %52 = vector.load %arg5[%c9, %c0_38, %c0_39] : memref<10x96x84xf32, #tpu.memory_space<vmem>>, vector<1x96x84xf32>
    %53 = vector.shape_cast %52 : vector<1x96x84xf32> to vector<96x84xf32>
    %cst_40 = arith.constant dense<0.000000e+00> : vector<7x84xf32>
    %54 = tpu.matmul %51, %53, %cst_40 {dimension_numbers = #tpu.dot_dimension_numbers<[1], [0], [0], [1], [0, 0, 1, 1], [], []>} : vector<7x96xf32>, vector<96x84xf32>, vector<7x84xf32> -> vector<7x84xf32>
    %55 = arith.addf %50, %54 : vector<7x84xf32>
    %56 = arith.maximumf %31, %55 : vector<7x84xf32>
    %57 = vector.extract_strided_slice %3 {offsets = [0, 0], sizes = [7, 96], strides = [1, 1]} : vector<8x96xf32> to vector<7x96xf32>
    %c0_41 = arith.constant 0 : index
    %c0_42 = arith.constant 0 : index
    %c0_43 = arith.constant 0 : index
    %58 = vector.load %arg5[%c0_41, %c0_42, %c0_43] : memref<10x96x84xf32, #tpu.memory_space<vmem>>, vector<1x96x84xf32>
    %59 = vector.shape_cast %58 : vector<1x96x84xf32> to vector<96x84xf32>
    %cst_44 = arith.constant dense<0.000000e+00> : vector<7x84xf32>
    %60 = tpu.matmul %57, %59, %cst_44 {dimension_numbers = #tpu.dot_dimension_numbers<[1], [0], [0], [1], [0, 0, 1, 1], [], []>} : vector<7x96xf32>, vector<96x84xf32>, vector<7x84xf32> -> vector<7x84xf32>
    %61 = vector.extract_strided_slice %5 {offsets = [0, 0], sizes = [7, 96], strides = [1, 1]} : vector<8x96xf32> to vector<7x96xf32>
    %c1_45 = arith.constant 1 : index
    %c0_46 = arith.constant 0 : index
    %c0_47 = arith.constant 0 : index
    %62 = vector.load %arg5[%c1_45, %c0_46, %c0_47] : memref<10x96x84xf32, #tpu.memory_space<vmem>>, vector<1x96x84xf32>
    %63 = vector.shape_cast %62 : vector<1x96x84xf32> to vector<96x84xf32>
    %cst_48 = arith.constant dense<0.000000e+00> : vector<7x84xf32>
    %64 = tpu.matmul %61, %63, %cst_48 {dimension_numbers = #tpu.dot_dimension_numbers<[1], [0], [0], [1], [0, 0, 1, 1], [], []>} : vector<7x96xf32>, vector<96x84xf32>, vector<7x84xf32> -> vector<7x84xf32>
    %65 = arith.addf %60, %64 : vector<7x84xf32>
    %66 = vector.extract_strided_slice %7 {offsets = [0, 0], sizes = [7, 96], strides = [1, 1]} : vector<8x96xf32> to vector<7x96xf32>
    %c2_49 = arith.constant 2 : index
    %c0_50 = arith.constant 0 : index
    %c0_51 = arith.constant 0 : index
    %67 = vector.load %arg5[%c2_49, %c0_50, %c0_51] : memref<10x96x84xf32, #tpu.memory_space<vmem>>, vector<1x96x84xf32>
    %68 = vector.shape_cast %67 : vector<1x96x84xf32> to vector<96x84xf32>
    %cst_52 = arith.constant dense<0.000000e+00> : vector<7x84xf32>
    %69 = tpu.matmul %66, %68, %cst_52 {dimension_numbers = #tpu.dot_dimension_numbers<[1], [0], [0], [1], [0, 0, 1, 1], [], []>} : vector<7x96xf32>, vector<96x84xf32>, vector<7x84xf32> -> vector<7x84xf32>
    %70 = arith.addf %65, %69 : vector<7x84xf32>
    %71 = vector.extract_strided_slice %1 {offsets = [1, 0], sizes = [7, 96], strides = [1, 1]} : vector<8x96xf32> to vector<7x96xf32>
    %c3_53 = arith.constant 3 : index
    %c0_54 = arith.constant 0 : index
    %c0_55 = arith.constant 0 : index
    %72 = vector.load %arg5[%c3_53, %c0_54, %c0_55] : memref<10x96x84xf32, #tpu.memory_space<vmem>>, vector<1x96x84xf32>
    %73 = vector.shape_cast %72 : vector<1x96x84xf32> to vector<96x84xf32>
    %cst_56 = arith.constant dense<0.000000e+00> : vector<7x84xf32>
    %74 = tpu.matmul %71, %73, %cst_56 {dimension_numbers = #tpu.dot_dimension_numbers<[1], [0], [0], [1], [0, 0, 1, 1], [], []>} : vector<7x96xf32>, vector<96x84xf32>, vector<7x84xf32> -> vector<7x84xf32>
    %75 = arith.addf %70, %74 : vector<7x84xf32>
    %76 = vector.extract_strided_slice %3 {offsets = [1, 0], sizes = [7, 96], strides = [1, 1]} : vector<8x96xf32> to vector<7x96xf32>
    %c4_57 = arith.constant 4 : index
    %c0_58 = arith.constant 0 : index
    %c0_59 = arith.constant 0 : index
    %77 = vector.load %arg5[%c4_57, %c0_58, %c0_59] : memref<10x96x84xf32, #tpu.memory_space<vmem>>, vector<1x96x84xf32>
    %78 = vector.shape_cast %77 : vector<1x96x84xf32> to vector<96x84xf32>
    %cst_60 = arith.constant dense<0.000000e+00> : vector<7x84xf32>
    %79 = tpu.matmul %76, %78, %cst_60 {dimension_numbers = #tpu.dot_dimension_numbers<[1], [0], [0], [1], [0, 0, 1, 1], [], []>} : vector<7x96xf32>, vector<96x84xf32>, vector<7x84xf32> -> vector<7x84xf32>
    %80 = arith.addf %75, %79 : vector<7x84xf32>
    %81 = arith.maximumf %56, %80 : vector<7x84xf32>
    %82 = vector.extract_strided_slice %3 {offsets = [0, 0], sizes = [7, 96], strides = [1, 1]} : vector<8x96xf32> to vector<7x96xf32>
    %c5_61 = arith.constant 5 : index
    %c0_62 = arith.constant 0 : index
    %c0_63 = arith.constant 0 : index
    %83 = vector.load %arg5[%c5_61, %c0_62, %c0_63] : memref<10x96x84xf32, #tpu.memory_space<vmem>>, vector<1x96x84xf32>
    %84 = vector.shape_cast %83 : vector<1x96x84xf32> to vector<96x84xf32>
    %cst_64 = arith.constant dense<0.000000e+00> : vector<7x84xf32>
    %85 = tpu.matmul %82, %84, %cst_64 {dimension_numbers = #tpu.dot_dimension_numbers<[1], [0], [0], [1], [0, 0, 1, 1], [], []>} : vector<7x96xf32>, vector<96x84xf32>, vector<7x84xf32> -> vector<7x84xf32>
    %86 = vector.extract_strided_slice %5 {offsets = [0, 0], sizes = [7, 96], strides = [1, 1]} : vector<8x96xf32> to vector<7x96xf32>
    %c6_65 = arith.constant 6 : index
    %c0_66 = arith.constant 0 : index
    %c0_67 = arith.constant 0 : index
    %87 = vector.load %arg5[%c6_65, %c0_66, %c0_67] : memref<10x96x84xf32, #tpu.memory_space<vmem>>, vector<1x96x84xf32>
    %88 = vector.shape_cast %87 : vector<1x96x84xf32> to vector<96x84xf32>
    %cst_68 = arith.constant dense<0.000000e+00> : vector<7x84xf32>
    %89 = tpu.matmul %86, %88, %cst_68 {dimension_numbers = #tpu.dot_dimension_numbers<[1], [0], [0], [1], [0, 0, 1, 1], [], []>} : vector<7x96xf32>, vector<96x84xf32>, vector<7x84xf32> -> vector<7x84xf32>
    %90 = arith.addf %85, %89 : vector<7x84xf32>
    %91 = vector.extract_strided_slice %7 {offsets = [0, 0], sizes = [7, 96], strides = [1, 1]} : vector<8x96xf32> to vector<7x96xf32>
    %c7_69 = arith.constant 7 : index
    %c0_70 = arith.constant 0 : index
    %c0_71 = arith.constant 0 : index
    %92 = vector.load %arg5[%c7_69, %c0_70, %c0_71] : memref<10x96x84xf32, #tpu.memory_space<vmem>>, vector<1x96x84xf32>
    %93 = vector.shape_cast %92 : vector<1x96x84xf32> to vector<96x84xf32>
    %cst_72 = arith.constant dense<0.000000e+00> : vector<7x84xf32>
    %94 = tpu.matmul %91, %93, %cst_72 {dimension_numbers = #tpu.dot_dimension_numbers<[1], [0], [0], [1], [0, 0, 1, 1], [], []>} : vector<7x96xf32>, vector<96x84xf32>, vector<7x84xf32> -> vector<7x84xf32>
    %95 = arith.addf %90, %94 : vector<7x84xf32>
    %96 = vector.extract_strided_slice %1 {offsets = [1, 0], sizes = [7, 96], strides = [1, 1]} : vector<8x96xf32> to vector<7x96xf32>
    %c8_73 = arith.constant 8 : index
    %c0_74 = arith.constant 0 : index
    %c0_75 = arith.constant 0 : index
    %97 = vector.load %arg5[%c8_73, %c0_74, %c0_75] : memref<10x96x84xf32, #tpu.memory_space<vmem>>, vector<1x96x84xf32>
    %98 = vector.shape_cast %97 : vector<1x96x84xf32> to vector<96x84xf32>
    %cst_76 = arith.constant dense<0.000000e+00> : vector<7x84xf32>
    %99 = tpu.matmul %96, %98, %cst_76 {dimension_numbers = #tpu.dot_dimension_numbers<[1], [0], [0], [1], [0, 0, 1, 1], [], []>} : vector<7x96xf32>, vector<96x84xf32>, vector<7x84xf32> -> vector<7x84xf32>
    %100 = arith.addf %95, %99 : vector<7x84xf32>
    %101 = vector.extract_strided_slice %3 {offsets = [1, 0], sizes = [7, 96], strides = [1, 1]} : vector<8x96xf32> to vector<7x96xf32>
    %c9_77 = arith.constant 9 : index
    %c0_78 = arith.constant 0 : index
    %c0_79 = arith.constant 0 : index
    %102 = vector.load %arg5[%c9_77, %c0_78, %c0_79] : memref<10x96x84xf32, #tpu.memory_space<vmem>>, vector<1x96x84xf32>
    %103 = vector.shape_cast %102 : vector<1x96x84xf32> to vector<96x84xf32>
    %cst_80 = arith.constant dense<0.000000e+00> : vector<7x84xf32>
    %104 = tpu.matmul %101, %103, %cst_80 {dimension_numbers = #tpu.dot_dimension_numbers<[1], [0], [0], [1], [0, 0, 1, 1], [], []>} : vector<7x96xf32>, vector<96x84xf32>, vector<7x84xf32> -> vector<7x84xf32>
    %105 = arith.addf %100, %104 : vector<7x84xf32>
    %106 = arith.maximumf %81, %105 : vector<7x84xf32>
    %c0_81 = arith.constant 0 : index
    %c0_82 = arith.constant 0 : index
    %107 = vector.load %arg6[%c0_81, %c0_82] : memref<1x84xf32, #tpu.memory_space<vmem>>, vector<1x84xf32>
    %108 = vector.broadcast %107 : vector<1x84xf32> to vector<7x84xf32>
    %109 = arith.addf %106, %108 : vector<7x84xf32>
    %cst_83 = arith.constant 0.000000e+00 : f32
    %110 = vector.broadcast %cst_83 : f32 to vector<7x84xf32>
    %111 = arith.maximumf %109, %110 : vector<7x84xf32>
    %112 = vector.extract_strided_slice %5 {offsets = [0, 0], sizes = [7, 96], strides = [1, 1]} : vector<8x96xf32> to vector<7x96xf32>
    %c0_84 = arith.constant 0 : index
    %c0_85 = arith.constant 0 : index
    %c0_86 = arith.constant 0 : index
    %113 = vector.load %arg5[%c0_84, %c0_85, %c0_86] : memref<10x96x84xf32, #tpu.memory_space<vmem>>, vector<1x96x84xf32>
    %114 = vector.shape_cast %113 : vector<1x96x84xf32> to vector<96x84xf32>
    %cst_87 = arith.constant dense<0.000000e+00> : vector<7x84xf32>
    %115 = tpu.matmul %112, %114, %cst_87 {dimension_numbers = #tpu.dot_dimension_numbers<[1], [0], [0], [1], [0, 0, 1, 1], [], []>} : vector<7x96xf32>, vector<96x84xf32>, vector<7x84xf32> -> vector<7x84xf32>
    %116 = vector.extract_strided_slice %7 {offsets = [0, 0], sizes = [7, 96], strides = [1, 1]} : vector<8x96xf32> to vector<7x96xf32>
    %c1_88 = arith.constant 1 : index
    %c0_89 = arith.constant 0 : index
    %c0_90 = arith.constant 0 : index
    %117 = vector.load %arg5[%c1_88, %c0_89, %c0_90] : memref<10x96x84xf32, #tpu.memory_space<vmem>>, vector<1x96x84xf32>
    %118 = vector.shape_cast %117 : vector<1x96x84xf32> to vector<96x84xf32>
    %cst_91 = arith.constant dense<0.000000e+00> : vector<7x84xf32>
    %119 = tpu.matmul %116, %118, %cst_91 {dimension_numbers = #tpu.dot_dimension_numbers<[1], [0], [0], [1], [0, 0, 1, 1], [], []>} : vector<7x96xf32>, vector<96x84xf32>, vector<7x84xf32> -> vector<7x84xf32>
    %120 = arith.addf %115, %119 : vector<7x84xf32>
    %121 = vector.extract_strided_slice %1 {offsets = [1, 0], sizes = [7, 96], strides = [1, 1]} : vector<8x96xf32> to vector<7x96xf32>
    %c2_92 = arith.constant 2 : index
    %c0_93 = arith.constant 0 : index
    %c0_94 = arith.constant 0 : index
    %122 = vector.load %arg5[%c2_92, %c0_93, %c0_94] : memref<10x96x84xf32, #tpu.memory_space<vmem>>, vector<1x96x84xf32>
    %123 = vector.shape_cast %122 : vector<1x96x84xf32> to vector<96x84xf32>
    %cst_95 = arith.constant dense<0.000000e+00> : vector<7x84xf32>
    %124 = tpu.matmul %121, %123, %cst_95 {dimension_numbers = #tpu.dot_dimension_numbers<[1], [0], [0], [1], [0, 0, 1, 1], [], []>} : vector<7x96xf32>, vector<96x84xf32>, vector<7x84xf32> -> vector<7x84xf32>
    %125 = arith.addf %120, %124 : vector<7x84xf32>
    %126 = vector.extract_strided_slice %3 {offsets = [1, 0], sizes = [7, 96], strides = [1, 1]} : vector<8x96xf32> to vector<7x96xf32>
    %c3_96 = arith.constant 3 : index
    %c0_97 = arith.constant 0 : index
    %c0_98 = arith.constant 0 : index
    %127 = vector.load %arg5[%c3_96, %c0_97, %c0_98] : memref<10x96x84xf32, #tpu.memory_space<vmem>>, vector<1x96x84xf32>
    %128 = vector.shape_cast %127 : vector<1x96x84xf32> to vector<96x84xf32>
    %cst_99 = arith.constant dense<0.000000e+00> : vector<7x84xf32>
    %129 = tpu.matmul %126, %128, %cst_99 {dimension_numbers = #tpu.dot_dimension_numbers<[1], [0], [0], [1], [0, 0, 1, 1], [], []>} : vector<7x96xf32>, vector<96x84xf32>, vector<7x84xf32> -> vector<7x84xf32>
    %130 = arith.addf %125, %129 : vector<7x84xf32>
    %131 = vector.extract_strided_slice %5 {offsets = [1, 0], sizes = [7, 96], strides = [1, 1]} : vector<8x96xf32> to vector<7x96xf32>
    %c4_100 = arith.constant 4 : index
    %c0_101 = arith.constant 0 : index
    %c0_102 = arith.constant 0 : index
    %132 = vector.load %arg5[%c4_100, %c0_101, %c0_102] : memref<10x96x84xf32, #tpu.memory_space<vmem>>, vector<1x96x84xf32>
    %133 = vector.shape_cast %132 : vector<1x96x84xf32> to vector<96x84xf32>
    %cst_103 = arith.constant dense<0.000000e+00> : vector<7x84xf32>
    %134 = tpu.matmul %131, %133, %cst_103 {dimension_numbers = #tpu.dot_dimension_numbers<[1], [0], [0], [1], [0, 0, 1, 1], [], []>} : vector<7x96xf32>, vector<96x84xf32>, vector<7x84xf32> -> vector<7x84xf32>
    %135 = arith.addf %130, %134 : vector<7x84xf32>
    %136 = vector.extract_strided_slice %5 {offsets = [0, 0], sizes = [7, 96], strides = [1, 1]} : vector<8x96xf32> to vector<7x96xf32>
    %c5_104 = arith.constant 5 : index
    %c0_105 = arith.constant 0 : index
    %c0_106 = arith.constant 0 : index
    %137 = vector.load %arg5[%c5_104, %c0_105, %c0_106] : memref<10x96x84xf32, #tpu.memory_space<vmem>>, vector<1x96x84xf32>
    %138 = vector.shape_cast %137 : vector<1x96x84xf32> to vector<96x84xf32>
    %cst_107 = arith.constant dense<0.000000e+00> : vector<7x84xf32>
    %139 = tpu.matmul %136, %138, %cst_107 {dimension_numbers = #tpu.dot_dimension_numbers<[1], [0], [0], [1], [0, 0, 1, 1], [], []>} : vector<7x96xf32>, vector<96x84xf32>, vector<7x84xf32> -> vector<7x84xf32>
    %140 = vector.extract_strided_slice %7 {offsets = [0, 0], sizes = [7, 96], strides = [1, 1]} : vector<8x96xf32> to vector<7x96xf32>
    %c6_108 = arith.constant 6 : index
    %c0_109 = arith.constant 0 : index
    %c0_110 = arith.constant 0 : index
    %141 = vector.load %arg5[%c6_108, %c0_109, %c0_110] : memref<10x96x84xf32, #tpu.memory_space<vmem>>, vector<1x96x84xf32>
    %142 = vector.shape_cast %141 : vector<1x96x84xf32> to vector<96x84xf32>
    %cst_111 = arith.constant dense<0.000000e+00> : vector<7x84xf32>
    %143 = tpu.matmul %140, %142, %cst_111 {dimension_numbers = #tpu.dot_dimension_numbers<[1], [0], [0], [1], [0, 0, 1, 1], [], []>} : vector<7x96xf32>, vector<96x84xf32>, vector<7x84xf32> -> vector<7x84xf32>
    %144 = arith.addf %139, %143 : vector<7x84xf32>
    %145 = vector.extract_strided_slice %1 {offsets = [1, 0], sizes = [7, 96], strides = [1, 1]} : vector<8x96xf32> to vector<7x96xf32>
    %c7_112 = arith.constant 7 : index
    %c0_113 = arith.constant 0 : index
    %c0_114 = arith.constant 0 : index
    %146 = vector.load %arg5[%c7_112, %c0_113, %c0_114] : memref<10x96x84xf32, #tpu.memory_space<vmem>>, vector<1x96x84xf32>
    %147 = vector.shape_cast %146 : vector<1x96x84xf32> to vector<96x84xf32>
    %cst_115 = arith.constant dense<0.000000e+00> : vector<7x84xf32>
    %148 = tpu.matmul %145, %147, %cst_115 {dimension_numbers = #tpu.dot_dimension_numbers<[1], [0], [0], [1], [0, 0, 1, 1], [], []>} : vector<7x96xf32>, vector<96x84xf32>, vector<7x84xf32> -> vector<7x84xf32>
    %149 = arith.addf %144, %148 : vector<7x84xf32>
    %150 = vector.extract_strided_slice %3 {offsets = [1, 0], sizes = [7, 96], strides = [1, 1]} : vector<8x96xf32> to vector<7x96xf32>
    %c8_116 = arith.constant 8 : index
    %c0_117 = arith.constant 0 : index
    %c0_118 = arith.constant 0 : index
    %151 = vector.load %arg5[%c8_116, %c0_117, %c0_118] : memref<10x96x84xf32, #tpu.memory_space<vmem>>, vector<1x96x84xf32>
    %152 = vector.shape_cast %151 : vector<1x96x84xf32> to vector<96x84xf32>
    %cst_119 = arith.constant dense<0.000000e+00> : vector<7x84xf32>
    %153 = tpu.matmul %150, %152, %cst_119 {dimension_numbers = #tpu.dot_dimension_numbers<[1], [0], [0], [1], [0, 0, 1, 1], [], []>} : vector<7x96xf32>, vector<96x84xf32>, vector<7x84xf32> -> vector<7x84xf32>
    %154 = arith.addf %149, %153 : vector<7x84xf32>
    %155 = vector.extract_strided_slice %5 {offsets = [1, 0], sizes = [7, 96], strides = [1, 1]} : vector<8x96xf32> to vector<7x96xf32>
    %c9_120 = arith.constant 9 : index
    %c0_121 = arith.constant 0 : index
    %c0_122 = arith.constant 0 : index
    %156 = vector.load %arg5[%c9_120, %c0_121, %c0_122] : memref<10x96x84xf32, #tpu.memory_space<vmem>>, vector<1x96x84xf32>
    %157 = vector.shape_cast %156 : vector<1x96x84xf32> to vector<96x84xf32>
    %cst_123 = arith.constant dense<0.000000e+00> : vector<7x84xf32>
    %158 = tpu.matmul %155, %157, %cst_123 {dimension_numbers = #tpu.dot_dimension_numbers<[1], [0], [0], [1], [0, 0, 1, 1], [], []>} : vector<7x96xf32>, vector<96x84xf32>, vector<7x84xf32> -> vector<7x84xf32>
    %159 = arith.addf %154, %158 : vector<7x84xf32>
    %160 = arith.maximumf %135, %159 : vector<7x84xf32>
    %161 = vector.extract_strided_slice %7 {offsets = [0, 0], sizes = [7, 96], strides = [1, 1]} : vector<8x96xf32> to vector<7x96xf32>
    %c0_124 = arith.constant 0 : index
    %c0_125 = arith.constant 0 : index
    %c0_126 = arith.constant 0 : index
    %162 = vector.load %arg5[%c0_124, %c0_125, %c0_126] : memref<10x96x84xf32, #tpu.memory_space<vmem>>, vector<1x96x84xf32>
    %163 = vector.shape_cast %162 : vector<1x96x84xf32> to vector<96x84xf32>
    %cst_127 = arith.constant dense<0.000000e+00> : vector<7x84xf32>
    %164 = tpu.matmul %161, %163, %cst_127 {dimension_numbers = #tpu.dot_dimension_numbers<[1], [0], [0], [1], [0, 0, 1, 1], [], []>} : vector<7x96xf32>, vector<96x84xf32>, vector<7x84xf32> -> vector<7x84xf32>
    %165 = vector.extract_strided_slice %1 {offsets = [1, 0], sizes = [7, 96], strides = [1, 1]} : vector<8x96xf32> to vector<7x96xf32>
    %c1_128 = arith.constant 1 : index
    %c0_129 = arith.constant 0 : index
    %c0_130 = arith.constant 0 : index
    %166 = vector.load %arg5[%c1_128, %c0_129, %c0_130] : memref<10x96x84xf32, #tpu.memory_space<vmem>>, vector<1x96x84xf32>
    %167 = vector.shape_cast %166 : vector<1x96x84xf32> to vector<96x84xf32>
    %cst_131 = arith.constant dense<0.000000e+00> : vector<7x84xf32>
    %168 = tpu.matmul %165, %167, %cst_131 {dimension_numbers = #tpu.dot_dimension_numbers<[1], [0], [0], [1], [0, 0, 1, 1], [], []>} : vector<7x96xf32>, vector<96x84xf32>, vector<7x84xf32> -> vector<7x84xf32>
    %169 = arith.addf %164, %168 : vector<7x84xf32>
    %170 = vector.extract_strided_slice %3 {offsets = [1, 0], sizes = [7, 96], strides = [1, 1]} : vector<8x96xf32> to vector<7x96xf32>
    %c2_132 = arith.constant 2 : index
    %c0_133 = arith.constant 0 : index
    %c0_134 = arith.constant 0 : index
    %171 = vector.load %arg5[%c2_132, %c0_133, %c0_134] : memref<10x96x84xf32, #tpu.memory_space<vmem>>, vector<1x96x84xf32>
    %172 = vector.shape_cast %171 : vector<1x96x84xf32> to vector<96x84xf32>
    %cst_135 = arith.constant dense<0.000000e+00> : vector<7x84xf32>
    %173 = tpu.matmul %170, %172, %cst_135 {dimension_numbers = #tpu.dot_dimension_numbers<[1], [0], [0], [1], [0, 0, 1, 1], [], []>} : vector<7x96xf32>, vector<96x84xf32>, vector<7x84xf32> -> vector<7x84xf32>
    %174 = arith.addf %169, %173 : vector<7x84xf32>
    %175 = vector.extract_strided_slice %5 {offsets = [1, 0], sizes = [7, 96], strides = [1, 1]} : vector<8x96xf32> to vector<7x96xf32>
    %c3_136 = arith.constant 3 : index
    %c0_137 = arith.constant 0 : index
    %c0_138 = arith.constant 0 : index
    %176 = vector.load %arg5[%c3_136, %c0_137, %c0_138] : memref<10x96x84xf32, #tpu.memory_space<vmem>>, vector<1x96x84xf32>
    %177 = vector.shape_cast %176 : vector<1x96x84xf32> to vector<96x84xf32>
    %cst_139 = arith.constant dense<0.000000e+00> : vector<7x84xf32>
    %178 = tpu.matmul %175, %177, %cst_139 {dimension_numbers = #tpu.dot_dimension_numbers<[1], [0], [0], [1], [0, 0, 1, 1], [], []>} : vector<7x96xf32>, vector<96x84xf32>, vector<7x84xf32> -> vector<7x84xf32>
    %179 = arith.addf %174, %178 : vector<7x84xf32>
    %180 = vector.extract_strided_slice %7 {offsets = [1, 0], sizes = [7, 96], strides = [1, 1]} : vector<8x96xf32> to vector<7x96xf32>
    %c4_140 = arith.constant 4 : index
    %c0_141 = arith.constant 0 : index
    %c0_142 = arith.constant 0 : index
    %181 = vector.load %arg5[%c4_140, %c0_141, %c0_142] : memref<10x96x84xf32, #tpu.memory_space<vmem>>, vector<1x96x84xf32>
    %182 = vector.shape_cast %181 : vector<1x96x84xf32> to vector<96x84xf32>
    %cst_143 = arith.constant dense<0.000000e+00> : vector<7x84xf32>
    %183 = tpu.matmul %180, %182, %cst_143 {dimension_numbers = #tpu.dot_dimension_numbers<[1], [0], [0], [1], [0, 0, 1, 1], [], []>} : vector<7x96xf32>, vector<96x84xf32>, vector<7x84xf32> -> vector<7x84xf32>
    %184 = arith.addf %179, %183 : vector<7x84xf32>
    %185 = arith.maximumf %160, %184 : vector<7x84xf32>
    %186 = vector.extract_strided_slice %7 {offsets = [0, 0], sizes = [7, 96], strides = [1, 1]} : vector<8x96xf32> to vector<7x96xf32>
    %c5_144 = arith.constant 5 : index
    %c0_145 = arith.constant 0 : index
    %c0_146 = arith.constant 0 : index
    %187 = vector.load %arg5[%c5_144, %c0_145, %c0_146] : memref<10x96x84xf32, #tpu.memory_space<vmem>>, vector<1x96x84xf32>
    %188 = vector.shape_cast %187 : vector<1x96x84xf32> to vector<96x84xf32>
    %cst_147 = arith.constant dense<0.000000e+00> : vector<7x84xf32>
    %189 = tpu.matmul %186, %188, %cst_147 {dimension_numbers = #tpu.dot_dimension_numbers<[1], [0], [0], [1], [0, 0, 1, 1], [], []>} : vector<7x96xf32>, vector<96x84xf32>, vector<7x84xf32> -> vector<7x84xf32>
    %190 = vector.extract_strided_slice %1 {offsets = [1, 0], sizes = [7, 96], strides = [1, 1]} : vector<8x96xf32> to vector<7x96xf32>
    %c6_148 = arith.constant 6 : index
    %c0_149 = arith.constant 0 : index
    %c0_150 = arith.constant 0 : index
    %191 = vector.load %arg5[%c6_148, %c0_149, %c0_150] : memref<10x96x84xf32, #tpu.memory_space<vmem>>, vector<1x96x84xf32>
    %192 = vector.shape_cast %191 : vector<1x96x84xf32> to vector<96x84xf32>
    %cst_151 = arith.constant dense<0.000000e+00> : vector<7x84xf32>
    %193 = tpu.matmul %190, %192, %cst_151 {dimension_numbers = #tpu.dot_dimension_numbers<[1], [0], [0], [1], [0, 0, 1, 1], [], []>} : vector<7x96xf32>, vector<96x84xf32>, vector<7x84xf32> -> vector<7x84xf32>
    %194 = arith.addf %189, %193 : vector<7x84xf32>
    %195 = vector.extract_strided_slice %3 {offsets = [1, 0], sizes = [7, 96], strides = [1, 1]} : vector<8x96xf32> to vector<7x96xf32>
    %c7_152 = arith.constant 7 : index
    %c0_153 = arith.constant 0 : index
    %c0_154 = arith.constant 0 : index
    %196 = vector.load %arg5[%c7_152, %c0_153, %c0_154] : memref<10x96x84xf32, #tpu.memory_space<vmem>>, vector<1x96x84xf32>
    %197 = vector.shape_cast %196 : vector<1x96x84xf32> to vector<96x84xf32>
    %cst_155 = arith.constant dense<0.000000e+00> : vector<7x84xf32>
    %198 = tpu.matmul %195, %197, %cst_155 {dimension_numbers = #tpu.dot_dimension_numbers<[1], [0], [0], [1], [0, 0, 1, 1], [], []>} : vector<7x96xf32>, vector<96x84xf32>, vector<7x84xf32> -> vector<7x84xf32>
    %199 = arith.addf %194, %198 : vector<7x84xf32>
    %200 = vector.extract_strided_slice %5 {offsets = [1, 0], sizes = [7, 96], strides = [1, 1]} : vector<8x96xf32> to vector<7x96xf32>
    %c8_156 = arith.constant 8 : index
    %c0_157 = arith.constant 0 : index
    %c0_158 = arith.constant 0 : index
    %201 = vector.load %arg5[%c8_156, %c0_157, %c0_158] : memref<10x96x84xf32, #tpu.memory_space<vmem>>, vector<1x96x84xf32>
    %202 = vector.shape_cast %201 : vector<1x96x84xf32> to vector<96x84xf32>
    %cst_159 = arith.constant dense<0.000000e+00> : vector<7x84xf32>
    %203 = tpu.matmul %200, %202, %cst_159 {dimension_numbers = #tpu.dot_dimension_numbers<[1], [0], [0], [1], [0, 0, 1, 1], [], []>} : vector<7x96xf32>, vector<96x84xf32>, vector<7x84xf32> -> vector<7x84xf32>
    %204 = arith.addf %199, %203 : vector<7x84xf32>
    %205 = vector.extract_strided_slice %7 {offsets = [1, 0], sizes = [7, 96], strides = [1, 1]} : vector<8x96xf32> to vector<7x96xf32>
    %c9_160 = arith.constant 9 : index
    %c0_161 = arith.constant 0 : index
    %c0_162 = arith.constant 0 : index
    %206 = vector.load %arg5[%c9_160, %c0_161, %c0_162] : memref<10x96x84xf32, #tpu.memory_space<vmem>>, vector<1x96x84xf32>
    %207 = vector.shape_cast %206 : vector<1x96x84xf32> to vector<96x84xf32>
    %cst_163 = arith.constant dense<0.000000e+00> : vector<7x84xf32>
    %208 = tpu.matmul %205, %207, %cst_163 {dimension_numbers = #tpu.dot_dimension_numbers<[1], [0], [0], [1], [0, 0, 1, 1], [], []>} : vector<7x96xf32>, vector<96x84xf32>, vector<7x84xf32> -> vector<7x84xf32>
    %209 = arith.addf %204, %208 : vector<7x84xf32>
    %210 = arith.maximumf %185, %209 : vector<7x84xf32>
    %c0_164 = arith.constant 0 : index
    %c0_165 = arith.constant 0 : index
    %211 = vector.load %arg6[%c0_164, %c0_165] : memref<1x84xf32, #tpu.memory_space<vmem>>, vector<1x84xf32>
    %212 = vector.broadcast %211 : vector<1x84xf32> to vector<7x84xf32>
    %213 = arith.addf %210, %212 : vector<7x84xf32>
    %cst_166 = arith.constant 0.000000e+00 : f32
    %214 = vector.broadcast %cst_166 : f32 to vector<7x84xf32>
    %215 = arith.maximumf %213, %214 : vector<7x84xf32>
    %216 = vector.extract_strided_slice %111 {offsets = [0, 0], sizes = [5, 84], strides = [1, 1]} : vector<7x84xf32> to vector<5x84xf32>
    %c0_167 = arith.constant 0 : index
    %c0_168 = arith.constant 0 : index
    %c0_169 = arith.constant 0 : index
    %217 = vector.load %arg7[%c0_167, %c0_168, %c0_169] : memref<10x84x80xf32, #tpu.memory_space<vmem>>, vector<1x84x80xf32>
    %218 = vector.shape_cast %217 : vector<1x84x80xf32> to vector<84x80xf32>
    %cst_170 = arith.constant dense<0.000000e+00> : vector<5x80xf32>
    %219 = tpu.matmul %216, %218, %cst_170 {dimension_numbers = #tpu.dot_dimension_numbers<[1], [0], [0], [1], [0, 0, 1, 1], [], []>} : vector<5x84xf32>, vector<84x80xf32>, vector<5x80xf32> -> vector<5x80xf32>
    %220 = vector.extract_strided_slice %215 {offsets = [0, 0], sizes = [5, 84], strides = [1, 1]} : vector<7x84xf32> to vector<5x84xf32>
    %c1_171 = arith.constant 1 : index
    %c0_172 = arith.constant 0 : index
    %c0_173 = arith.constant 0 : index
    %221 = vector.load %arg7[%c1_171, %c0_172, %c0_173] : memref<10x84x80xf32, #tpu.memory_space<vmem>>, vector<1x84x80xf32>
    %222 = vector.shape_cast %221 : vector<1x84x80xf32> to vector<84x80xf32>
    %cst_174 = arith.constant dense<0.000000e+00> : vector<5x80xf32>
    %223 = tpu.matmul %220, %222, %cst_174 {dimension_numbers = #tpu.dot_dimension_numbers<[1], [0], [0], [1], [0, 0, 1, 1], [], []>} : vector<5x84xf32>, vector<84x80xf32>, vector<5x80xf32> -> vector<5x80xf32>
    %224 = arith.addf %219, %223 : vector<5x80xf32>
    %225 = vector.extract_strided_slice %111 {offsets = [1, 0], sizes = [5, 84], strides = [1, 1]} : vector<7x84xf32> to vector<5x84xf32>
    %c2_175 = arith.constant 2 : index
    %c0_176 = arith.constant 0 : index
    %c0_177 = arith.constant 0 : index
    %226 = vector.load %arg7[%c2_175, %c0_176, %c0_177] : memref<10x84x80xf32, #tpu.memory_space<vmem>>, vector<1x84x80xf32>
    %227 = vector.shape_cast %226 : vector<1x84x80xf32> to vector<84x80xf32>
    %cst_178 = arith.constant dense<0.000000e+00> : vector<5x80xf32>
    %228 = tpu.matmul %225, %227, %cst_178 {dimension_numbers = #tpu.dot_dimension_numbers<[1], [0], [0], [1], [0, 0, 1, 1], [], []>} : vector<5x84xf32>, vector<84x80xf32>, vector<5x80xf32> -> vector<5x80xf32>
    %229 = arith.addf %224, %228 : vector<5x80xf32>
    %230 = vector.extract_strided_slice %215 {offsets = [1, 0], sizes = [5, 84], strides = [1, 1]} : vector<7x84xf32> to vector<5x84xf32>
    %c3_179 = arith.constant 3 : index
    %c0_180 = arith.constant 0 : index
    %c0_181 = arith.constant 0 : index
    %231 = vector.load %arg7[%c3_179, %c0_180, %c0_181] : memref<10x84x80xf32, #tpu.memory_space<vmem>>, vector<1x84x80xf32>
    %232 = vector.shape_cast %231 : vector<1x84x80xf32> to vector<84x80xf32>
    %cst_182 = arith.constant dense<0.000000e+00> : vector<5x80xf32>
    %233 = tpu.matmul %230, %232, %cst_182 {dimension_numbers = #tpu.dot_dimension_numbers<[1], [0], [0], [1], [0, 0, 1, 1], [], []>} : vector<5x84xf32>, vector<84x80xf32>, vector<5x80xf32> -> vector<5x80xf32>
    %234 = arith.addf %229, %233 : vector<5x80xf32>
    %235 = vector.extract_strided_slice %111 {offsets = [2, 0], sizes = [5, 84], strides = [1, 1]} : vector<7x84xf32> to vector<5x84xf32>
    %c4_183 = arith.constant 4 : index
    %c0_184 = arith.constant 0 : index
    %c0_185 = arith.constant 0 : index
    %236 = vector.load %arg7[%c4_183, %c0_184, %c0_185] : memref<10x84x80xf32, #tpu.memory_space<vmem>>, vector<1x84x80xf32>
    %237 = vector.shape_cast %236 : vector<1x84x80xf32> to vector<84x80xf32>
    %cst_186 = arith.constant dense<0.000000e+00> : vector<5x80xf32>
    %238 = tpu.matmul %235, %237, %cst_186 {dimension_numbers = #tpu.dot_dimension_numbers<[1], [0], [0], [1], [0, 0, 1, 1], [], []>} : vector<5x84xf32>, vector<84x80xf32>, vector<5x80xf32> -> vector<5x80xf32>
    %239 = arith.addf %234, %238 : vector<5x80xf32>
    %240 = vector.extract_strided_slice %111 {offsets = [0, 0], sizes = [5, 84], strides = [1, 1]} : vector<7x84xf32> to vector<5x84xf32>
    %c5_187 = arith.constant 5 : index
    %c0_188 = arith.constant 0 : index
    %c0_189 = arith.constant 0 : index
    %241 = vector.load %arg7[%c5_187, %c0_188, %c0_189] : memref<10x84x80xf32, #tpu.memory_space<vmem>>, vector<1x84x80xf32>
    %242 = vector.shape_cast %241 : vector<1x84x80xf32> to vector<84x80xf32>
    %cst_190 = arith.constant dense<0.000000e+00> : vector<5x80xf32>
    %243 = tpu.matmul %240, %242, %cst_190 {dimension_numbers = #tpu.dot_dimension_numbers<[1], [0], [0], [1], [0, 0, 1, 1], [], []>} : vector<5x84xf32>, vector<84x80xf32>, vector<5x80xf32> -> vector<5x80xf32>
    %244 = vector.extract_strided_slice %215 {offsets = [0, 0], sizes = [5, 84], strides = [1, 1]} : vector<7x84xf32> to vector<5x84xf32>
    %c6_191 = arith.constant 6 : index
    %c0_192 = arith.constant 0 : index
    %c0_193 = arith.constant 0 : index
    %245 = vector.load %arg7[%c6_191, %c0_192, %c0_193] : memref<10x84x80xf32, #tpu.memory_space<vmem>>, vector<1x84x80xf32>
    %246 = vector.shape_cast %245 : vector<1x84x80xf32> to vector<84x80xf32>
    %cst_194 = arith.constant dense<0.000000e+00> : vector<5x80xf32>
    %247 = tpu.matmul %244, %246, %cst_194 {dimension_numbers = #tpu.dot_dimension_numbers<[1], [0], [0], [1], [0, 0, 1, 1], [], []>} : vector<5x84xf32>, vector<84x80xf32>, vector<5x80xf32> -> vector<5x80xf32>
    %248 = arith.addf %243, %247 : vector<5x80xf32>
    %249 = vector.extract_strided_slice %111 {offsets = [1, 0], sizes = [5, 84], strides = [1, 1]} : vector<7x84xf32> to vector<5x84xf32>
    %c7_195 = arith.constant 7 : index
    %c0_196 = arith.constant 0 : index
    %c0_197 = arith.constant 0 : index
    %250 = vector.load %arg7[%c7_195, %c0_196, %c0_197] : memref<10x84x80xf32, #tpu.memory_space<vmem>>, vector<1x84x80xf32>
    %251 = vector.shape_cast %250 : vector<1x84x80xf32> to vector<84x80xf32>
    %cst_198 = arith.constant dense<0.000000e+00> : vector<5x80xf32>
    %252 = tpu.matmul %249, %251, %cst_198 {dimension_numbers = #tpu.dot_dimension_numbers<[1], [0], [0], [1], [0, 0, 1, 1], [], []>} : vector<5x84xf32>, vector<84x80xf32>, vector<5x80xf32> -> vector<5x80xf32>
    %253 = arith.addf %248, %252 : vector<5x80xf32>
    %254 = vector.extract_strided_slice %215 {offsets = [1, 0], sizes = [5, 84], strides = [1, 1]} : vector<7x84xf32> to vector<5x84xf32>
    %c8_199 = arith.constant 8 : index
    %c0_200 = arith.constant 0 : index
    %c0_201 = arith.constant 0 : index
    %255 = vector.load %arg7[%c8_199, %c0_200, %c0_201] : memref<10x84x80xf32, #tpu.memory_space<vmem>>, vector<1x84x80xf32>
    %256 = vector.shape_cast %255 : vector<1x84x80xf32> to vector<84x80xf32>
    %cst_202 = arith.constant dense<0.000000e+00> : vector<5x80xf32>
    %257 = tpu.matmul %254, %256, %cst_202 {dimension_numbers = #tpu.dot_dimension_numbers<[1], [0], [0], [1], [0, 0, 1, 1], [], []>} : vector<5x84xf32>, vector<84x80xf32>, vector<5x80xf32> -> vector<5x80xf32>
    %258 = arith.addf %253, %257 : vector<5x80xf32>
    %259 = vector.extract_strided_slice %111 {offsets = [2, 0], sizes = [5, 84], strides = [1, 1]} : vector<7x84xf32> to vector<5x84xf32>
    %c9_203 = arith.constant 9 : index
    %c0_204 = arith.constant 0 : index
    %c0_205 = arith.constant 0 : index
    %260 = vector.load %arg7[%c9_203, %c0_204, %c0_205] : memref<10x84x80xf32, #tpu.memory_space<vmem>>, vector<1x84x80xf32>
    %261 = vector.shape_cast %260 : vector<1x84x80xf32> to vector<84x80xf32>
    %cst_206 = arith.constant dense<0.000000e+00> : vector<5x80xf32>
    %262 = tpu.matmul %259, %261, %cst_206 {dimension_numbers = #tpu.dot_dimension_numbers<[1], [0], [0], [1], [0, 0, 1, 1], [], []>} : vector<5x84xf32>, vector<84x80xf32>, vector<5x80xf32> -> vector<5x80xf32>
    %263 = arith.addf %258, %262 : vector<5x80xf32>
    %264 = arith.maximumf %239, %263 : vector<5x80xf32>
    %265 = vector.extract_strided_slice %215 {offsets = [0, 0], sizes = [5, 84], strides = [1, 1]} : vector<7x84xf32> to vector<5x84xf32>
    %c0_207 = arith.constant 0 : index
    %c0_208 = arith.constant 0 : index
    %c0_209 = arith.constant 0 : index
    %266 = vector.load %arg7[%c0_207, %c0_208, %c0_209] : memref<10x84x80xf32, #tpu.memory_space<vmem>>, vector<1x84x80xf32>
    %267 = vector.shape_cast %266 : vector<1x84x80xf32> to vector<84x80xf32>
    %cst_210 = arith.constant dense<0.000000e+00> : vector<5x80xf32>
    %268 = tpu.matmul %265, %267, %cst_210 {dimension_numbers = #tpu.dot_dimension_numbers<[1], [0], [0], [1], [0, 0, 1, 1], [], []>} : vector<5x84xf32>, vector<84x80xf32>, vector<5x80xf32> -> vector<5x80xf32>
    %269 = vector.extract_strided_slice %111 {offsets = [1, 0], sizes = [5, 84], strides = [1, 1]} : vector<7x84xf32> to vector<5x84xf32>
    %c1_211 = arith.constant 1 : index
    %c0_212 = arith.constant 0 : index
    %c0_213 = arith.constant 0 : index
    %270 = vector.load %arg7[%c1_211, %c0_212, %c0_213] : memref<10x84x80xf32, #tpu.memory_space<vmem>>, vector<1x84x80xf32>
    %271 = vector.shape_cast %270 : vector<1x84x80xf32> to vector<84x80xf32>
    %cst_214 = arith.constant dense<0.000000e+00> : vector<5x80xf32>
    %272 = tpu.matmul %269, %271, %cst_214 {dimension_numbers = #tpu.dot_dimension_numbers<[1], [0], [0], [1], [0, 0, 1, 1], [], []>} : vector<5x84xf32>, vector<84x80xf32>, vector<5x80xf32> -> vector<5x80xf32>
    %273 = arith.addf %268, %272 : vector<5x80xf32>
    %274 = vector.extract_strided_slice %215 {offsets = [1, 0], sizes = [5, 84], strides = [1, 1]} : vector<7x84xf32> to vector<5x84xf32>
    %c2_215 = arith.constant 2 : index
    %c0_216 = arith.constant 0 : index
    %c0_217 = arith.constant 0 : index
    %275 = vector.load %arg7[%c2_215, %c0_216, %c0_217] : memref<10x84x80xf32, #tpu.memory_space<vmem>>, vector<1x84x80xf32>
    %276 = vector.shape_cast %275 : vector<1x84x80xf32> to vector<84x80xf32>
    %cst_218 = arith.constant dense<0.000000e+00> : vector<5x80xf32>
    %277 = tpu.matmul %274, %276, %cst_218 {dimension_numbers = #tpu.dot_dimension_numbers<[1], [0], [0], [1], [0, 0, 1, 1], [], []>} : vector<5x84xf32>, vector<84x80xf32>, vector<5x80xf32> -> vector<5x80xf32>
    %278 = arith.addf %273, %277 : vector<5x80xf32>
    %279 = vector.extract_strided_slice %111 {offsets = [2, 0], sizes = [5, 84], strides = [1, 1]} : vector<7x84xf32> to vector<5x84xf32>
    %c3_219 = arith.constant 3 : index
    %c0_220 = arith.constant 0 : index
    %c0_221 = arith.constant 0 : index
    %280 = vector.load %arg7[%c3_219, %c0_220, %c0_221] : memref<10x84x80xf32, #tpu.memory_space<vmem>>, vector<1x84x80xf32>
    %281 = vector.shape_cast %280 : vector<1x84x80xf32> to vector<84x80xf32>
    %cst_222 = arith.constant dense<0.000000e+00> : vector<5x80xf32>
    %282 = tpu.matmul %279, %281, %cst_222 {dimension_numbers = #tpu.dot_dimension_numbers<[1], [0], [0], [1], [0, 0, 1, 1], [], []>} : vector<5x84xf32>, vector<84x80xf32>, vector<5x80xf32> -> vector<5x80xf32>
    %283 = arith.addf %278, %282 : vector<5x80xf32>
    %284 = vector.extract_strided_slice %215 {offsets = [2, 0], sizes = [5, 84], strides = [1, 1]} : vector<7x84xf32> to vector<5x84xf32>
    %c4_223 = arith.constant 4 : index
    %c0_224 = arith.constant 0 : index
    %c0_225 = arith.constant 0 : index
    %285 = vector.load %arg7[%c4_223, %c0_224, %c0_225] : memref<10x84x80xf32, #tpu.memory_space<vmem>>, vector<1x84x80xf32>
    %286 = vector.shape_cast %285 : vector<1x84x80xf32> to vector<84x80xf32>
    %cst_226 = arith.constant dense<0.000000e+00> : vector<5x80xf32>
    %287 = tpu.matmul %284, %286, %cst_226 {dimension_numbers = #tpu.dot_dimension_numbers<[1], [0], [0], [1], [0, 0, 1, 1], [], []>} : vector<5x84xf32>, vector<84x80xf32>, vector<5x80xf32> -> vector<5x80xf32>
    %288 = arith.addf %283, %287 : vector<5x80xf32>
    %289 = arith.maximumf %264, %288 : vector<5x80xf32>
    %290 = vector.extract_strided_slice %215 {offsets = [0, 0], sizes = [5, 84], strides = [1, 1]} : vector<7x84xf32> to vector<5x84xf32>
    %c5_227 = arith.constant 5 : index
    %c0_228 = arith.constant 0 : index
    %c0_229 = arith.constant 0 : index
    %291 = vector.load %arg7[%c5_227, %c0_228, %c0_229] : memref<10x84x80xf32, #tpu.memory_space<vmem>>, vector<1x84x80xf32>
    %292 = vector.shape_cast %291 : vector<1x84x80xf32> to vector<84x80xf32>
    %cst_230 = arith.constant dense<0.000000e+00> : vector<5x80xf32>
    %293 = tpu.matmul %290, %292, %cst_230 {dimension_numbers = #tpu.dot_dimension_numbers<[1], [0], [0], [1], [0, 0, 1, 1], [], []>} : vector<5x84xf32>, vector<84x80xf32>, vector<5x80xf32> -> vector<5x80xf32>
    %294 = vector.extract_strided_slice %111 {offsets = [1, 0], sizes = [5, 84], strides = [1, 1]} : vector<7x84xf32> to vector<5x84xf32>
    %c6_231 = arith.constant 6 : index
    %c0_232 = arith.constant 0 : index
    %c0_233 = arith.constant 0 : index
    %295 = vector.load %arg7[%c6_231, %c0_232, %c0_233] : memref<10x84x80xf32, #tpu.memory_space<vmem>>, vector<1x84x80xf32>
    %296 = vector.shape_cast %295 : vector<1x84x80xf32> to vector<84x80xf32>
    %cst_234 = arith.constant dense<0.000000e+00> : vector<5x80xf32>
    %297 = tpu.matmul %294, %296, %cst_234 {dimension_numbers = #tpu.dot_dimension_numbers<[1], [0], [0], [1], [0, 0, 1, 1], [], []>} : vector<5x84xf32>, vector<84x80xf32>, vector<5x80xf32> -> vector<5x80xf32>
    %298 = arith.addf %293, %297 : vector<5x80xf32>
    %299 = vector.extract_strided_slice %215 {offsets = [1, 0], sizes = [5, 84], strides = [1, 1]} : vector<7x84xf32> to vector<5x84xf32>
    %c7_235 = arith.constant 7 : index
    %c0_236 = arith.constant 0 : index
    %c0_237 = arith.constant 0 : index
    %300 = vector.load %arg7[%c7_235, %c0_236, %c0_237] : memref<10x84x80xf32, #tpu.memory_space<vmem>>, vector<1x84x80xf32>
    %301 = vector.shape_cast %300 : vector<1x84x80xf32> to vector<84x80xf32>
    %cst_238 = arith.constant dense<0.000000e+00> : vector<5x80xf32>
    %302 = tpu.matmul %299, %301, %cst_238 {dimension_numbers = #tpu.dot_dimension_numbers<[1], [0], [0], [1], [0, 0, 1, 1], [], []>} : vector<5x84xf32>, vector<84x80xf32>, vector<5x80xf32> -> vector<5x80xf32>
    %303 = arith.addf %298, %302 : vector<5x80xf32>
    %304 = vector.extract_strided_slice %111 {offsets = [2, 0], sizes = [5, 84], strides = [1, 1]} : vector<7x84xf32> to vector<5x84xf32>
    %c8_239 = arith.constant 8 : index
    %c0_240 = arith.constant 0 : index
    %c0_241 = arith.constant 0 : index
    %305 = vector.load %arg7[%c8_239, %c0_240, %c0_241] : memref<10x84x80xf32, #tpu.memory_space<vmem>>, vector<1x84x80xf32>
    %306 = vector.shape_cast %305 : vector<1x84x80xf32> to vector<84x80xf32>
    %cst_242 = arith.constant dense<0.000000e+00> : vector<5x80xf32>
    %307 = tpu.matmul %304, %306, %cst_242 {dimension_numbers = #tpu.dot_dimension_numbers<[1], [0], [0], [1], [0, 0, 1, 1], [], []>} : vector<5x84xf32>, vector<84x80xf32>, vector<5x80xf32> -> vector<5x80xf32>
    %308 = arith.addf %303, %307 : vector<5x80xf32>
    %309 = vector.extract_strided_slice %215 {offsets = [2, 0], sizes = [5, 84], strides = [1, 1]} : vector<7x84xf32> to vector<5x84xf32>
    %c9_243 = arith.constant 9 : index
    %c0_244 = arith.constant 0 : index
    %c0_245 = arith.constant 0 : index
    %310 = vector.load %arg7[%c9_243, %c0_244, %c0_245] : memref<10x84x80xf32, #tpu.memory_space<vmem>>, vector<1x84x80xf32>
    %311 = vector.shape_cast %310 : vector<1x84x80xf32> to vector<84x80xf32>
    %cst_246 = arith.constant dense<0.000000e+00> : vector<5x80xf32>
    %312 = tpu.matmul %309, %311, %cst_246 {dimension_numbers = #tpu.dot_dimension_numbers<[1], [0], [0], [1], [0, 0, 1, 1], [], []>} : vector<5x84xf32>, vector<84x80xf32>, vector<5x80xf32> -> vector<5x80xf32>
    %313 = arith.addf %308, %312 : vector<5x80xf32>
    %314 = arith.maximumf %289, %313 : vector<5x80xf32>
    %c0_247 = arith.constant 0 : index
    %c0_248 = arith.constant 0 : index
    %315 = vector.load %arg8[%c0_247, %c0_248] : memref<1x80xf32, #tpu.memory_space<vmem>>, vector<1x80xf32>
    %316 = vector.broadcast %315 : vector<1x80xf32> to vector<5x80xf32>
    %317 = arith.addf %314, %316 : vector<5x80xf32>
    %cst_249 = arith.constant 0.000000e+00 : f32
    %318 = vector.broadcast %cst_249 : f32 to vector<5x80xf32>
    %319 = arith.maximumf %317, %318 : vector<5x80xf32>
    %320 = vector.extract_strided_slice %319 {offsets = [0, 0], sizes = [1, 80], strides = [1, 1]} : vector<5x80xf32> to vector<1x80xf32>
    %c0_250 = arith.constant 0 : index
    %c0_251 = arith.constant 0 : index
    %c0_252 = arith.constant 0 : index
    %321 = vector.load %arg9[%c0_250, %c0_251, %c0_252] : memref<5x80x120xf32, #tpu.memory_space<vmem>>, vector<1x80x120xf32>
    %322 = vector.shape_cast %321 : vector<1x80x120xf32> to vector<80x120xf32>
    %cst_253 = arith.constant dense<0.000000e+00> : vector<1x120xf32>
    %323 = tpu.matmul %320, %322, %cst_253 {dimension_numbers = #tpu.dot_dimension_numbers<[1], [0], [0], [1], [0, 0, 1, 1], [], []>} : vector<1x80xf32>, vector<80x120xf32>, vector<1x120xf32> -> vector<1x120xf32>
    %324 = vector.extract_strided_slice %319 {offsets = [1, 0], sizes = [1, 80], strides = [1, 1]} : vector<5x80xf32> to vector<1x80xf32>
    %c1_254 = arith.constant 1 : index
    %c0_255 = arith.constant 0 : index
    %c0_256 = arith.constant 0 : index
    %325 = vector.load %arg9[%c1_254, %c0_255, %c0_256] : memref<5x80x120xf32, #tpu.memory_space<vmem>>, vector<1x80x120xf32>
    %326 = vector.shape_cast %325 : vector<1x80x120xf32> to vector<80x120xf32>
    %cst_257 = arith.constant dense<0.000000e+00> : vector<1x120xf32>
    %327 = tpu.matmul %324, %326, %cst_257 {dimension_numbers = #tpu.dot_dimension_numbers<[1], [0], [0], [1], [0, 0, 1, 1], [], []>} : vector<1x80xf32>, vector<80x120xf32>, vector<1x120xf32> -> vector<1x120xf32>
    %328 = arith.addf %323, %327 : vector<1x120xf32>
    %329 = vector.extract_strided_slice %319 {offsets = [2, 0], sizes = [1, 80], strides = [1, 1]} : vector<5x80xf32> to vector<1x80xf32>
    %c2_258 = arith.constant 2 : index
    %c0_259 = arith.constant 0 : index
    %c0_260 = arith.constant 0 : index
    %330 = vector.load %arg9[%c2_258, %c0_259, %c0_260] : memref<5x80x120xf32, #tpu.memory_space<vmem>>, vector<1x80x120xf32>
    %331 = vector.shape_cast %330 : vector<1x80x120xf32> to vector<80x120xf32>
    %cst_261 = arith.constant dense<0.000000e+00> : vector<1x120xf32>
    %332 = tpu.matmul %329, %331, %cst_261 {dimension_numbers = #tpu.dot_dimension_numbers<[1], [0], [0], [1], [0, 0, 1, 1], [], []>} : vector<1x80xf32>, vector<80x120xf32>, vector<1x120xf32> -> vector<1x120xf32>
    %333 = arith.addf %328, %332 : vector<1x120xf32>
    %334 = vector.extract_strided_slice %319 {offsets = [3, 0], sizes = [1, 80], strides = [1, 1]} : vector<5x80xf32> to vector<1x80xf32>
    %c3_262 = arith.constant 3 : index
    %c0_263 = arith.constant 0 : index
    %c0_264 = arith.constant 0 : index
    %335 = vector.load %arg9[%c3_262, %c0_263, %c0_264] : memref<5x80x120xf32, #tpu.memory_space<vmem>>, vector<1x80x120xf32>
    %336 = vector.shape_cast %335 : vector<1x80x120xf32> to vector<80x120xf32>
    %cst_265 = arith.constant dense<0.000000e+00> : vector<1x120xf32>
    %337 = tpu.matmul %334, %336, %cst_265 {dimension_numbers = #tpu.dot_dimension_numbers<[1], [0], [0], [1], [0, 0, 1, 1], [], []>} : vector<1x80xf32>, vector<80x120xf32>, vector<1x120xf32> -> vector<1x120xf32>
    %338 = arith.addf %333, %337 : vector<1x120xf32>
    %339 = vector.extract_strided_slice %319 {offsets = [4, 0], sizes = [1, 80], strides = [1, 1]} : vector<5x80xf32> to vector<1x80xf32>
    %c4_266 = arith.constant 4 : index
    %c0_267 = arith.constant 0 : index
    %c0_268 = arith.constant 0 : index
    %340 = vector.load %arg9[%c4_266, %c0_267, %c0_268] : memref<5x80x120xf32, #tpu.memory_space<vmem>>, vector<1x80x120xf32>
    %341 = vector.shape_cast %340 : vector<1x80x120xf32> to vector<80x120xf32>
    %cst_269 = arith.constant dense<0.000000e+00> : vector<1x120xf32>
    %342 = tpu.matmul %339, %341, %cst_269 {dimension_numbers = #tpu.dot_dimension_numbers<[1], [0], [0], [1], [0, 0, 1, 1], [], []>} : vector<1x80xf32>, vector<80x120xf32>, vector<1x120xf32> -> vector<1x120xf32>
    %343 = arith.addf %338, %342 : vector<1x120xf32>
    %c0_270 = arith.constant 0 : index
    %c0_271 = arith.constant 0 : index
    %344 = vector.load %arg10[%c0_270, %c0_271] : memref<1x120xf32, #tpu.memory_space<vmem>>, vector<1x120xf32>
    %345 = arith.addf %343, %344 : vector<1x120xf32>
    %cst_272 = arith.constant 0.000000e+00 : f32
    %346 = vector.broadcast %cst_272 : f32 to vector<1x120xf32>
    %347 = arith.maximumf %345, %346 : vector<1x120xf32>
    %c0_273 = arith.constant 0 : index
    %c0_274 = arith.constant 0 : index
    %348 = vector.load %arg11[%c0_273, %c0_274] : memref<120x84xf32, #tpu.memory_space<vmem>>, vector<120x84xf32>
    %cst_275 = arith.constant dense<0.000000e+00> : vector<1x84xf32>
    %349 = tpu.matmul %347, %348, %cst_275 {dimension_numbers = #tpu.dot_dimension_numbers<[1], [0], [0], [1], [0, 0, 1, 1], [], []>} : vector<1x120xf32>, vector<120x84xf32>, vector<1x84xf32> -> vector<1x84xf32>
    %c0_276 = arith.constant 0 : index
    %c0_277 = arith.constant 0 : index
    %350 = vector.load %arg12[%c0_276, %c0_277] : memref<1x84xf32, #tpu.memory_space<vmem>>, vector<1x84xf32>
    %351 = arith.addf %349, %350 : vector<1x84xf32>
    %cst_278 = arith.constant 0.000000e+00 : f32
    %352 = vector.broadcast %cst_278 : f32 to vector<1x84xf32>
    %353 = arith.maximumf %351, %352 : vector<1x84xf32>
    %c0_279 = arith.constant 0 : index
    %c0_280 = arith.constant 0 : index
    %354 = vector.load %arg13[%c0_279, %c0_280] : memref<84x10xf32, #tpu.memory_space<vmem>>, vector<84x10xf32>
    %cst_281 = arith.constant dense<0.000000e+00> : vector<1x10xf32>
    %355 = tpu.matmul %353, %354, %cst_281 {dimension_numbers = #tpu.dot_dimension_numbers<[1], [0], [0], [1], [0, 0, 1, 1], [], []>} : vector<1x84xf32>, vector<84x10xf32>, vector<1x10xf32> -> vector<1x10xf32>
    %c0_282 = arith.constant 0 : index
    %c0_283 = arith.constant 0 : index
    %356 = vector.load %arg14[%c0_282, %c0_283] : memref<1x10xf32, #tpu.memory_space<vmem>>, vector<1x10xf32>
    %357 = arith.addf %355, %356 : vector<1x10xf32>
    %358 = vector.shape_cast %357 : vector<1x10xf32> to vector<1x1x10xf32>
    %c0_284 = arith.constant 0 : index
    %c0_285 = arith.constant 0 : index
    %c0_286 = arith.constant 0 : index
    %359 = vector.load %arg15[%c0_284, %c0_285, %c0_286] : memref<1x1x10xf32, #tpu.memory_space<vmem>>, vector<1x1x10xf32>
    tpu.vector_store %arg15[%c0_284, %c0_285, %c0_286], %358 {strides = array<i32>} : memref<1x1x10xf32, #tpu.memory_space<vmem>>, vector<1x1x10xf32>,
    return
  }
  func.func @transform_0(%arg0: i32) -> (i32, i32, i32) {
    %c0_i32 = arith.constant 0 : i32
    %c0_i32_0 = arith.constant 0 : i32
    %c0_i32_1 = arith.constant 0 : i32
    return %arg0, %c0_i32, %c0_i32_0 : i32, i32, i32
  }
  func.func @transform_1(%arg0: i32) -> (i32, i32, i32) {
    %c0_i32 = arith.constant 0 : i32
    %c0_i32_0 = arith.constant 0 : i32
    %c0_i32_1 = arith.constant 0 : i32
    return %arg0, %c0_i32, %c0_i32_0 : i32, i32, i32
  }
  func.func @transform_2(%arg0: i32) -> (i32, i32, i32) {
    %c0_i32 = arith.constant 0 : i32
    %c0_i32_0 = arith.constant 0 : i32
    %c0_i32_1 = arith.constant 0 : i32
    return %arg0, %c0_i32, %c0_i32_0 : i32, i32, i32
  }
  func.func @transform_3(%arg0: i32) -> (i32, i32, i32) {
    %c0_i32 = arith.constant 0 : i32
    %c0_i32_0 = arith.constant 0 : i32
    %c0_i32_1 = arith.constant 0 : i32
    return %arg0, %c0_i32, %c0_i32_0 : i32, i32, i32
  }
  func.func @transform_4(%arg0: i32) -> (i32, i32, i32) {
    %c0_i32 = arith.constant 0 : i32
    %c0_i32_0 = arith.constant 0 : i32
    %c0_i32_1 = arith.constant 0 : i32
    %c0_i32_2 = arith.constant 0 : i32
    return %c0_i32, %c0_i32_0, %c0_i32_1 : i32, i32, i32
  }
  func.func @transform_5(%arg0: i32) -> (i32, i32) {
    %c0_i32 = arith.constant 0 : i32
    %c0_i32_0 = arith.constant 0 : i32
    %c0_i32_1 = arith.constant 0 : i32
    return %c0_i32, %c0_i32_0 : i32, i32
  }
  func.func @transform_6(%arg0: i32) -> (i32, i32, i32) {
    %c0_i32 = arith.constant 0 : i32
    %c0_i32_0 = arith.constant 0 : i32
    %c0_i32_1 = arith.constant 0 : i32
    %c0_i32_2 = arith.constant 0 : i32
    return %c0_i32, %c0_i32_0, %c0_i32_1 : i32, i32, i32
  }
  func.func @transform_7(%arg0: i32) -> (i32, i32) {
    %c0_i32 = arith.constant 0 : i32
    %c0_i32_0 = arith.constant 0 : i32
    %c0_i32_1 = arith.constant 0 : i32
    return %c0_i32, %c0_i32_0 : i32, i32
  }
  func.func @transform_8(%arg0: i32) -> (i32, i32, i32) {
    %c0_i32 = arith.constant 0 : i32
    %c0_i32_0 = arith.constant 0 : i32
    %c0_i32_1 = arith.constant 0 : i32
    %c0_i32_2 = arith.constant 0 : i32
    return %c0_i32, %c0_i32_0, %c0_i32_1 : i32, i32, i32
  }
  func.func @transform_9(%arg0: i32) -> (i32, i32) {
    %c0_i32 = arith.constant 0 : i32
    %c0_i32_0 = arith.constant 0 : i32
    %c0_i32_1 = arith.constant 0 : i32
    return %c0_i32, %c0_i32_0 : i32, i32
  }
  func.func @transform_10(%arg0: i32) -> (i32, i32) {
    %c0_i32 = arith.constant 0 : i32
    %c0_i32_0 = arith.constant 0 : i32
    %c0_i32_1 = arith.constant 0 : i32
    return %c0_i32, %c0_i32_0 : i32, i32
  }
  func.func @transform_11(%arg0: i32) -> (i32, i32) {
    %c0_i32 = arith.constant 0 : i32
    %c0_i32_0 = arith.constant 0 : i32
    %c0_i32_1 = arith.constant 0 : i32
    return %c0_i32, %c0_i32_0 : i32, i32
  }
  func.func @transform_12(%arg0: i32) -> (i32, i32) {
    %c0_i32 = arith.constant 0 : i32
    %c0_i32_0 = arith.constant 0 : i32
    %c0_i32_1 = arith.constant 0 : i32
    return %c0_i32, %c0_i32_0 : i32, i32
  }
  func.func @transform_13(%arg0: i32) -> (i32, i32) {
    %c0_i32 = arith.constant 0 : i32
    %c0_i32_0 = arith.constant 0 : i32
    %c0_i32_1 = arith.constant 0 : i32
    return %c0_i32, %c0_i32_0 : i32, i32
  }
  func.func @transform_14(%arg0: i32) -> (i32, i32, i32) {
    %c0_i32 = arith.constant 0 : i32
    %c0_i32_0 = arith.constant 0 : i32
    %c0_i32_1 = arith.constant 0 : i32
    return %arg0, %c0_i32, %c0_i32_0 : i32, i32, i32
  }
}

</mosaic_0001>

<bundles_post_ra>
// kernel: net_forward.1
= control target key start
LH: loop header
LB: loop body
LE: loop exit
PB: predicated region body
PF: predicated region fallthrough
CT: control target
= control target key end

     0   :  { %19 = vsyncpa [#allocation3], 0  ;;  %s12553_s0 = inlined_call_operand.vmem [shape: f32[2,8,96], index: 0, kind: input, shape index: {}]   ;;  %s12554_s1 = inlined_call_operand.vmem [shape: f32[2,8,96], index: 1, kind: input, shape index: {}]   ;;  %s12555_s2 = inlined_call_operand.vmem [shape: f32[2,8,96], index: 2, kind: input, shape index: {}]   ;;  %s12556_s3 = inlined_call_operand.vmem [shape: f32[2,8,96], index: 3, kind: input, shape index: {}]   ;;  %s12557_s4 = inlined_call_operand.vmem [shape: f32[10,96,84], index: 4, kind: input, shape index: {}]   ;;  %s12558_s5 = inlined_call_operand.vmem [shape: f32[1,84], index: 5, kind: input, shape index: {}]   ;;  %s12559_s6 = inlined_call_operand.vmem [shape: f32[10,84,80], index: 6, kind: input, shape index: {}]   ;;  %s12560_s7 = inlined_call_operand.vmem [shape: f32[1,80], index: 7, kind: input, shape index: {}]   ;;  %s12561_s8 = inlined_call_operand.vmem [shape: f32[5,80,120], index: 8, kind: input, shape index: {}]   ;;  %s12562_s9 = inlined_call_operand.vmem [shape: f32[1,120], index: 9, kind: input, shape index: {}]   ;;  %s12563_s10 = inlined_call_operand.vmem [shape: f32[120,84], index: 10, kind: input, shape index: {}]   ;;  %s12564_s11 = inlined_call_operand.vmem [shape: f32[1,84], index: 11, kind: input, shape index: {}]   ;;  %s12565_s12 = inlined_call_operand.vmem [shape: f32[84,10], index: 12, kind: input, shape index: {}]   ;;  %s12566_s13 = inlined_call_operand.vmem [shape: f32[1,10], index: 13, kind: input, shape index: {}]   ;;  %s12567_s14 = inlined_call_operand.hbm [shape: f32[2,1,10], index: 14, kind: output, shape index: {}]  }
   0x1   :  { %21 = vsyncpa [#allocation3 + $0x1], 0  ;;  %s10172_s29 = smov 0   ;;  %s10174_s30 = smov 0  }
   0x2   :  { %s10176_s15 = smov 0   ;;  %s10178_s16 = smov 0  }
   0x3 LB: > { %12597 = sst [smem:[#allocation5_spill]] %s10079_s29  ;;  %s10193_s17 = sadd.s32 4294967295, %s10091_s16   ;;  %s10091_s16 = sphi %s10178_s16, %s12643_s16   ;;  %s10087_s15 = sphi %s10176_s15, %s12645_s15   ;;  %s10083_s30 = sphi %s10174_s30, %s12647_s30   ;;  %s10079_s29 = sphi %s10172_s29, %s12646_s29  }
   0x4   : > { %12598 = sst [smem:[#allocation6_spill]] %s10087_s15  ;;  %s5816_s18 = sadd.s32 4294967294, %s10091_s16  }
   0x5   : > { %s10197_s19 = sadd.s32 1, %s10091_s16   ;;  %s348_s20 = sadd.s32 1, %s10087_s15 }
   0x6   : > { %12599 = sst [smem:[#allocation7_spill]] %s10197_s19  ;;  %s345_s21 = ssub.s32 %s10091_s16, %s10197_s19 }
   0x7   : > { %p358_p0 = scmp.ne.s32.totalorder %s10087_s15, %s10083_s30  ;;  %p346_p1 = scmp.eq.s32.totalorder %s345_s21, 0 }
   0x8   : > { %p359_p2 = scmp.eq.s32.totalorder %s10193_s17, 1  ;;  %p364_p3 = scmp.ne.s32.totalorder %s10083_s30, %s10079_s29 }
   0x9   : > { %p365_p4 = scmp.eq.s32.totalorder %s5816_s18, 1  ;;  %p5819_p7 = scmp.ge.s32.totalorder %s10091_s16, 1 }
   0xa   : > { %s10208_s22 = scalar_select %p346_p1, %s10087_s15, %s348_s20  }
   0xb   : > { %p10210_p5 = por %p359_p2, %p358_p0  ;;  %p10214_p6 = por %p365_p4, %p364_p3 }
   0xc   : > { %12600 = sst [smem:[#allocation8_spill]] %s10208_s22  ;;  %p441_p8 = scmp.lt.s32.totalorder %s10091_s16, 3 }
   0xd   : > { %s12602_s24 = scalar_select %p10214_p6, 1, 0 }
   0xe   : > { %p442_p9 = pnand %p5819_p7, %p441_p8 }
   0xf   : > { %12603 = sst [smem:[#allocation9_spill]] %s12602_s24 }
  0x10   : > { %445 = sbr.rel (%p442_p9) target bundleno = 1855 (0x73f), region = 76 }
  0x17   : > { %v5824_v0 = vld [vmem:[%s12557_s4 + $0x60] sm:$0xff]  ;;  %v5825_v1 = vld [vmem:[%s12557_s4 + $0x68] sm:$0xff]  ;;  %v10093_v3 = vmov 0.0|0.0   ;;  %v5826_v6 = vld [vmem:[%s12557_s4 + $0x70] sm:$0xff]  ;;  %vm10094_vm0 = vmmov 0   ;;  %v12577_v11 = vmov 0.0  }
  0x18   : > { %v5889_v2 = vld [vmem:[%s12557_s4 + $0x240] sm:$0xff]  ;;  %8760 = vmatprep.subr.bf16.mxu0 %v10093_v3  ;;  %8850 = vmatprep.subr.bf16.mxu1 %v10093_v3  ;;  %v10231_v4 = vpack.c.bf16 %v5825_v1, %v5824_v0  ;;  %v5890_v5 = vld [vmem:[%s12557_s4 + $0x248] sm:$0xff]  ;;  %v5827_v7 = vld [vmem:[%s12557_s4 + $0x78] sm:$0xff]  ;;  %p497_p10 = scmp.lt.s32.totalorder %s10193_s17, 1  ;;  %vm542_vm1 = vcmask 785408   ;;  %vm3539_vm2 = vcmask 1043456  }
  0x19   : > { %v10242_v8 = vpack.c.bf16 %v5890_v5, %v5889_v2  ;;  %v5891_v9 = vld [vmem:[%s12557_s4 + $0x250] sm:$0xff]  ;;  %v5892_v10 = vld [vmem:[%s12557_s4 + $0x258] sm:$0xff]  ;;  %7031 = vmatprep.mubr.msk.f32.mxu0 %vm10094_vm0, %v12577_v11  ;;  %7166 = vmatprep.mubr.msk.f32.mxu1 %vm10094_vm0, %v12577_v11  ;;  %v10255_v12 = vpack.c.bf16 %v5827_v7, %v5826_v6  ;;  %v5828_v14 = vld [vmem:[%s12557_s4 + $0x80] sm:$0xff]  ;;  %vm3535_vm3 = vcmask 687104   ;;  %vm5128_vm4 = vcmask 654336   ;;  %s495_s22 = sand.u32 1, %s10083_s30  }
  0x1a   : > { %8762 = vmatpush3.bf16.msra.mxu0 %v10231_v4  ;;  %v10259_v13 = vpack.c.bf16 %v5892_v10, %v5891_v9  ;;  %v5829_v15 = vld [vmem:[%s12557_s4 + $0x88] sm:$0xff]  ;;  %v5893_v16 = vld [vmem:[%s12557_s4 + $0x260] sm:$0xff]  ;;  %v5830_v20 = vld [vmem:[%s12557_s4 + $0x90] sm:$0xff]  ;;  %s498_s25 = scalar_select %p497_p10, %s10193_s17, 1  ;;  %vm5547_vm5 = vcmask 982016   ;;  %vm5710_vm6 = vcmask 73728  }
  0x1b   : > { %8852 = vmatpush3.bf16.msra.mxu1 %v10242_v8  ;;  %8763 = vmatprep.subr.bf16.mxu0 %v10093_v3  ;;  %v5894_v17 = vld [vmem:[%s12557_s4 + $0x268] sm:$0xff]  ;;  %v10275_v18 = vpack.c.bf16 %v5829_v15, %v5828_v14  ;;  %v5831_v21 = vld [vmem:[%s12557_s4 + $0x98] sm:$0xff]  ;;  %v5895_v22 = vld [vmem:[%s12557_s4 + $0x270] sm:$0xff]  ;;  %s6161_s18 = sshll.u32 %s10193_s17, 4  ;;  %s10096_s17 = smov [#allocation2]  }
  0x1c   : > { %8853 = vmatprep.subr.bf16.mxu1 %v10093_v3  ;;  %v10279_v19 = vpack.c.bf16 %v5894_v17, %v5893_v16  ;;  %v5896_v23 = vld [vmem:[%s12557_s4 + $0x278] sm:$0xff]  ;;  %v10296_v24 = vpack.c.bf16 %v5831_v21, %v5830_v20  ;;  %v5832_v26 = vld [vmem:[%s12557_s4 + $0xa0] sm:$0xff]  ;;  %v5833_v27 = vld [vmem:[%s12557_s4 + $0xa8] sm:$0xff]  ;;  %s10336_s21 = sshll.u32 %s498_s25, 3  ;;  %s12511_s25 = scalar_lea.hbm %s12567_s14, %s6161_s18 }
  0x1d   : > { %v10300_v25 = vpack.c.bf16 %v5896_v23, %v5895_v22  ;;  %v5897_v28 = vld [vmem:[%s12557_s4 + $0x280] sm:$0xff]  ;;  %v5898_v29 = vld [vmem:[%s12557_s4 + $0x288] sm:$0xff]  ;;  %v10317_v30 = vpack.c.bf16 %v5833_v27, %v5832_v26  ;;  %v5834_v32 = vld [vmem:[%s12557_s4 + $0xb0] sm:$0xff]  ;;  %s504_s28 = scalar_lea.vmem %s12554_s1, %s10336_s21  ;;  %s500_s19 = scalar_lea.vmem %s12553_s0, %s10336_s21 }
  0x1e   : > { %8765 = vmatpush3.bf16.msra.mxu0 %v10255_v12  ;;  %v10321_v31 = vpack.c.bf16 %v5898_v29, %v5897_v28  ;;  %v5835_v33 = vld [vmem:[%s12557_s4 + $0xb8] sm:$0xff]  ;;  %v5899_v34 = vld [vmem:[%s12557_s4 + $0x290] sm:$0xff]  ;;  %v517_v38 = vld [vmem:[%s12557_s4] sm:$0xff]  ;;  %s512_s27 = scalar_lea.vmem %s12556_s3, %s10336_s21  ;;  %s10033_s15 = sshll.u32 %s10096_s17, 4  ;;  %s10034_s15 = int_to_ptr.vmem [resolvable:$false] %s10033_s15 }
  0x1f   : > { %8855 = vmatpush3.bf16.msra.mxu1 %v10259_v13  ;;  %8766 = vmatprep.subr.bf16.mxu0 %v10093_v3  ;;  %v5900_v35 = vld [vmem:[%s12557_s4 + $0x298] sm:$0xff]  ;;  %v10339_v36 = vpack.c.bf16 %v5835_v33, %v5834_v32  ;;  %v518_v39 = vld [vmem:[%s12557_s4 + $0x8] sm:$0xff]  ;;  %v5877_v40 = vld [vmem:[%s12557_s4 + $0x1e0] sm:$0xff]  ;;  %s10035_s26 = scalar_lea.vmem %s10034_s15, 32 }
  0x20   : > { %8856 = vmatprep.subr.bf16.mxu1 %v10093_v3  ;;  %v10343_v37 = vpack.c.bf16 %v5900_v35, %v5899_v34  ;;  %v5878_v41 = vld [vmem:[%s12557_s4 + $0x1e8] sm:$0xff]  ;;  %v10363_v42 = vld [vmem:[%s504_s28] sm:$0xff]  ;;  %v10365_v43 = vpack.c.bf16 %v518_v39, %v517_v38  ;;  %v519_v45 = vld [vmem:[%s12557_s4 + $0x10] sm:$0xff]  ;;  %s508_s28 = scalar_lea.vmem %s12555_s2, %s10336_s21 }
  0x21   : > { %v10369_v44 = vpack.c.bf16 %v5878_v41, %v5877_v40  ;;  %v520_v46 = vld [vmem:[%s12557_s4 + $0x18] sm:$0xff]  ;;  %v5879_v47 = vld [vmem:[%s12557_s4 + $0x1f0] sm:$0xff]  ;;  %v521_v51 = vld [vmem:[%s12557_s4 + $0x20] sm:$0xff] }
  0x22   : > { %8768 = vmatpush3.bf16.msra.mxu0 %v10275_v18  ;;  %v5880_v48 = vld [vmem:[%s12557_s4 + $0x1f8] sm:$0xff]  ;;  %v10389_v49 = vpack.c.bf16 %v520_v46, %v519_v45  ;;  %v522_v52 = vld [vmem:[%s12557_s4 + $0x28] sm:$0xff]  ;;  %v5881_v53 = vld [vmem:[%s12557_s4 + $0x200] sm:$0xff] }
  0x23   : > { %8858 = vmatpush3.bf16.msra.mxu1 %v10279_v19  ;;  %8769 = vmatprep.subr.bf16.mxu0 %v10093_v3  ;;  %v10393_v50 = vpack.c.bf16 %v5880_v48, %v5879_v47  ;;  %v5882_v54 = vld [vmem:[%s12557_s4 + $0x208] sm:$0xff]  ;;  %v10413_v55 = vpack.c.bf16 %v522_v52, %v521_v51  ;;  %v523_v57 = vld [vmem:[%s12557_s4 + $0x30] sm:$0xff]  ;;  %v524_v58 = vld [vmem:[%s12557_s4 + $0x38] sm:$0xff] }
  0x24   : > { %8859 = vmatprep.subr.bf16.mxu1 %v10093_v3  ;;  %v10417_v56 = vpack.c.bf16 %v5882_v54, %v5881_v53  ;;  %v5883_v59 = vld [vmem:[%s12557_s4 + $0x210] sm:$0xff]  ;;  %v5884_v60 = vld [vmem:[%s12557_s4 + $0x218] sm:$0xff]  ;;  %v10433_v61 = vpack.c.bf16 %v524_v58, %v523_v57  ;;  %v525_v63 = vld [vmem:[%s12557_s4 + $0x40] sm:$0xff] }
  0x25   : > { %v10437_v62 = vpack.c.bf16 %v5884_v60, %v5883_v59  ;;  %v526_v0 = vld [vmem:[%s12557_s4 + $0x48] sm:$0xff]  ;;  %v5885_v1 = vld [vmem:[%s12557_s4 + $0x220] sm:$0xff]  ;;  %v527_v7 = vld [vmem:[%s12557_s4 + $0x50] sm:$0xff] }
  0x26   : > { %8771 = vmatpush3.bf16.msra.mxu0 %v10296_v24  ;;  %v5886_v2 = vld [vmem:[%s12557_s4 + $0x228] sm:$0xff]  ;;  %v10453_v5 = vpack.c.bf16 %v526_v0, %v525_v63  ;;  %v528_v9 = vld [vmem:[%s12557_s4 + $0x58] sm:$0xff]  ;;  %v5887_v10 = vld [vmem:[%s12557_s4 + $0x230] sm:$0xff] }
  0x27   : > { %8861 = vmatpush3.bf16.msra.mxu1 %v10300_v25  ;;  %8772 = vmatprep.subr.bf16.mxu0 %v10093_v3  ;;  %v10457_v6 = vpack.c.bf16 %v5886_v2, %v5885_v1  ;;  %v5888_v14 = vld [vmem:[%s12557_s4 + $0x238] sm:$0xff]  ;;  %v10473_v15 = vpack.c.bf16 %v528_v9, %v527_v7  ;;  %v5838_v17 = vld [vmem:[%s12557_s4 + $0xc0] sm:$0xff]  ;;  %v5839_v20 = vld [vmem:[%s12557_s4 + $0xc8] sm:$0xff] }
  0x28   : > { %8862 = vmatprep.subr.bf16.mxu1 %v10093_v3  ;;  %v10477_v16 = vpack.c.bf16 %v5888_v14, %v5887_v10  ;;  %v5903_v21 = vld [vmem:[%s12557_s4 + $0x2a0] sm:$0xff]  ;;  %v5904_v22 = vld [vmem:[%s12557_s4 + $0x2a8] sm:$0xff]  ;;  %v10499_v26 = vpack.c.bf16 %v5839_v20, %v5838_v17  ;;  %v5840_v28 = vld [vmem:[%s12557_s4 + $0xd0] sm:$0xff] }
  0x29   : > { %v10497_v23 = vld [vmem:[%s500_s19] sm:$0xff]  ;;  %v10503_v27 = vpack.c.bf16 %v5904_v22, %v5903_v21  ;;  %v5841_v29 = vld [vmem:[%s12557_s4 + $0xd8] sm:$0xff]  ;;  %v5905_v32 = vld [vmem:[%s12557_s4 + $0x2b0] sm:$0xff] }
  0x2a   : > { %8774 = vmatpush3.bf16.msra.mxu0 %v10317_v30  ;;  %v5906_v33 = vld [vmem:[%s12557_s4 + $0x2b8] sm:$0xff]  ;;  %v10523_v34 = vpack.c.bf16 %v5841_v29, %v5840_v28  ;;  %v5842_v38 = vld [vmem:[%s12557_s4 + $0xe0] sm:$0xff]  ;;  %v5843_v39 = vld [vmem:[%s12557_s4 + $0xe8] sm:$0xff] }
  0x2b   : > { %8864 = vmatpush3.bf16.msra.mxu1 %v10321_v31  ;;  %8775 = vmatprep.subr.bf16.mxu0 %v10093_v3  ;;  %v10527_v35 = vpack.c.bf16 %v5906_v33, %v5905_v32  ;;  %v5907_v40 = vld [vmem:[%s12557_s4 + $0x2c0] sm:$0xff]  ;;  %v5908_v41 = vld [vmem:[%s12557_s4 + $0x2c8] sm:$0xff]  ;;  %v10547_v45 = vpack.c.bf16 %v5843_v39, %v5842_v38  ;;  %v5844_v47 = vld [vmem:[%s12557_s4 + $0xf0] sm:$0xff] }
  0x2c   : > { %8865 = vmatprep.subr.bf16.mxu1 %v10093_v3  ;;  %v10551_v46 = vpack.c.bf16 %v5908_v41, %v5907_v40  ;;  %v5845_v48 = vld [vmem:[%s12557_s4 + $0xf8] sm:$0xff]  ;;  %v5909_v51 = vld [vmem:[%s12557_s4 + $0x2d0] sm:$0xff]  ;;  %v5846_v57 = vld [vmem:[%s12557_s4 + $0x100] sm:$0xff] }
  0x2d   : > { %v5910_v52 = vld [vmem:[%s12557_s4 + $0x2d8] sm:$0xff]  ;;  %v10567_v53 = vpack.c.bf16 %v5845_v48, %v5844_v47  ;;  %v5847_v58 = vld [vmem:[%s12557_s4 + $0x108] sm:$0xff]  ;;  %v5911_v59 = vld [vmem:[%s12557_s4 + $0x2e0] sm:$0xff] }
  0x2e   : > { %8777 = vmatpush3.bf16.msra.mxu0 %v10339_v36  ;;  %v10571_v54 = vpack.c.bf16 %v5910_v52, %v5909_v51  ;;  %v5912_v60 = vld [vmem:[%s12557_s4 + $0x2e8] sm:$0xff]  ;;  %v10587_v63 = vpack.c.bf16 %v5847_v58, %v5846_v57  ;;  %v5848_v1 = vld [vmem:[%s12557_s4 + $0x110] sm:$0xff]  ;;  %v5849_v2 = vld [vmem:[%s12557_s4 + $0x118] sm:$0xff] }
  0x2f   : > { %8867 = vmatpush3.bf16.msra.mxu1 %v10343_v37  ;;  %8778 = vmatprep.subr.bf16.mxu0 %v10093_v3  ;;  %v10591_v0 = vpack.c.bf16 %v5912_v60, %v5911_v59  ;;  %v5913_v7 = vld [vmem:[%s12557_s4 + $0x2f0] sm:$0xff]  ;;  %v5914_v9 = vld [vmem:[%s12557_s4 + $0x2f8] sm:$0xff]  ;;  %v10607_v10 = vpack.c.bf16 %v5849_v2, %v5848_v1  ;;  %v5851_v17 = vld [vmem:[%s12557_s4 + $0x120] sm:$0xff] }
  0x30   : > { %8868 = vmatprep.subr.bf16.mxu1 %v10093_v3  ;;  %v10611_v14 = vpack.c.bf16 %v5914_v9, %v5913_v7  ;;  %v5852_v20 = vld [vmem:[%s12557_s4 + $0x128] sm:$0xff]  ;;  %v5916_v21 = vld [vmem:[%s12557_s4 + $0x300] sm:$0xff]  ;;  %v5853_v33 = vld [vmem:[%s12557_s4 + $0x130] sm:$0xff] }
  0x31   : > { %7032 = vmatmul.mubr.msk.f32.vlgmr.msra.gmra.mrb[0].mxu0 %vm542_vm1, %v10363_v42  ;;  %v5917_v22 = vld [vmem:[%s12557_s4 + $0x308] sm:$0xff]  ;;  %v10631_v28 = vld [vmem:[%s508_s28] sm:$0xff]  ;;  %v10633_v29 = vpack.c.bf16 %v5852_v20, %v5851_v17  ;;  %v5854_v38 = vld [vmem:[%s12557_s4 + $0x138] sm:$0xff]  ;;  %s5713_s28 = scalar_lea.sflag [#allocation3], %s495_s22 }
  0x32   : > { %8780 = vmatpush3.bf16.msra.mxu0 %v10365_v43  ;;  %7167 = vmatmul.mubr.msk.f32.vlgmr.msra.gmra.mrb[0].mxu1 %vm542_vm1, %v10363_v42  ;;  %v10637_v32 = vpack.c.bf16 %v5917_v22, %v5916_v21  ;;  %v5918_v39 = vld [vmem:[%s12557_s4 + $0x310] sm:$0xff]  ;;  %v5919_v40 = vld [vmem:[%s12557_s4 + $0x318] sm:$0xff]  ;;  %v10657_v41 = vpack.c.bf16 %v5854_v38, %v5853_v33  ;;  %v5855_v48 = vld [vmem:[%s12557_s4 + $0x140] sm:$0xff] }
  0x33   : > { %8870 = vmatpush3.bf16.msra.mxu1 %v10369_v44  ;;  %8781 = vmatprep.subr.bf16.mxu0 %v10093_v3  ;;  %v10661_v47 = vpack.c.bf16 %v5919_v40, %v5918_v39  ;;  %v5856_v51 = vld [vmem:[%s12557_s4 + $0x148] sm:$0xff]  ;;  %v5920_v52 = vld [vmem:[%s12557_s4 + $0x320] sm:$0xff]  ;;  %v5857_v60 = vld [vmem:[%s12557_s4 + $0x150] sm:$0xff] }
  0x34   : > { %8871 = vmatprep.subr.bf16.mxu1 %v10093_v3  ;;  %7058 = vmatprep.mubr.msk.f32.mxu0 %vm10094_vm0, %v12577_v11  ;;  %v5921_v57 = vld [vmem:[%s12557_s4 + $0x328] sm:$0xff]  ;;  %v10681_v58 = vpack.c.bf16 %v5856_v51, %v5855_v48  ;;  %v5858_v1 = vld [vmem:[%s12557_s4 + $0x158] sm:$0xff]  ;;  %v5922_v2 = vld [vmem:[%s12557_s4 + $0x330] sm:$0xff] }
  0x35   : > { %7193 = vmatprep.mubr.msk.f32.mxu1 %vm10094_vm0, %v12577_v11  ;;  %v10685_v59 = vpack.c.bf16 %v5921_v57, %v5920_v52  ;;  %v5923_v7 = vld [vmem:[%s12557_s4 + $0x338] sm:$0xff]  ;;  %v10701_v9 = vpack.c.bf16 %v5858_v1, %v5857_v60  ;;  %v5859_v20 = vld [vmem:[%s12557_s4 + $0x160] sm:$0xff]  ;;  %v5860_v21 = vld [vmem:[%s12557_s4 + $0x168] sm:$0xff] }
  0x36   : > { %8783 = vmatpush3.bf16.msra.mxu0 %v10389_v49  ;;  %12604 = vst [vmem:[#allocation10_spill] sm:$0xff] %v10681_v58  ;;  %v10705_v17 = vpack.c.bf16 %v5923_v7, %v5922_v2  ;;  %v5924_v22 = vld [vmem:[%s12557_s4 + $0x340] sm:$0xff]  ;;  %v5925_v33 = vld [vmem:[%s12557_s4 + $0x348] sm:$0xff]  ;;  %v10721_v38 = vpack.c.bf16 %v5860_v21, %v5859_v20  ;;  %v5861_v40 = vld [vmem:[%s12557_s4 + $0x170] sm:$0xff] }
  0x37   : > { %8873 = vmatpush3.bf16.msra.mxu1 %v10393_v50  ;;  %8784 = vmatprep.subr.bf16.mxu0 %v10093_v3  ;;  %12605 = vst [vmem:[#allocation11_spill] sm:$0xff] %v10685_v59  ;;  %12606 = vst [vmem:[#allocation12_spill] sm:$0xff] %v10701_v9  ;;  %v10725_v39 = vpack.c.bf16 %v5925_v33, %v5924_v22  ;;  %v5862_v48 = vld [vmem:[%s12557_s4 + $0x178] sm:$0xff]  ;;  %v5926_v51 = vld [vmem:[%s12557_s4 + $0x350] sm:$0xff] }
  0x38   : > { %8874 = vmatprep.subr.bf16.mxu1 %v10093_v3  ;;  %12607 = vst [vmem:[#allocation13_spill] sm:$0xff] %v10705_v17  ;;  %v5927_v52 = vld [vmem:[%s12557_s4 + $0x358] sm:$0xff]  ;;  %v10741_v57 = vpack.c.bf16 %v5862_v48, %v5861_v40  ;;  %v5864_v1 = vld [vmem:[%s12557_s4 + $0x180] sm:$0xff]  ;;  %v5865_v2 = vld [vmem:[%s12557_s4 + $0x188] sm:$0xff] }
  0x39   : > { %12608 = vst [vmem:[#allocation14_spill] sm:$0xff] %v10725_v39  ;;  %v10749_v60 = vpack.c.bf16 %v5927_v52, %v5926_v51  ;;  %v5929_v7 = vld [vmem:[%s12557_s4 + $0x360] sm:$0xff]  ;;  %v5930_v20 = vld [vmem:[%s12557_s4 + $0x368] sm:$0xff]  ;;  %v10767_v22 = vpack.c.bf16 %v5865_v2, %v5864_v1  ;;  %v5866_v40 = vld [vmem:[%s12557_s4 + $0x190] sm:$0xff] }
  0x3a   : > { %8786 = vmatpush3.bf16.msra.mxu0 %v10413_v55  ;;  %v10764_v21 = vld [vmem:[%s512_s27] sm:$0xff]  ;;  %v10771_v33 = vpack.c.bf16 %v5930_v20, %v5929_v7  ;;  %v5867_v48 = vld [vmem:[%s12557_s4 + $0x198] sm:$0xff]  ;;  %v5931_v51 = vld [vmem:[%s12557_s4 + $0x370] sm:$0xff]  ;;  %s496_s27 = scalar_lea.vmem [#allocation2], %s495_s22 }
  0x3b   : > { %8876 = vmatpush3.bf16.msra.mxu1 %v10417_v56  ;;  %8787 = vmatprep.subr.bf16.mxu0 %v10093_v3  ;;  %12609 = vst [vmem:[#allocation15_spill] sm:$0xff] %v10767_v22  ;;  %v5932_v52 = vld [vmem:[%s12557_s4 + $0x378] sm:$0xff]  ;;  %v10791_v1 = vpack.c.bf16 %v5867_v48, %v5866_v40  ;;  %v5868_v7 = vld [vmem:[%s12557_s4 + $0x1a0] sm:$0xff]  ;;  %v5869_v20 = vld [vmem:[%s12557_s4 + $0x1a8] sm:$0xff]  ;;  %s5725_s29 = sshll.u32 %s496_s27, 4  ;;  %s12513_s29 = int_to_ptr.vmem [resolvable:$true] %s5725_s29 }
  0x3c   : > { %8877 = vmatprep.subr.bf16.mxu1 %v10093_v3  ;;  %12610 = vst [vmem:[#allocation16_spill] sm:$0xff] %v10771_v33  ;;  %v10795_v2 = vpack.c.bf16 %v5932_v52, %v5931_v51  ;;  %v5933_v40 = vld [vmem:[%s12557_s4 + $0x380] sm:$0xff]  ;;  %v5934_v48 = vld [vmem:[%s12557_s4 + $0x388] sm:$0xff]  ;;  %v10815_v51 = vpack.c.bf16 %v5869_v20, %v5868_v7  ;;  %v5935_v7 = vld [vmem:[%s12557_s4 + $0x390] sm:$0xff]  ;;  %s10029_s21 = scalar_lea.vmem %s12513_s29, 16  ;;  %p10036_p0 = scmp.lt.s32.totalorder %s12513_s29, %s10034_s15 }
  0x3d   : > { %v10819_v52 = vpack.c.bf16 %v5934_v48, %v5933_v40  ;;  %v5936_v20 = vld [vmem:[%s12557_s4 + $0x398] sm:$0xff]  ;;  %p10030_p11 = scmp.ne.s32.totalorder %s12513_s29, %s10029_s21  ;;  %p10037_p1 = scmp.lt.s32.totalorder %s10035_s26, %s10029_s21 }
  0x3e   : > { %8789 = vmatpush3.bf16.msra.mxu0 %v10433_v61  ;;  %12611 = vst [vmem:[#allocation17_spill] sm:$0xff] %v10795_v2  ;;  %12612 = vst [vmem:[#allocation18_spill] sm:$0xff] %v10815_v51  ;;  %v10839_v48 = vpack.c.bf16 %v5936_v20, %v5935_v7 }
  0x3f   : > { %8879 = vmatpush3.bf16.msra.mxu1 %v10437_v62  ;;  %8790 = vmatprep.subr.bf16.mxu0 %v10093_v3  ;;  %12613 = vst [vmem:[#allocation19_spill] sm:$0xff] %v10819_v52  ;;  %p10031_p12 = pnand %p10030_p11, %p10210_p5  ;;  %p10038_p2 = por %p10037_p1, %p10036_p0 }
  0x40   : > { %8880 = vmatprep.subr.bf16.mxu1 %v10093_v3  ;;  %12614 = vst [vmem:[#allocation20_spill] sm:$0xff] %v10839_v48 }
  0x41   : > { %p10032_p13 = pneg %p10031_p12 }
  0x42   : > { %8792 = vmatpush3.bf16.msra.mxu0 %v10453_v5 }
  0x43   : > { %8882 = vmatpush3.bf16.msra.mxu1 %v10457_v6  ;;  %8793 = vmatprep.subr.bf16.mxu0 %v10093_v3  ;;  %p10039_p3 = pnand %p10038_p2, %p10032_p13 }
  0x44   : > { %8883 = vmatprep.subr.bf16.mxu1 %v10093_v3 }
  0x46   : > { %8795 = vmatpush3.bf16.msra.mxu0 %v10473_v15 }
  0x47   : > { %8885 = vmatpush3.bf16.msra.mxu1 %v10477_v16  ;;  %8796 = vmatprep.subr.bf16.mxu0 %v10093_v3 }
  0x48   : > { %8886 = vmatprep.subr.bf16.mxu1 %v10093_v3 }
  0x49   : > { %7059 = vmatmul.mubr.msk.f32.vlgmr.msra.gmra.mrb[0].mxu0 %vm542_vm1, %v10497_v23 }
  0x4a   : > { %8798 = vmatpush3.bf16.msra.mxu0 %v10499_v26  ;;  %7194 = vmatmul.mubr.msk.f32.vlgmr.msra.gmra.mrb[0].mxu1 %vm542_vm1, %v10497_v23 }
  0x4b   : > { %8888 = vmatpush3.bf16.msra.mxu1 %v10503_v27  ;;  %8799 = vmatprep.subr.bf16.mxu0 %v10093_v3 }
  0x4c   : > { %8889 = vmatprep.subr.bf16.mxu1 %v10093_v3  ;;  %7085 = vmatprep.mubr.msk.f32.mxu0 %vm10094_vm0, %v12577_v11 }
  0x4d   : > { %7220 = vmatprep.mubr.msk.f32.mxu1 %vm10094_vm0, %v12577_v11 }
  0x4e   : > { %8801 = vmatpush3.bf16.msra.mxu0 %v10523_v34 }
  0x4f   : > { %8891 = vmatpush3.bf16.msra.mxu1 %v10527_v35  ;;  %8802 = vmatprep.subr.bf16.mxu0 %v10093_v3 }
  0x50   : > { %8892 = vmatprep.subr.bf16.mxu1 %v10093_v3 }
  0x52   : > { %8804 = vmatpush3.bf16.msra.mxu0 %v10547_v45 }
  0x53   : > { %8894 = vmatpush3.bf16.msra.mxu1 %v10551_v46  ;;  %8805 = vmatprep.subr.bf16.mxu0 %v10093_v3 }
  0x54   : > { %8895 = vmatprep.subr.bf16.mxu1 %v10093_v3 }
  0x56   : > { %8807 = vmatpush3.bf16.msra.mxu0 %v10567_v53 }
  0x57   : > { %8897 = vmatpush3.bf16.msra.mxu1 %v10571_v54  ;;  %8808 = vmatprep.subr.bf16.mxu0 %v10093_v3 }
  0x58   : > { %8898 = vmatprep.subr.bf16.mxu1 %v10093_v3 }
  0x5a   : > { %8810 = vmatpush3.bf16.msra.mxu0 %v10587_v63 }
  0x5b   : > { %8900 = vmatpush3.bf16.msra.mxu1 %v10591_v0  ;;  %8811 = vmatprep.subr.bf16.mxu0 %v10093_v3 }
  0x5c   : > { %8901 = vmatprep.subr.bf16.mxu1 %v10093_v3 }
  0x5e   : > { %8813 = vmatpush3.bf16.msra.mxu0 %v10607_v10 }
  0x5f   : > { %8903 = vmatpush3.bf16.msra.mxu1 %v10611_v14  ;;  %8814 = vmatprep.subr.bf16.mxu0 %v10093_v3 }
  0x60   : > { %8904 = vmatprep.subr.bf16.mxu1 %v10093_v3 }
  0x61   : > { %7086 = vmatmul.mubr.msk.f32.vlgmr.msra.gmra.mrb[0].mxu0 %vm542_vm1, %v10631_v28 }
  0x62   : > { %8816 = vmatpush3.bf16.msra.mxu0 %v10633_v29  ;;  %7221 = vmatmul.mubr.msk.f32.vlgmr.msra.gmra.mrb[0].mxu1 %vm542_vm1, %v10631_v28 }
  0x63   : > { %8906 = vmatpush3.bf16.msra.mxu1 %v10637_v32  ;;  %8817 = vmatprep.subr.bf16.mxu0 %v10093_v3 }
  0x64   : > { %8907 = vmatprep.subr.bf16.mxu1 %v10093_v3  ;;  %7112 = vmatprep.mubr.msk.f32.mxu0 %vm10094_vm0, %v12577_v11 }
  0x65   : > { %7247 = vmatprep.mubr.msk.f32.mxu1 %vm10094_vm0, %v12577_v11 }
  0x66   : > { %8819 = vmatpush3.bf16.msra.mxu0 %v10657_v41 }
  0x67   : > { %8909 = vmatpush3.bf16.msra.mxu1 %v10661_v47  ;;  %8820 = vmatprep.subr.bf16.mxu0 %v10093_v3 }
  0x68   : > { %8910 = vmatprep.subr.bf16.mxu1 %v10093_v3 }
  0x6a   : > { %8822 = vmatpush3.bf16.msra.mxu0 %v10681_v58 }
  0x6b   : > { %8912 = vmatpush3.bf16.msra.mxu1 %v10685_v59  ;;  %8823 = vmatprep.subr.bf16.mxu0 %v10093_v3 }
  0x6c   : > { %8913 = vmatprep.subr.bf16.mxu1 %v10093_v3 }
  0x6e   : > { %8825 = vmatpush3.bf16.msra.mxu0 %v10701_v9 }
  0x6f   : > { %8915 = vmatpush3.bf16.msra.mxu1 %v10705_v17  ;;  %8826 = vmatprep.subr.bf16.mxu0 %v10093_v3 }
  0x70   : > { %8916 = vmatprep.subr.bf16.mxu1 %v10093_v3 }
  0x72   : > { %8828 = vmatpush3.bf16.msra.mxu0 %v10721_v38 }
  0x73   : > { %8918 = vmatpush3.bf16.msra.mxu1 %v10725_v39  ;;  %8829 = vmatprep.subr.bf16.mxu0 %v10093_v3 }
  0x74   : > { %8919 = vmatprep.subr.bf16.mxu1 %v10093_v3 }
  0x76   : > { %8831 = vmatpush3.bf16.msra.mxu0 %v10741_v57 }
  0x77   : > { %8921 = vmatpush3.bf16.msra.mxu1 %v10749_v60  ;;  %8832 = vmatprep.subr.bf16.mxu0 %v10093_v3 }
  0x78   : > { %8922 = vmatprep.subr.bf16.mxu1 %v10093_v3 }
  0x79   : > { %7113 = vmatmul.mubr.msk.f32.vlgmr.msra.gmra.mrb[0].mxu0 %vm542_vm1, %v10764_v21 }
  0x7a   : > { %8834 = vmatpush3.bf16.msra.mxu0 %v10767_v22  ;;  %7248 = vmatmul.mubr.msk.f32.vlgmr.msra.gmra.mrb[0].mxu1 %vm542_vm1, %v10764_v21  ;;  %v5871_v22 = vld [vmem:[%s12557_s4 + $0x1b8] sm:$0xff] }
  0x7b   : > { %8924 = vmatpush3.bf16.msra.mxu1 %v10771_v33  ;;  %8835 = vmatprep.subr.bf16.mxu0 %v10093_v3  ;;  %v5870_v33 = vld [vmem:[%s12557_s4 + $0x1b0] sm:$0xff] }
  0x7c   : > { %8925 = vmatprep.subr.bf16.mxu1 %v10093_v3  ;;  %7139 = vmatprep.mubr.msk.f32.mxu0 %vm10094_vm0, %v12577_v11  ;;  %v10835_v40 = vpack.c.bf16 %v5871_v22, %v5870_v33  ;;  %v5937_v22 = vld [vmem:[%s12557_s4 + $0x3a0] sm:$0xff]  ;;  %v5938_v33 = vld [vmem:[%s12557_s4 + $0x3a8] sm:$0xff] }
  0x7d   : > { %7274 = vmatprep.mubr.msk.f32.mxu1 %vm10094_vm0, %v12577_v11  ;;  %v5872_v11 = vld [vmem:[%s12557_s4 + $0x1c0] sm:$0xff]  ;;  %v10859_v20 = vpack.c.bf16 %v5938_v33, %v5937_v22 }
  0x7e   : > { %8837 = vmatpush3.bf16.msra.mxu0 %v10791_v1 }
  0x7f   : > { %8927 = vmatpush3.bf16.msra.mxu1 %v10795_v2  ;;  %8838 = vmatprep.subr.bf16.mxu0 %v10093_v3  ;;  %v5873_v2 = vld [vmem:[%s12557_s4 + $0x1c8] sm:$0xff] }
  0x80   : > { %8928 = vmatprep.subr.bf16.mxu1 %v10093_v3  ;;  %v10855_v7 = vpack.c.bf16 %v5873_v2, %v5872_v11  ;;  %v5939_v11 = vld [vmem:[%s12557_s4 + $0x3b0] sm:$0xff]  ;;  %v5940_v2 = vld [vmem:[%s12557_s4 + $0x3b8] sm:$0xff] }
  0x81   : > { %v10879_v33 = vpack.c.bf16 %v5940_v2, %v5939_v11  ;;  %v12618_v11 = vld [vmem:[#allocation17_spill] sm:$0xff]  ;;  %v12619_v2 = vld [vmem:[#allocation18_spill] sm:$0xff] }
  0x82   : > { %8840 = vmatpush3.bf16.msra.mxu0 %v10815_v51  ;;  %v5875_v51 = vld [vmem:[%s12557_s4 + $0x1d8] sm:$0xff] }
  0x83   : > { %8930 = vmatpush3.bf16.msra.mxu1 %v10819_v52  ;;  %8841 = vmatprep.subr.bf16.mxu0 %v10093_v3  ;;  %v5874_v52 = vld [vmem:[%s12557_s4 + $0x1d0] sm:$0xff] }
  0x84   : > { %8931 = vmatprep.subr.bf16.mxu1 %v10093_v3  ;;  %v10875_v22 = vpack.c.bf16 %v5875_v51, %v5874_v52  ;;  %v12616_v51 = vld [vmem:[#allocation15_spill] sm:$0xff]  ;;  %v12617_v52 = vld [vmem:[#allocation16_spill] sm:$0xff] }
  0x86   : > { %8843 = vmatpush3.bf16.msra.mxu0 %v10835_v40 }
  0x87   : > { %8933 = vmatpush3.bf16.msra.mxu1 %v10839_v48  ;;  %8844 = vmatprep.subr.bf16.mxu0 %v10093_v3  ;;  %v10883_v48 = vrot.slane %v10497_v23, 1  ;;  %v12615_v23 = vmov 0.0  }
  0x88   : > { %8934 = vmatprep.subr.bf16.mxu1 %v10093_v3 }
  0x8a   : > { %8846 = vmatpush3.bf16.msra.mxu0 %v10855_v7 }
  0x8b   : > { %8936 = vmatpush3.bf16.msra.mxu1 %v10859_v20  ;;  %8847 = vmatprep.subr.bf16.mxu0 %v10093_v3 }
  0x8c   : > { %8937 = vmatprep.subr.bf16.mxu1 %v10093_v3 }
  0x8e   : > { %8849 = vmatpush3.bf16.msra.mxu0 %v10875_v22 }
  0x8f   : > { %8939 = vmatpush3.bf16.msra.mxu1 %v10879_v33  ;;  %8940 = vmatprep.subr.bf16.mxu0 %v10093_v3 }
  0x90   : > { %9030 = vmatprep.subr.bf16.mxu1 %v10093_v3 }
  0x91   : > { %7140 = vmatmul.mubr.msk.f32.vlgmr.msra.gmra.mrb[0].mxu0 %vm542_vm1, %v10883_v48 }
  0x92   : > { %7275 = vmatmul.mubr.msk.f32.vlgmr.msra.gmra.mrb[0].mxu1 %vm542_vm1, %v10883_v48  ;;  %8942 = vmatpush3.bf16.msra.mxu0 %v10231_v4 }
  0x93   : > { %9032 = vmatpush3.bf16.msra.mxu1 %v10242_v8  ;;  %8943 = vmatprep.subr.bf16.mxu0 %v10093_v3 }
  0x94   : > { %9033 = vmatprep.subr.bf16.mxu1 %v10093_v3  ;;  %7301 = vmatprep.mubr.msk.f32.mxu0 %vm10094_vm0, %v12615_v23 }
  0x95   : > { %7436 = vmatprep.mubr.msk.f32.mxu1 %vm10094_vm0, %v12615_v23 }
  0x96   : > { %8945 = vmatpush3.bf16.msra.mxu0 %v10255_v12 }
  0x97   : > { %9035 = vmatpush3.bf16.msra.mxu1 %v10259_v13  ;;  %8946 = vmatprep.subr.bf16.mxu0 %v10093_v3 }
  0x98   : > { %9036 = vmatprep.subr.bf16.mxu1 %v10093_v3 }
  0x9a   : > { %8948 = vmatpush3.bf16.msra.mxu0 %v10275_v18 }
  0x9b   : > { %9038 = vmatpush3.bf16.msra.mxu1 %v10279_v19  ;;  %8949 = vmatprep.subr.bf16.mxu0 %v10093_v3 }
  0x9c   : > { %9039 = vmatprep.subr.bf16.mxu1 %v10093_v3 }
  0x9e   : > { %8951 = vmatpush3.bf16.msra.mxu0 %v10296_v24 }
  0x9f   : > { %9041 = vmatpush3.bf16.msra.mxu1 %v10300_v25  ;;  %8952 = vmatprep.subr.bf16.mxu0 %v10093_v3 }
  0xa0   : > { %9042 = vmatprep.subr.bf16.mxu1 %v10093_v3 }
  0xa2   : > { %8954 = vmatpush3.bf16.msra.mxu0 %v10317_v30 }
  0xa3   : > { %9044 = vmatpush3.bf16.msra.mxu1 %v10321_v31  ;;  %8955 = vmatprep.subr.bf16.mxu0 %v10093_v3 }
  0xa4   : > { %9045 = vmatprep.subr.bf16.mxu1 %v10093_v3 }
  0xa6   : > { %8957 = vmatpush3.bf16.msra.mxu0 %v10339_v36 }
  0xa7   : > { %9047 = vmatpush3.bf16.msra.mxu1 %v10343_v37  ;;  %8958 = vmatprep.subr.bf16.mxu0 %v10093_v3 }
  0xa8   : > { %9048 = vmatprep.subr.bf16.mxu1 %v10093_v3 }
  0xa9   : > { %7302 = vmatmul.mubr.msk.f32.vlgmr.msra.gmra.mrb[2].mxu0 %vm542_vm1, %v10631_v28 }
  0xaa   : > { %8960 = vmatpush3.bf16.msra.mxu0 %v10365_v43  ;;  %7437 = vmatmul.mubr.msk.f32.vlgmr.msra.gmra.mrb[2].mxu1 %vm542_vm1, %v10631_v28 }
  0xab   : > { %9050 = vmatpush3.bf16.msra.mxu1 %v10369_v44  ;;  %8961 = vmatprep.subr.bf16.mxu0 %v10093_v3 }
  0xac   : > { %9051 = vmatprep.subr.bf16.mxu1 %v10093_v3  ;;  %7328 = vmatprep.mubr.msk.f32.mxu0 %vm10094_vm0, %v12615_v23 }
  0xad   : > { %7463 = vmatprep.mubr.msk.f32.mxu1 %vm10094_vm0, %v12615_v23 }
  0xae   : > { %8963 = vmatpush3.bf16.msra.mxu0 %v10389_v49 }
  0xaf   : > { %9053 = vmatpush3.bf16.msra.mxu1 %v10393_v50  ;;  %8964 = vmatprep.subr.bf16.mxu0 %v10093_v3 }
  0xb0   : > { %9054 = vmatprep.subr.bf16.mxu1 %v10093_v3 }
  0xb2   : > { %8966 = vmatpush3.bf16.msra.mxu0 %v10413_v55 }
  0xb3   : > { %9056 = vmatpush3.bf16.msra.mxu1 %v10417_v56  ;;  %8967 = vmatprep.subr.bf16.mxu0 %v10093_v3 }
  0xb4   : > { %9057 = vmatprep.subr.bf16.mxu1 %v10093_v3 }
  0xb6   : > { %8969 = vmatpush3.bf16.msra.mxu0 %v10433_v61 }
  0xb7   : > { %9059 = vmatpush3.bf16.msra.mxu1 %v10437_v62  ;;  %8970 = vmatprep.subr.bf16.mxu0 %v10093_v3 }
  0xb8   : > { %9060 = vmatprep.subr.bf16.mxu1 %v10093_v3 }
  0xba   : > { %8972 = vmatpush3.bf16.msra.mxu0 %v10453_v5 }
  0xbb   : > { %9062 = vmatpush3.bf16.msra.mxu1 %v10457_v6  ;;  %8973 = vmatprep.subr.bf16.mxu0 %v10093_v3 }
  0xbc   : > { %9063 = vmatprep.subr.bf16.mxu1 %v10093_v3 }
  0xbe   : > { %8975 = vmatpush3.bf16.msra.mxu0 %v10473_v15 }
  0xbf   : > { %9065 = vmatpush3.bf16.msra.mxu1 %v10477_v16  ;;  %8976 = vmatprep.subr.bf16.mxu0 %v10093_v3 }
  0xc0   : > { %9066 = vmatprep.subr.bf16.mxu1 %v10093_v3 }
  0xc1   : > { %7329 = vmatmul.mubr.msk.f32.vlgmr.msra.gmra.mrb[2].mxu0 %vm542_vm1, %v10363_v42 }
  0xc2   : > { %8978 = vmatpush3.bf16.msra.mxu0 %v10499_v26  ;;  %7464 = vmatmul.mubr.msk.f32.vlgmr.msra.gmra.mrb[2].mxu1 %vm542_vm1, %v10363_v42 }
  0xc3   : > { %9068 = vmatpush3.bf16.msra.mxu1 %v10503_v27  ;;  %8979 = vmatprep.subr.bf16.mxu0 %v10093_v3 }
  0xc4   : > { %9069 = vmatprep.subr.bf16.mxu1 %v10093_v3  ;;  %7355 = vmatprep.mubr.msk.f32.mxu0 %vm10094_vm0, %v12615_v23 }
  0xc5   : > { %7490 = vmatprep.mubr.msk.f32.mxu1 %vm10094_vm0, %v12615_v23 }
  0xc6   : > { %8981 = vmatpush3.bf16.msra.mxu0 %v10523_v34 }
  0xc7   : > { %9071 = vmatpush3.bf16.msra.mxu1 %v10527_v35  ;;  %8982 = vmatprep.subr.bf16.mxu0 %v10093_v3 }
  0xc8   : > { %9072 = vmatprep.subr.bf16.mxu1 %v10093_v3 }
  0xca   : > { %8984 = vmatpush3.bf16.msra.mxu0 %v10547_v45 }
  0xcb   : > { %9074 = vmatpush3.bf16.msra.mxu1 %v10551_v46  ;;  %8985 = vmatprep.subr.bf16.mxu0 %v10093_v3 }
  0xcc   : > { %9075 = vmatprep.subr.bf16.mxu1 %v10093_v3 }
  0xce   : > { %8987 = vmatpush3.bf16.msra.mxu0 %v10567_v53 }
  0xcf   : > { %9077 = vmatpush3.bf16.msra.mxu1 %v10571_v54  ;;  %8988 = vmatprep.subr.bf16.mxu0 %v10093_v3 }
  0xd0   : > { %9078 = vmatprep.subr.bf16.mxu1 %v10093_v3 }
  0xd2   : > { %8990 = vmatpush3.bf16.msra.mxu0 %v10587_v63 }
  0xd3   : > { %9080 = vmatpush3.bf16.msra.mxu1 %v10591_v0  ;;  %8991 = vmatprep.subr.bf16.mxu0 %v10093_v3 }
  0xd4   : > { %9081 = vmatprep.subr.bf16.mxu1 %v10093_v3 }
  0xd6   : > { %8993 = vmatpush3.bf16.msra.mxu0 %v10607_v10 }
  0xd7   : > { %9083 = vmatpush3.bf16.msra.mxu1 %v10611_v14  ;;  %8994 = vmatprep.subr.bf16.mxu0 %v10093_v3 }
  0xd8   : > { %9084 = vmatprep.subr.bf16.mxu1 %v10093_v3 }
  0xd9   : > { %7356 = vmatmul.mubr.msk.f32.vlgmr.msra.gmra.mrb[2].mxu0 %vm542_vm1, %v10764_v21 }
  0xda   : > { %8996 = vmatpush3.bf16.msra.mxu0 %v10633_v29  ;;  %7491 = vmatmul.mubr.msk.f32.vlgmr.msra.gmra.mrb[2].mxu1 %vm542_vm1, %v10764_v21 }
  0xdb   : > { %9086 = vmatpush3.bf16.msra.mxu1 %v10637_v32  ;;  %8997 = vmatprep.subr.bf16.mxu0 %v10093_v3 }
  0xdc   : > { %9087 = vmatprep.subr.bf16.mxu1 %v10093_v3  ;;  %7382 = vmatprep.mubr.msk.f32.mxu0 %vm10094_vm0, %v12615_v23 }
  0xdd   : > { %7517 = vmatprep.mubr.msk.f32.mxu1 %vm10094_vm0, %v12615_v23 }
  0xde   : > { %8999 = vmatpush3.bf16.msra.mxu0 %v10657_v41 }
  0xdf   : > { %9089 = vmatpush3.bf16.msra.mxu1 %v10661_v47  ;;  %9000 = vmatprep.subr.bf16.mxu0 %v10093_v3 }
  0xe0   : > { %9090 = vmatprep.subr.bf16.mxu1 %v10093_v3 }
  0xe2   : > { %9002 = vmatpush3.bf16.msra.mxu0 %v10681_v58 }
  0xe3   : > { %9092 = vmatpush3.bf16.msra.mxu1 %v10685_v59  ;;  %9003 = vmatprep.subr.bf16.mxu0 %v10093_v3 }
  0xe4   : > { %9093 = vmatprep.subr.bf16.mxu1 %v10093_v3 }
  0xe6   : > { %9005 = vmatpush3.bf16.msra.mxu0 %v10701_v9 }
  0xe7   : > { %9095 = vmatpush3.bf16.msra.mxu1 %v10705_v17  ;;  %9006 = vmatprep.subr.bf16.mxu0 %v10093_v3 }
  0xe8   : > { %9096 = vmatprep.subr.bf16.mxu1 %v10093_v3 }
  0xea   : > { %9008 = vmatpush3.bf16.msra.mxu0 %v10721_v38 }
  0xeb   : > { %9098 = vmatpush3.bf16.msra.mxu1 %v10725_v39  ;;  %9009 = vmatprep.subr.bf16.mxu0 %v10093_v3 }
  0xec   : > { %9099 = vmatprep.subr.bf16.mxu1 %v10093_v3 }
  0xee   : > { %9011 = vmatpush3.bf16.msra.mxu0 %v10741_v57 }
  0xef   : > { %9101 = vmatpush3.bf16.msra.mxu1 %v10749_v60  ;;  %9012 = vmatprep.subr.bf16.mxu0 %v10093_v3 }
  0xf0   : > { %9102 = vmatprep.subr.bf16.mxu1 %v10093_v3 }
  0xf1   : > { %7383 = vmatmul.mubr.msk.f32.vlgmr.msra.gmra.mrb[2].mxu0 %vm542_vm1, %v10883_v48 }
  0xf2   : > { %9014 = vmatpush3.bf16.msra.mxu0 %v12616_v51  ;;  %7518 = vmatmul.mubr.msk.f32.vlgmr.msra.gmra.mrb[2].mxu1 %vm542_vm1, %v10883_v48  ;;  %v12621_v51 = vld [vmem:[#allocation20_spill] sm:$0xff] }
  0xf3   : > { %9104 = vmatpush3.bf16.msra.mxu1 %v12617_v52  ;;  %9015 = vmatprep.subr.bf16.mxu0 %v10093_v3  ;;  %v12620_v52 = vld [vmem:[#allocation19_spill] sm:$0xff] }
  0xf4   : > { %9105 = vmatprep.subr.bf16.mxu1 %v10093_v3  ;;  %7409 = vmatprep.mubr.msk.f32.mxu0 %vm10094_vm0, %v12615_v23 }
  0xf5   : > { %7544 = vmatprep.mubr.msk.f32.mxu1 %vm10094_vm0, %v12615_v23 }
  0xf6   : > { %9017 = vmatpush3.bf16.msra.mxu0 %v10791_v1 }
  0xf7   : > { %9107 = vmatpush3.bf16.msra.mxu1 %v12618_v11  ;;  %9018 = vmatprep.subr.bf16.mxu0 %v10093_v3 }
  0xf8   : > { %9108 = vmatprep.subr.bf16.mxu1 %v10093_v3 }
  0xfa   : > { %9020 = vmatpush3.bf16.msra.mxu0 %v12619_v2 }
  0xfb   : > { %9110 = vmatpush3.bf16.msra.mxu1 %v12620_v52  ;;  %9021 = vmatprep.subr.bf16.mxu0 %v10093_v3  ;;  %v11046_v52 = vrot.slane %v10363_v42, 1 }
  0xfc   : > { %9111 = vmatprep.subr.bf16.mxu1 %v10093_v3 }
  0xfe   : > { %9023 = vmatpush3.bf16.msra.mxu0 %v10835_v40 }
  0xff   : > { %9113 = vmatpush3.bf16.msra.mxu1 %v12621_v51  ;;  %9024 = vmatprep.subr.bf16.mxu0 %v10093_v3 }
 0x100   : > { %9114 = vmatprep.subr.bf16.mxu1 %v10093_v3 }
 0x102   : > { %9026 = vmatpush3.bf16.msra.mxu0 %v10855_v7 }
 0x103   : > { %9116 = vmatpush3.bf16.msra.mxu1 %v10859_v20  ;;  %9027 = vmatprep.subr.bf16.mxu0 %v10093_v3 }
 0x104   : > { %9117 = vmatprep.subr.bf16.mxu1 %v10093_v3 }
 0x106   : > { %9029 = vmatpush3.bf16.msra.mxu0 %v10875_v22 }
 0x107   : > { %9119 = vmatpush3.bf16.msra.mxu1 %v10879_v33  ;;  %9120 = vmatprep.subr.bf16.mxu0 %v10093_v3 }
 0x108   : > { %9210 = vmatprep.subr.bf16.mxu1 %v10093_v3 }
 0x109   : > { %7410 = vmatmul.mubr.msk.f32.vlgmr.msra.gmra.mrb[2].mxu0 %vm542_vm1, %v11046_v52 }
 0x10a   : > { %7545 = vmatmul.mubr.msk.f32.vlgmr.msra.gmra.mrb[2].mxu1 %vm542_vm1, %v11046_v52  ;;  %9122 = vmatpush3.bf16.msra.mxu0 %v10231_v4 }
 0x10b   : > { %9212 = vmatpush3.bf16.msra.mxu1 %v10242_v8  ;;  %9123 = vmatprep.subr.bf16.mxu0 %v10093_v3 }
 0x10c   : > { %9213 = vmatprep.subr.bf16.mxu1 %v10093_v3  ;;  %7571 = vmatprep.mubr.msk.f32.mxu0 %vm10094_vm0, %v12615_v23 }
 0x10d   : > { %7706 = vmatprep.mubr.msk.f32.mxu1 %vm10094_vm0, %v12615_v23 }
 0x10e   : > { %9125 = vmatpush3.bf16.msra.mxu0 %v10255_v12 }
 0x10f   : > { %9215 = vmatpush3.bf16.msra.mxu1 %v10259_v13  ;;  %9126 = vmatprep.subr.bf16.mxu0 %v10093_v3 }
 0x110   : > { %9216 = vmatprep.subr.bf16.mxu1 %v10093_v3 }
 0x112   : > { %9128 = vmatpush3.bf16.msra.mxu0 %v10275_v18 }
 0x113   : > { %9218 = vmatpush3.bf16.msra.mxu1 %v10279_v19  ;;  %9129 = vmatprep.subr.bf16.mxu0 %v10093_v3 }
 0x114   : > { %9219 = vmatprep.subr.bf16.mxu1 %v10093_v3 }
 0x116   : > { %9131 = vmatpush3.bf16.msra.mxu0 %v10296_v24 }
 0x117   : > { %9221 = vmatpush3.bf16.msra.mxu1 %v10300_v25  ;;  %9132 = vmatprep.subr.bf16.mxu0 %v10093_v3 }
 0x118   : > { %9222 = vmatprep.subr.bf16.mxu1 %v10093_v3 }
 0x11a   : > { %9134 = vmatpush3.bf16.msra.mxu0 %v10317_v30 }
 0x11b   : > { %9224 = vmatpush3.bf16.msra.mxu1 %v10321_v31  ;;  %9135 = vmatprep.subr.bf16.mxu0 %v10093_v3 }
 0x11c   : > { %9225 = vmatprep.subr.bf16.mxu1 %v10093_v3 }
 0x11e   : > { %9137 = vmatpush3.bf16.msra.mxu0 %v10339_v36 }
 0x11f   : > { %9227 = vmatpush3.bf16.msra.mxu1 %v10343_v37  ;;  %9138 = vmatprep.subr.bf16.mxu0 %v10093_v3 }
 0x120   : > { %9228 = vmatprep.subr.bf16.mxu1 %v10093_v3 }
 0x121   : > { %7572 = vmatmul.mubr.msk.f32.vlgmr.msra.gmra.mrb[4].mxu0 %vm542_vm1, %v10764_v21 }
 0x122   : > { %9140 = vmatpush3.bf16.msra.mxu0 %v10365_v43  ;;  %7707 = vmatmul.mubr.msk.f32.vlgmr.msra.gmra.mrb[4].mxu1 %vm542_vm1, %v10764_v21 }
 0x123   : > { %9230 = vmatpush3.bf16.msra.mxu1 %v10369_v44  ;;  %9141 = vmatprep.subr.bf16.mxu0 %v10093_v3 }
 0x124   : > { %9231 = vmatprep.subr.bf16.mxu1 %v10093_v3  ;;  %7598 = vmatprep.mubr.msk.f32.mxu0 %vm10094_vm0, %v12615_v23 }
 0x125   : > { %7733 = vmatprep.mubr.msk.f32.mxu1 %vm10094_vm0, %v12615_v23 }
 0x126   : > { %9143 = vmatpush3.bf16.msra.mxu0 %v10389_v49 }
 0x127   : > { %9233 = vmatpush3.bf16.msra.mxu1 %v10393_v50  ;;  %9144 = vmatprep.subr.bf16.mxu0 %v10093_v3 }
 0x128   : > { %9234 = vmatprep.subr.bf16.mxu1 %v10093_v3 }
 0x12a   : > { %9146 = vmatpush3.bf16.msra.mxu0 %v10413_v55 }
 0x12b   : > { %9236 = vmatpush3.bf16.msra.mxu1 %v10417_v56  ;;  %9147 = vmatprep.subr.bf16.mxu0 %v10093_v3 }
 0x12c   : > { %9237 = vmatprep.subr.bf16.mxu1 %v10093_v3 }
 0x12e   : > { %9149 = vmatpush3.bf16.msra.mxu0 %v10433_v61 }
 0x12f   : > { %9239 = vmatpush3.bf16.msra.mxu1 %v10437_v62  ;;  %9150 = vmatprep.subr.bf16.mxu0 %v10093_v3 }
 0x130   : > { %9240 = vmatprep.subr.bf16.mxu1 %v10093_v3 }
 0x132   : > { %9152 = vmatpush3.bf16.msra.mxu0 %v10453_v5 }
 0x133   : > { %9242 = vmatpush3.bf16.msra.mxu1 %v10457_v6  ;;  %9153 = vmatprep.subr.bf16.mxu0 %v10093_v3 }
 0x134   : > { %9243 = vmatprep.subr.bf16.mxu1 %v10093_v3 }
 0x136   : > { %9155 = vmatpush3.bf16.msra.mxu0 %v10473_v15 }
 0x137   : > { %9245 = vmatpush3.bf16.msra.mxu1 %v10477_v16  ;;  %9156 = vmatprep.subr.bf16.mxu0 %v10093_v3 }
 0x138   : > { %9246 = vmatprep.subr.bf16.mxu1 %v10093_v3 }
 0x139   : > { %7599 = vmatmul.mubr.msk.f32.vlgmr.msra.gmra.mrb[4].mxu0 %vm542_vm1, %v10631_v28 }
 0x13a   : > { %9158 = vmatpush3.bf16.msra.mxu0 %v10499_v26  ;;  %7734 = vmatmul.mubr.msk.f32.vlgmr.msra.gmra.mrb[4].mxu1 %vm542_vm1, %v10631_v28 }
 0x13b   : > { %9248 = vmatpush3.bf16.msra.mxu1 %v10503_v27  ;;  %9159 = vmatprep.subr.bf16.mxu0 %v10093_v3 }
 0x13c   : > { %9249 = vmatprep.subr.bf16.mxu1 %v10093_v3  ;;  %7625 = vmatprep.mubr.msk.f32.mxu0 %vm10094_vm0, %v12615_v23 }
 0x13d   : > { %7760 = vmatprep.mubr.msk.f32.mxu1 %vm10094_vm0, %v12615_v23 }
 0x13e   : > { %9161 = vmatpush3.bf16.msra.mxu0 %v10523_v34 }
 0x13f   : > { %9251 = vmatpush3.bf16.msra.mxu1 %v10527_v35  ;;  %9162 = vmatprep.subr.bf16.mxu0 %v10093_v3 }
 0x140   : > { %9252 = vmatprep.subr.bf16.mxu1 %v10093_v3 }
 0x142   : > { %9164 = vmatpush3.bf16.msra.mxu0 %v10547_v45 }
 0x143   : > { %9254 = vmatpush3.bf16.msra.mxu1 %v10551_v46  ;;  %9165 = vmatprep.subr.bf16.mxu0 %v10093_v3 }
 0x144   : > { %9255 = vmatprep.subr.bf16.mxu1 %v10093_v3 }
 0x146   : > { %9167 = vmatpush3.bf16.msra.mxu0 %v10567_v53 }
 0x147   : > { %9257 = vmatpush3.bf16.msra.mxu1 %v10571_v54  ;;  %9168 = vmatprep.subr.bf16.mxu0 %v10093_v3 }
 0x148   : > { %9258 = vmatprep.subr.bf16.mxu1 %v10093_v3 }
 0x14a   : > { %9170 = vmatpush3.bf16.msra.mxu0 %v10587_v63 }
 0x14b   : > { %9260 = vmatpush3.bf16.msra.mxu1 %v10591_v0  ;;  %9171 = vmatprep.subr.bf16.mxu0 %v10093_v3 }
 0x14c   : > { %9261 = vmatprep.subr.bf16.mxu1 %v10093_v3 }
 0x14e   : > { %9173 = vmatpush3.bf16.msra.mxu0 %v10607_v10 }
 0x14f   : > { %9263 = vmatpush3.bf16.msra.mxu1 %v10611_v14  ;;  %9174 = vmatprep.subr.bf16.mxu0 %v10093_v3 }
 0x150   : > { %9264 = vmatprep.subr.bf16.mxu1 %v10093_v3 }
 0x151   : > { %7626 = vmatmul.mubr.msk.f32.vlgmr.msra.gmra.mrb[4].mxu0 %vm542_vm1, %v10883_v48 }
 0x152   : > { %9176 = vmatpush3.bf16.msra.mxu0 %v10633_v29  ;;  %7761 = vmatmul.mubr.msk.f32.vlgmr.msra.gmra.mrb[4].mxu1 %vm542_vm1, %v10883_v48 }
 0x153   : > { %9266 = vmatpush3.bf16.msra.mxu1 %v10637_v32  ;;  %9177 = vmatprep.subr.bf16.mxu0 %v10093_v3 }
 0x154   : > { %9267 = vmatprep.subr.bf16.mxu1 %v10093_v3  ;;  %7652 = vmatprep.mubr.msk.f32.mxu0 %vm10094_vm0, %v12615_v23 }
 0x155   : > { %7787 = vmatprep.mubr.msk.f32.mxu1 %vm10094_vm0, %v12615_v23 }
 0x156   : > { %9179 = vmatpush3.bf16.msra.mxu0 %v10657_v41 }
 0x157   : > { %9269 = vmatpush3.bf16.msra.mxu1 %v10661_v47  ;;  %9180 = vmatprep.subr.bf16.mxu0 %v10093_v3 }
 0x158   : > { %9270 = vmatprep.subr.bf16.mxu1 %v10093_v3 }
 0x15a   : > { %9182 = vmatpush3.bf16.msra.mxu0 %v10681_v58 }
 0x15b   : > { %9272 = vmatpush3.bf16.msra.mxu1 %v10685_v59  ;;  %9183 = vmatprep.subr.bf16.mxu0 %v10093_v3 }
 0x15c   : > { %9273 = vmatprep.subr.bf16.mxu1 %v10093_v3 }
 0x15e   : > { %9185 = vmatpush3.bf16.msra.mxu0 %v10701_v9 }
 0x15f   : > { %9275 = vmatpush3.bf16.msra.mxu1 %v10705_v17  ;;  %9186 = vmatprep.subr.bf16.mxu0 %v10093_v3  ;;  %v11215_v17 = vrot.slane %v10631_v28, 1 }
 0x160   : > { %9276 = vmatprep.subr.bf16.mxu1 %v10093_v3 }
 0x162   : > { %9188 = vmatpush3.bf16.msra.mxu0 %v10721_v38 }
 0x163   : > { %9278 = vmatpush3.bf16.msra.mxu1 %v10725_v39  ;;  %9189 = vmatprep.subr.bf16.mxu0 %v10093_v3  ;;  %v12622_v39 = vld [vmem:[#allocation15_spill] sm:$0xff] }
 0x164   : > { %v11175_v42 = vpop.f32.mrb[0].mxu0  ;;  %9279 = vmatprep.subr.bf16.mxu1 %v10093_v3 }
 0x165   : > { %v11178_v59 = vpop.f32.mrb[0].mxu1  ;;  %v7141_v58 = vpop.f32.mrb[1].mxu0 }
 0x166   : > { %v7276_v9 = vpop.f32.mrb[1].mxu1  ;;  %9191 = vmatpush3.bf16.msra.mxu0 %v10741_v57  ;;  %v12623_v58 = vld [vmem:[#allocation16_spill] sm:$0xff] }
 0x167   : > { %9281 = vmatpush3.bf16.msra.mxu1 %v10749_v60  ;;  %9192 = vmatprep.subr.bf16.mxu0 %v10093_v3  ;;  %v12624_v9 = vld [vmem:[#allocation19_spill] sm:$0xff] }
 0x168   : > { %9282 = vmatprep.subr.bf16.mxu1 %v10093_v3 }
 0x169   : > { %7653 = vmatmul.mubr.msk.f32.vlgmr.msra.gmra.mrb[4].mxu0 %vm542_vm1, %v11046_v52 }
 0x16a   : > { %9194 = vmatpush3.bf16.msra.mxu0 %v12622_v39  ;;  %7788 = vmatmul.mubr.msk.f32.vlgmr.msra.gmra.mrb[4].mxu1 %vm542_vm1, %v11046_v52 }
 0x16b   : > { %9284 = vmatpush3.bf16.msra.mxu1 %v12623_v58  ;;  %9195 = vmatprep.subr.bf16.mxu0 %v10093_v3 }
 0x16c   : > { %9285 = vmatprep.subr.bf16.mxu1 %v10093_v3  ;;  %7679 = vmatprep.mubr.msk.f32.mxu0 %vm10094_vm0, %v12615_v23 }
 0x16d   : > { %7814 = vmatprep.mubr.msk.f32.mxu1 %vm10094_vm0, %v12615_v23 }
 0x16e   : > { %9197 = vmatpush3.bf16.msra.mxu0 %v10791_v1 }
 0x16f   : > { %9287 = vmatpush3.bf16.msra.mxu1 %v12618_v11  ;;  %9198 = vmatprep.subr.bf16.mxu0 %v10093_v3 }
 0x170   : > { %9288 = vmatprep.subr.bf16.mxu1 %v10093_v3 }
 0x172   : > { %9200 = vmatpush3.bf16.msra.mxu0 %v12619_v2 }
 0x173   : > { %9290 = vmatpush3.bf16.msra.mxu1 %v12624_v9  ;;  %9201 = vmatprep.subr.bf16.mxu0 %v10093_v3 }
 0x174   : > { %9291 = vmatprep.subr.bf16.mxu1 %v10093_v3 }
 0x176   : > { %9203 = vmatpush3.bf16.msra.mxu0 %v10835_v40 }
 0x177   : > { %9293 = vmatpush3.bf16.msra.mxu1 %v12621_v51  ;;  %9204 = vmatprep.subr.bf16.mxu0 %v10093_v3 }
 0x178   : > { %9294 = vmatprep.subr.bf16.mxu1 %v10093_v3 }
 0x17a   : > { %9206 = vmatpush3.bf16.msra.mxu0 %v10855_v7 }
 0x17b   : > { %9296 = vmatpush3.bf16.msra.mxu1 %v10859_v20  ;;  %9207 = vmatprep.subr.bf16.mxu0 %v10093_v3 }
 0x17c   : > { %9297 = vmatprep.subr.bf16.mxu1 %v10093_v3 }
 0x17e   : > { %9209 = vmatpush3.bf16.msra.mxu0 %v10875_v22 }
 0x17f   : > { %9299 = vmatpush3.bf16.msra.mxu1 %v10879_v33  ;;  %9300 = vmatprep.subr.bf16.mxu0 %v10093_v3 }
 0x180   : > { %9390 = vmatprep.subr.bf16.mxu1 %v10093_v3 }
 0x181   : > { %7680 = vmatmul.mubr.msk.f32.vlgmr.msra.gmra.mrb[4].mxu0 %vm542_vm1, %v11215_v17 }
 0x182   : > { %7815 = vmatmul.mubr.msk.f32.vlgmr.msra.gmra.mrb[4].mxu1 %vm542_vm1, %v11215_v17  ;;  %9302 = vmatpush3.bf16.msra.mxu0 %v10231_v4  ;;  %v12625_v4 = vld [vmem:[#allocation10_spill] sm:$0xff] }
 0x183   : > { %9392 = vmatpush3.bf16.msra.mxu1 %v10242_v8  ;;  %9303 = vmatprep.subr.bf16.mxu0 %v10093_v3  ;;  %v12626_v8 = vld [vmem:[#allocation11_spill] sm:$0xff] }
 0x184   : > { %9393 = vmatprep.subr.bf16.mxu1 %v10093_v3  ;;  %7841 = vmatprep.mubr.msk.f32.mxu0 %vm10094_vm0, %v12615_v23 }
 0x185   : > { %7976 = vmatprep.mubr.msk.f32.mxu1 %vm10094_vm0, %v12615_v23 }
 0x186   : > { %9305 = vmatpush3.bf16.msra.mxu0 %v10255_v12  ;;  %v12627_v12 = vld [vmem:[#allocation12_spill] sm:$0xff] }
 0x187   : > { %9395 = vmatpush3.bf16.msra.mxu1 %v10259_v13  ;;  %9306 = vmatprep.subr.bf16.mxu0 %v10093_v3  ;;  %v12628_v13 = vld [vmem:[#allocation13_spill] sm:$0xff] }
 0x188   : > { %9396 = vmatprep.subr.bf16.mxu1 %v10093_v3 }
 0x18a   : > { %9308 = vmatpush3.bf16.msra.mxu0 %v10275_v18  ;;  %v12629_v18 = vld [vmem:[#allocation14_spill] sm:$0xff] }
 0x18b   : > { %9398 = vmatpush3.bf16.msra.mxu1 %v10279_v19  ;;  %9309 = vmatprep.subr.bf16.mxu0 %v10093_v3 }
 0x18c   : > { %9399 = vmatprep.subr.bf16.mxu1 %v10093_v3 }
 0x18e   : > { %9311 = vmatpush3.bf16.msra.mxu0 %v10296_v24  ;;  %v12630_v24 = vmax.f32 %v11175_v42, %v11178_v59  ;;  %v6047_v59 = vld [vmem:[%s12559_s6 + $0x258] sm:$0xff]  ;;  %v6028_v42 = vld [vmem:[%s12559_s6 + $0x1c0] sm:$0xff] }
 0x18f   : > { %9401 = vmatpush3.bf16.msra.mxu1 %v10300_v25  ;;  %9312 = vmatprep.subr.bf16.mxu0 %v10093_v3 }
 0x190   : > { %9402 = vmatprep.subr.bf16.mxu1 %v10093_v3 }
 0x192   : > { %9314 = vmatpush3.bf16.msra.mxu0 %v10317_v30 }
 0x193   : > { %9404 = vmatpush3.bf16.msra.mxu1 %v10321_v31  ;;  %9315 = vmatprep.subr.bf16.mxu0 %v10093_v3 }
 0x194   : > { %9405 = vmatprep.subr.bf16.mxu1 %v10093_v3 }
 0x196   : > { %9317 = vmatpush3.bf16.msra.mxu0 %v10339_v36 }
 0x197   : > { %9407 = vmatpush3.bf16.msra.mxu1 %v10343_v37  ;;  %9318 = vmatprep.subr.bf16.mxu0 %v10093_v3 }
 0x198   : > { %9408 = vmatprep.subr.bf16.mxu1 %v10093_v3 }
 0x199   : > { %7842 = vmatmul.mubr.msk.f32.vlgmr.msra.gmra.mrb[6].mxu0 %vm542_vm1, %v10883_v48 }
 0x19a   : > { %9320 = vmatpush3.bf16.msra.mxu0 %v10365_v43  ;;  %7977 = vmatmul.mubr.msk.f32.vlgmr.msra.gmra.mrb[6].mxu1 %vm542_vm1, %v10883_v48  ;;  %v5973_v43 = vld [vmem:[%s12559_s6 + $0x58] sm:$0xff] }
 0x19b   : > { %9410 = vmatpush3.bf16.msra.mxu1 %v10369_v44  ;;  %9321 = vmatprep.subr.bf16.mxu0 %v10093_v3  ;;  %v5974_v44 = vld [vmem:[%s12559_s6 + $0x60] sm:$0xff] }
 0x19c   : > { %9411 = vmatprep.subr.bf16.mxu1 %v10093_v3  ;;  %7868 = vmatprep.mubr.msk.f32.mxu0 %vm10094_vm0, %v12615_v23 }
 0x19d   : > { %8003 = vmatprep.mubr.msk.f32.mxu1 %vm10094_vm0, %v12615_v23 }
 0x19e   : > { %9323 = vmatpush3.bf16.msra.mxu0 %v10389_v49  ;;  %v6038_v49 = vld [vmem:[%s12559_s6 + $0x210] sm:$0xff] }
 0x19f   : > { %9413 = vmatpush3.bf16.msra.mxu1 %v10393_v50  ;;  %9324 = vmatprep.subr.bf16.mxu0 %v10093_v3  ;;  %v6039_v50 = vld [vmem:[%s12559_s6 + $0x218] sm:$0xff] }
 0x1a0   : > { %9414 = vmatprep.subr.bf16.mxu1 %v10093_v3 }
 0x1a2   : > { %9326 = vmatpush3.bf16.msra.mxu0 %v10413_v55  ;;  %v3081_v55 = vrot.slane %v10764_v21, 1 }
 0x1a3   : > { %9416 = vmatpush3.bf16.msra.mxu1 %v10417_v56  ;;  %9327 = vmatprep.subr.bf16.mxu0 %v10093_v3  ;;  %v11400_v56 = vpack.c.bf16 %v5974_v44, %v5973_v43  ;;  %v3516_v43 = vld [vmem:[%s12559_s6 + $0x20] sm:$0xff]  ;;  %v3517_v44 = vld [vmem:[%s12559_s6 + $0x28] sm:$0xff] }
 0x1a4   : > { %9417 = vmatprep.subr.bf16.mxu1 %v10093_v3 }
 0x1a6   : > { %9329 = vmatpush3.bf16.msra.mxu0 %v10433_v61  ;;  %v11404_v61 = vpack.c.bf16 %v6039_v50, %v6038_v49  ;;  %v6031_v49 = vld [vmem:[%s12559_s6 + $0x1d8] sm:$0xff]  ;;  %v6032_v50 = vld [vmem:[%s12559_s6 + $0x1e0] sm:$0xff] }
 0x1a7   : > { %9419 = vmatpush3.bf16.msra.mxu1 %v10437_v62  ;;  %9330 = vmatprep.subr.bf16.mxu0 %v10093_v3  ;;  %v5975_v62 = vld [vmem:[%s12559_s6 + $0x68] sm:$0xff] }
 0x1a8   : > { %9420 = vmatprep.subr.bf16.mxu1 %v10093_v3 }
 0x1aa   : > { %9332 = vmatpush3.bf16.msra.mxu0 %v10453_v5  ;;  %v5976_v5 = vld [vmem:[%s12559_s6 + $0x70] sm:$0xff] }
 0x1ab   : > { %9422 = vmatpush3.bf16.msra.mxu1 %v10457_v6  ;;  %9333 = vmatprep.subr.bf16.mxu0 %v10093_v3  ;;  %v6040_v6 = vld [vmem:[%s12559_s6 + $0x220] sm:$0xff] }
 0x1ac   : > { %9423 = vmatprep.subr.bf16.mxu1 %v10093_v3 }
 0x1ae   : > { %9335 = vmatpush3.bf16.msra.mxu0 %v10473_v15  ;;  %v6041_v15 = vld [vmem:[%s12559_s6 + $0x228] sm:$0xff] }
 0x1af   : > { %9425 = vmatpush3.bf16.msra.mxu1 %v10477_v16  ;;  %9336 = vmatprep.subr.bf16.mxu0 %v10093_v3  ;;  %v11422_v16 = vpack.c.bf16 %v5976_v5, %v5975_v62  ;;  %v11578_v62 = vpack.c.bf16 %v6032_v50, %v6031_v49  ;;  %v3518_v5 = vld [vmem:[%s12559_s6 + $0x30] sm:$0xff]  ;;  %v5997_v49 = vld [vmem:[%s12559_s6 + $0xf8] sm:$0xff]  ;;  %v6061_v50 = vld [vmem:[%s12559_s6 + $0x2a8] sm:$0xff] }
 0x1b0   : > { %9426 = vmatprep.subr.bf16.mxu1 %v10093_v3 }
 0x1b1   : > { %7869 = vmatmul.mubr.msk.f32.vlgmr.msra.gmra.mrb[6].mxu0 %vm542_vm1, %v10764_v21 }
 0x1b2   : > { %9338 = vmatpush3.bf16.msra.mxu0 %v10499_v26  ;;  %8004 = vmatmul.mubr.msk.f32.vlgmr.msra.gmra.mrb[6].mxu1 %vm542_vm1, %v10764_v21  ;;  %v11426_v26 = vpack.c.bf16 %v6041_v15, %v6040_v6  ;;  %v3519_v6 = vld [vmem:[%s12559_s6 + $0x38] sm:$0xff]  ;;  %v6033_v15 = vld [vmem:[%s12559_s6 + $0x1e8] sm:$0xff] }
 0x1b3   : > { %9428 = vmatpush3.bf16.msra.mxu1 %v10503_v27  ;;  %9339 = vmatprep.subr.bf16.mxu0 %v10093_v3  ;;  %v5977_v27 = vld [vmem:[%s12559_s6 + $0x78] sm:$0xff] }
 0x1b4   : > { %9429 = vmatprep.subr.bf16.mxu1 %v10093_v3  ;;  %7895 = vmatprep.mubr.msk.f32.mxu0 %vm10094_vm0, %v12615_v23 }
 0x1b5   : > { %8030 = vmatprep.mubr.msk.f32.mxu1 %vm10094_vm0, %v12615_v23 }
 0x1b6   : > { %9341 = vmatpush3.bf16.msra.mxu0 %v10523_v34  ;;  %v5978_v34 = vld [vmem:[%s12559_s6 + $0x80] sm:$0xff] }
 0x1b7   : > { %9431 = vmatpush3.bf16.msra.mxu1 %v10527_v35  ;;  %9342 = vmatprep.subr.bf16.mxu0 %v10093_v3  ;;  %v6042_v35 = vld [vmem:[%s12559_s6 + $0x230] sm:$0xff] }
 0x1b8   : > { %9432 = vmatprep.subr.bf16.mxu1 %v10093_v3 }
 0x1ba   : > { %9344 = vmatpush3.bf16.msra.mxu0 %v10547_v45  ;;  %v6043_v45 = vld [vmem:[%s12559_s6 + $0x238] sm:$0xff] }
 0x1bb   : > { %9434 = vmatpush3.bf16.msra.mxu1 %v10551_v46  ;;  %9345 = vmatprep.subr.bf16.mxu0 %v10093_v3  ;;  %v11446_v46 = vpack.c.bf16 %v5978_v34, %v5977_v27  ;;  %v6034_v27 = vld [vmem:[%s12559_s6 + $0x1f0] sm:$0xff]  ;;  %v11596_v34 = vpack.c.bf16 %v3519_v6, %v3518_v5 }
 0x1bc   : > { %9435 = vmatprep.subr.bf16.mxu1 %v10093_v3  ;;  %v6062_v5 = vld [vmem:[%s12559_s6 + $0x2b0] sm:$0xff] }
 0x1be   : > { %9347 = vmatpush3.bf16.msra.mxu0 %v10567_v53  ;;  %v11450_v53 = vpack.c.bf16 %v6043_v45, %v6042_v35  ;;  %v11598_v35 = vpack.c.bf16 %v6034_v27, %v6033_v15  ;;  %v3520_v45 = vld [vmem:[%s12559_s6 + $0x40] sm:$0xff]  ;;  %v11747_v15 = vpack.c.bf16 %v6062_v5, %v6061_v50  ;;  %v6001_v27 = vld [vmem:[%s12559_s6 + $0x108] sm:$0xff]  ;;  %v6073_v50 = vld [vmem:[%s12559_s6 + $0x2f8] sm:$0xff] }
 0x1bf   : > { %9437 = vmatpush3.bf16.msra.mxu1 %v10571_v54  ;;  %9348 = vmatprep.subr.bf16.mxu0 %v10093_v3  ;;  %v5979_v54 = vld [vmem:[%s12559_s6 + $0x88] sm:$0xff] }
 0x1c0   : > { %9438 = vmatprep.subr.bf16.mxu1 %v10093_v3 }
 0x1c2   : > { %9350 = vmatpush3.bf16.msra.mxu0 %v10587_v63  ;;  %v5980_v63 = vld [vmem:[%s12559_s6 + $0x90] sm:$0xff] }
 0x1c3   : > { %9440 = vmatpush3.bf16.msra.mxu1 %v10591_v0  ;;  %9351 = vmatprep.subr.bf16.mxu0 %v10093_v3  ;;  %v6044_v0 = vld [vmem:[%s12559_s6 + $0x240] sm:$0xff] }
 0x1c4   : > { %9441 = vmatprep.subr.bf16.mxu1 %v10093_v3 }
 0x1c6   : > { %9353 = vmatpush3.bf16.msra.mxu0 %v10607_v10  ;;  %v6045_v10 = vld [vmem:[%s12559_s6 + $0x248] sm:$0xff] }
 0x1c7   : > { %9443 = vmatpush3.bf16.msra.mxu1 %v10611_v14  ;;  %9354 = vmatprep.subr.bf16.mxu0 %v10093_v3  ;;  %v11466_v14 = vpack.c.bf16 %v5980_v63, %v5979_v54  ;;  %v11470_v28 = vpack.c.bf16 %v6045_v10, %v6044_v0  ;;  %v3521_v54 = vld [vmem:[%s12559_s6 + $0x48] sm:$0xff]  ;;  %v6035_v63 = vld [vmem:[%s12559_s6 + $0x1f8] sm:$0xff]  ;;  %v6036_v0 = vld [vmem:[%s12559_s6 + $0x200] sm:$0xff] }
 0x1c8   : > { %9444 = vmatprep.subr.bf16.mxu1 %v10093_v3  ;;  %v11616_v10 = vpack.c.bf16 %v3521_v54, %v3520_v45  ;;  %v6002_v45 = vld [vmem:[%s12559_s6 + $0x110] sm:$0xff]  ;;  %v6066_v54 = vld [vmem:[%s12559_s6 + $0x2c0] sm:$0xff] }
 0x1c9   : > { %7896 = vmatmul.mubr.msk.f32.vlgmr.msra.gmra.mrb[6].mxu0 %vm542_vm1, %v11046_v52 }
 0x1ca   : > { %9356 = vmatpush3.bf16.msra.mxu0 %v10633_v29  ;;  %8031 = vmatmul.mubr.msk.f32.vlgmr.msra.gmra.mrb[6].mxu1 %vm542_vm1, %v11046_v52  ;;  %v5981_v29 = vld [vmem:[%s12559_s6 + $0x98] sm:$0xff] }
 0x1cb   : > { %9446 = vmatpush3.bf16.msra.mxu1 %v10637_v32  ;;  %9357 = vmatprep.subr.bf16.mxu0 %v10093_v3  ;;  %v5982_v32 = vld [vmem:[%s12559_s6 + $0xa0] sm:$0xff] }
 0x1cc   : > { %9447 = vmatprep.subr.bf16.mxu1 %v10093_v3  ;;  %7922 = vmatprep.mubr.msk.f32.mxu0 %vm10094_vm0, %v12615_v23 }
 0x1cd   : > { %8057 = vmatprep.mubr.msk.f32.mxu1 %vm10094_vm0, %v12615_v23 }
 0x1ce   : > { %9359 = vmatpush3.bf16.msra.mxu0 %v10657_v41  ;;  %v6046_v41 = vld [vmem:[%s12559_s6 + $0x250] sm:$0xff] }
 0x1cf   : > { %9449 = vmatpush3.bf16.msra.mxu1 %v10661_v47  ;;  %9360 = vmatprep.subr.bf16.mxu0 %v10093_v3  ;;  %v11486_v47 = vpack.c.bf16 %v5982_v32, %v5981_v29  ;;  %v11618_v29 = vpack.c.bf16 %v6036_v0, %v6035_v63  ;;  %v6067_v63 = vld [vmem:[%s12559_s6 + $0x2c8] sm:$0xff]  ;;  %v11770_v0 = vld [vmem:[%s12559_s6 + $0x100] sm:$0xf] }
 0x1d0   : > { %9450 = vmatprep.subr.bf16.mxu1 %v10093_v3 }
 0x1d2   : > { %9362 = vmatpush3.bf16.msra.mxu0 %v12625_v4 }
 0x1d3   : > { %9452 = vmatpush3.bf16.msra.mxu1 %v12626_v8  ;;  %9363 = vmatprep.subr.bf16.mxu0 %v10093_v3 }
 0x1d4   : > { %9453 = vmatprep.subr.bf16.mxu1 %v10093_v3 }
 0x1d6   : > { %9365 = vmatpush3.bf16.msra.mxu0 %v12627_v12  ;;  %v3514_v12 = vld [vmem:[%s12559_s6 + $0x10] sm:$0xff] }
 0x1d7   : > { %9455 = vmatpush3.bf16.msra.mxu1 %v12628_v13  ;;  %9366 = vmatprep.subr.bf16.mxu0 %v10093_v3 }
 0x1d8   : > { %9456 = vmatprep.subr.bf16.mxu1 %v10093_v3 }
 0x1da   : > { %9368 = vmatpush3.bf16.msra.mxu0 %v10721_v38  ;;  %v11500_v38 = vld [vmem:[%s12559_s6 + $0xa8] sm:$0xf] }
 0x1db   : > { %9458 = vmatpush3.bf16.msra.mxu1 %v12629_v18  ;;  %9369 = vmatprep.subr.bf16.mxu0 %v10093_v3  ;;  %v3515_v18 = vld [vmem:[%s12559_s6 + $0x18] sm:$0xff] }
 0x1dc   : > { %v1720_v19 = vpop.f32.mrb[2].mxu0  ;;  %9459 = vmatprep.subr.bf16.mxu1 %v10093_v3 }
 0x1dd   : > { %v11348_v25 = vmax.f32 %v12630_v24, %v1720_v19  ;;  %v11350_v30 = vpop.f32.mrb[2].mxu1  ;;  %v7411_v31 = vpop.f32.mrb[3].mxu0  ;;  %v6029_v19 = vld [vmem:[%s12559_s6 + $0x1c8] sm:$0xff]  ;;  %v6030_v24 = vld [vmem:[%s12559_s6 + $0x1d0] sm:$0xff] }
 0x1de   : > { %v7546_v36 = vpop.f32.mrb[3].mxu1  ;;  %9371 = vmatpush3.bf16.msra.mxu0 %v10741_v57  ;;  %v11552_v31 = vpack.c.bf16 %v3515_v18, %v3514_v12  ;;  %v5995_v12 = vld [vmem:[%s12559_s6 + $0xe8] sm:$0xff]  ;;  %v6059_v18 = vld [vmem:[%s12559_s6 + $0x298] sm:$0xff] }
 0x1df   : > { %v2079_v37 = vmax.f32 %v11348_v25, %v11350_v30  ;;  %9461 = vmatpush3.bf16.msra.mxu1 %v10749_v60  ;;  %9372 = vmatprep.subr.bf16.mxu0 %v10093_v3  ;;  %v11554_v36 = vpack.c.bf16 %v6030_v24, %v6029_v19  ;;  %v6054_v25 = vld [vmem:[%s12559_s6 + $0x270] sm:$0xff]  ;;  %v6060_v19 = vld [vmem:[%s12559_s6 + $0x2a0] sm:$0xff] }
 0x1e0   : > { %9462 = vmatprep.subr.bf16.mxu1 %v10093_v3  ;;  %v11644_v30 = vld [vmem:[%s12559_s6 + $0x50] sm:$0xf] }
 0x1e1   : > { %7923 = vmatmul.mubr.msk.f32.vlgmr.msra.gmra.mrb[6].mxu0 %vm542_vm1, %v11215_v17 }
 0x1e2   : > { %9374 = vmatpush3.bf16.msra.mxu0 %v12622_v39  ;;  %8058 = vmatmul.mubr.msk.f32.vlgmr.msra.gmra.mrb[6].mxu1 %vm542_vm1, %v11215_v17  ;;  %v11491_v17 = vpack.c.bf16 %v6047_v59, %v6046_v41  ;;  %v11505_v39 = vld [vmem:[%s12559_s6 + $0x260] sm:$0xf]  ;;  %v5988_v41 = vld [vmem:[%s12559_s6 + $0xb0] sm:$0xff]  ;;  %v5989_v59 = vld [vmem:[%s12559_s6 + $0xb8] sm:$0xff] }
 0x1e3   : > { %9464 = vmatpush3.bf16.msra.mxu1 %v12623_v58  ;;  %9375 = vmatprep.subr.bf16.mxu0 %v10093_v3  ;;  %v5952_v58 = vld [vmem:[%s12558_s5] ss:$0 sm:$0xff] }
 0x1e4   : > { %9465 = vmatprep.subr.bf16.mxu1 %v10093_v3  ;;  %7949 = vmatprep.mubr.msk.f32.mxu0 %vm10094_vm0, %v12615_v23  ;;  %v2087_v32 = vadd.f32 %v5952_v58, %v2079_v37  ;;  %v11649_v37 = vld [vmem:[%s12559_s6 + $0x208] sm:$0xf] }
 0x1e5   : > { %8084 = vmatprep.mubr.msk.f32.mxu1 %vm10094_vm0, %v12615_v23 }
 0x1e6   : > { %9377 = vmatpush3.bf16.msra.mxu0 %v10791_v1 }
 0x1e7   : > { %9467 = vmatpush3.bf16.msra.mxu1 %v12618_v11  ;;  %9378 = vmatprep.subr.bf16.mxu0 %v10093_v3  ;;  %v3513_v11 = vld [vmem:[%s12559_s6 + $0x8] sm:$0xff] }
 0x1e8   : > { %9468 = vmatprep.subr.bf16.mxu1 %v10093_v3 }
 0x1ea   : > { %9380 = vmatpush3.bf16.msra.mxu0 %v12619_v2  ;;  %v6027_v2 = vld [vmem:[%s12559_s6 + $0x1b8] sm:$0xff] }
 0x1eb   : > { %9470 = vmatpush3.bf16.msra.mxu1 %v12624_v9  ;;  %9381 = vmatprep.subr.bf16.mxu0 %v10093_v3  ;;  %v11530_v8 = vpack.c.bf16 %v6028_v42, %v6027_v2  ;;  %v6058_v2 = vld [vmem:[%s12559_s6 + $0x290] sm:$0xff] }
 0x1ec   : > { %9471 = vmatprep.subr.bf16.mxu1 %v10093_v3 }
 0x1ee   : > { %9383 = vmatpush3.bf16.msra.mxu0 %v10835_v40 }
 0x1ef   : > { %9473 = vmatpush3.bf16.msra.mxu1 %v12621_v51  ;;  %9384 = vmatprep.subr.bf16.mxu0 %v10093_v3  ;;  %v3512_v51 = vld [vmem:[%s12559_s6] sm:$0xff] }
 0x1f0   : > { %9474 = vmatprep.subr.bf16.mxu1 %v10093_v3  ;;  %v11528_v4 = vpack.c.bf16 %v3513_v11, %v3512_v51  ;;  %v5992_v51 = vld [vmem:[%s12559_s6 + $0xd0] sm:$0xff]  ;;  %v6057_v11 = vld [vmem:[%s12559_s6 + $0x288] sm:$0xff] }
 0x1f2   : > { %9386 = vmatpush3.bf16.msra.mxu0 %v10855_v7 }
 0x1f3   : > { %9476 = vmatpush3.bf16.msra.mxu1 %v10859_v20  ;;  %9387 = vmatprep.subr.bf16.mxu0 %v10093_v3 }
 0x1f4   : > { %9477 = vmatprep.subr.bf16.mxu1 %v10093_v3 }
 0x1f6   : > { %9389 = vmatpush3.bf16.msra.mxu0 %v10875_v22 }
 0x1f7   : > { %9479 = vmatpush3.bf16.msra.mxu1 %v10879_v33  ;;  %9480 = vmatprep.subr.bf16.mxu0 %v10093_v3 }
 0x1f8   : > { %9555 = vmatprep.subr.bf16.mxu1 %v10093_v3 }
 0x1f9   : > { %7950 = vmatmul.mubr.msk.f32.vlgmr.msra.gmra.mrb[6].mxu0 %vm542_vm1, %v3081_v55 }
 0x1fa   : > { %8085 = vmatmul.mubr.msk.f32.vlgmr.msra.gmra.mrb[6].mxu1 %vm542_vm1, %v3081_v55  ;;  %9482 = vmatpush3.bf16.msra.mxu0 %v11400_v56  ;;  %v11576_v55 = vpack.c.bf16 %v3517_v44, %v3516_v43  ;;  %v11727_v43 = vpack.c.bf16 %v6060_v19, %v6059_v18  ;;  %v5996_v44 = vld [vmem:[%s12559_s6 + $0xf0] sm:$0xff]  ;;  %v6007_v19 = vld [vmem:[%s12559_s6 + $0x138] sm:$0xff] }
 0x1fb   : > { %9557 = vmatpush3.bf16.msra.mxu1 %v11404_v61  ;;  %9483 = vmatprep.subr.bf16.mxu0 %v10093_v3  ;;  %v11745_v6 = vpack.c.bf16 %v5997_v49, %v5996_v44  ;;  %v6008_v44 = vld [vmem:[%s12559_s6 + $0x140] sm:$0xff]  ;;  %v6072_v49 = vld [vmem:[%s12559_s6 + $0x2f0] sm:$0xff] }
 0x1fc   : > { %9558 = vmatprep.subr.bf16.mxu1 %v10093_v3  ;;  %8109 = vmatprep.mubr.msk.f32.mxu0 %vm10094_vm0, %v12615_v23  ;;  %v11852_v5 = vpack.c.bf16 %v6008_v44, %v6007_v19  ;;  %v11902_v19 = vld [vmem:[%s12559_s6 + $0x310] sm:$0xf] }
 0x1fd   : > { %8234 = vmatprep.mubr.msk.f32.mxu1 %vm10094_vm0, %v12615_v23 }
 0x1fe   : > { %9485 = vmatpush3.bf16.msra.mxu0 %v11422_v16 }
 0x1ff   : > { %9560 = vmatpush3.bf16.msra.mxu1 %v11426_v26  ;;  %9486 = vmatprep.subr.bf16.mxu0 %v10093_v3 }
 0x200   : > { %9561 = vmatprep.subr.bf16.mxu1 %v10093_v3 }
 0x202   : > { %9488 = vmatpush3.bf16.msra.mxu0 %v11446_v46 }
 0x203   : > { %9563 = vmatpush3.bf16.msra.mxu1 %v11450_v53  ;;  %9489 = vmatprep.subr.bf16.mxu0 %v10093_v3 }
 0x204   : > { %9564 = vmatprep.subr.bf16.mxu1 %v10093_v3 }
 0x206   : > { %9491 = vmatpush3.bf16.msra.mxu0 %v11466_v14 }
 0x207   : > { %9566 = vmatpush3.bf16.msra.mxu1 %v11470_v28  ;;  %9492 = vmatprep.subr.bf16.mxu0 %v10093_v3 }
 0x208   : > { %9567 = vmatprep.subr.bf16.mxu1 %v10093_v3 }
 0x20a   : > { %9494 = vmatpush3.bf16.msra.mxu0 %v11486_v47 }
 0x20b   : > { %9569 = vmatpush3.bf16.msra.mxu1 %v11491_v17  ;;  %8107 = vmatprep.subr.mxu0 %v12615_v23 }
 0x20c   : > { %8232 = vmatprep.subr.mxu1 %v12615_v23 }
 0x20e   : > { %8108 = vmatpush3.msk.msra.mxu0 %vm3539_vm2, %v11500_v38 }
 0x20f   : > { %8233 = vmatpush3.msk.msra.mxu1 %vm3539_vm2, %v11505_v39  ;;  %9495 = vmatprep.subr.bf16.mxu0 %v10093_v3 }
 0x210   : > { %9570 = vmatprep.subr.bf16.mxu1 %v10093_v3 }
 0x254   : > { %v2440_v57 = vpop.f32.mrb[4].mxu0 }
 0x255   : > { %v2793_v60 = vpop.f32.mrb[4].mxu1  ;;  %v7681_v21 = vpop.f32.mrb[5].mxu0 }
 0x256   : > { %v2798_v1 = vmax.f32 %v2440_v57, %v2793_v60  ;;  %v7816_v40 = vpop.f32.mrb[5].mxu1  ;;  %v6053_v57 = vld [vmem:[%s12559_s6 + $0x268] sm:$0xff]  ;;  %v11651_v60 = vmax.f32 %v2087_v32, 0.0  ;;  %v11653_v21 = vpack.c.bf16 %v5989_v59, %v5988_v41  ;;  %v11775_v32 = vld [vmem:[%s12559_s6 + $0x2b8] sm:$0xf]  ;;  %v11780_v59 = vpack.c.bf16 %v6002_v45, %v6001_v27 }
 0x257   : > { %v5990_v40 = vld [vmem:[%s12559_s6 + $0xc0] sm:$0xff]  ;;  %v11854_v27 = vpack.c.bf16 %v6073_v50, %v6072_v49  ;;  %v6009_v45 = vld [vmem:[%s12559_s6 + $0x148] sm:$0xff] }
 0x258   : > { %v11778_v41 = vrot.slane %v11651_v60, 1 }
 0x2cc   : > { %v3150_v48 = vpop.f32.mrb[6].mxu0 }
 0x2cd   : > { %v3155_v7 = vmax.f32 %v2798_v1, %v3150_v48  ;;  %v3504_v20 = vpop.f32.mrb[6].mxu1  ;;  %v7951_v22 = vpop.f32.mrb[7].mxu0  ;;  %v11655_v1 = vpack.c.bf16 %v6054_v25, %v6053_v57  ;;  %v5991_v48 = vld [vmem:[%s12559_s6 + $0xc8] sm:$0xff]  ;;  %v11782_v57 = vpack.c.bf16 %v6067_v63, %v6066_v54  ;;  %v6003_v25 = vld [vmem:[%s12559_s6 + $0x118] sm:$0xff]  ;;  %v6010_v54 = vld [vmem:[%s12559_s6 + $0x150] sm:$0xff] }
 0x2ce   : > { %v8086_v33 = vpop.f32.mrb[7].mxu1  ;;  %v11681_v22 = vpack.c.bf16 %v5991_v48, %v5990_v40  ;;  %v6004_v40 = vld [vmem:[%s12559_s6 + $0x120] sm:$0xff]  ;;  %v6068_v48 = vld [vmem:[%s12559_s6 + $0x2d0] sm:$0xff] }
 0x2cf   : > { %v3509_v52 = vmax.f32 %v3155_v7, %v3504_v20  ;;  %v6055_v7 = vld [vmem:[%s12559_s6 + $0x278] sm:$0xff]  ;;  %v6056_v20 = vld [vmem:[%s12559_s6 + $0x280] sm:$0xff] }
 0x2d0   : > { %v11683_v33 = vpack.c.bf16 %v6056_v20, %v6055_v7  ;;  %v6069_v7 = vld [vmem:[%s12559_s6 + $0x2d8] sm:$0xff]  ;;  %v11808_v20 = vpack.c.bf16 %v6004_v40, %v6003_v25  ;;  %v6074_v63 = vld [vmem:[%s12559_s6 + $0x300] sm:$0xff]  ;;  %v6075_v25 = vld [vmem:[%s12559_s6 + $0x308] sm:$0xff]  ;;  %v11872_v40 = vpack.c.bf16 %v6010_v54, %v6009_v45 }
 0x2d1   : > { %v3510_v9 = vadd.f32 %v5952_v58, %v3509_v52  ;;  %v5993_v52 = vld [vmem:[%s12559_s6 + $0xd8] sm:$0xff]  ;;  %v11707_v58 = vpack.c.bf16 %v6058_v2, %v6057_v11  ;;  %v6006_v11 = vld [vmem:[%s12559_s6 + $0x130] sm:$0xff]  ;;  %v6070_v2 = vld [vmem:[%s12559_s6 + $0x2e0] sm:$0xff] }
 0x2d2   : > { %v11705_v42 = vpack.c.bf16 %v5993_v52, %v5992_v51  ;;  %v11810_v51 = vpack.c.bf16 %v6069_v7, %v6068_v48  ;;  %v6005_v52 = vld [vmem:[%s12559_s6 + $0x128] sm:$0xff]  ;;  %v11874_v48 = vpack.c.bf16 %v6075_v25, %v6074_v63  ;;  %v6014_v7 = vld [vmem:[%s12559_s6 + $0x160] sm:$0xff]  ;;  %v6016_v45 = vld [vmem:[%s12559_s6 + $0x170] sm:$0xff] }
 0x2d3   : > { %v11535_v13 = vmax.f32 %v3510_v9, 0.0  ;;  %v5994_v9 = vld [vmem:[%s12559_s6 + $0xe0] sm:$0xff]  ;;  %v6017_v54 = vld [vmem:[%s12559_s6 + $0x178] sm:$0xff]  ;;  %v6081_v63 = vld [vmem:[%s12559_s6 + $0x328] sm:$0xff] }
 0x2d4   : > { %v11725_v24 = vpack.c.bf16 %v5995_v12, %v5994_v9  ;;  %v6071_v9 = vld [vmem:[%s12559_s6 + $0x2e8] sm:$0xff]  ;;  %v11832_v12 = vpack.c.bf16 %v6006_v11, %v6005_v52  ;;  %v6079_v11 = vld [vmem:[%s12559_s6 + $0x318] sm:$0xff]  ;;  %v6082_v25 = vld [vmem:[%s12559_s6 + $0x330] sm:$0xff] }
 0x2d5   : > { %8110 = vmatmul.mubr.msk.f32.vlgmr.msra.gmra.mrb[8].mxu0 %vm3535_vm3, %v11535_v13  ;;  %8235 = vmatmul.mubr.msk.f32.vlgmr.msra.gmra.mrb[8].mxu1 %vm3535_vm3, %v11535_v13  ;;  %v11834_v18 = vpack.c.bf16 %v6071_v9, %v6070_v2  ;;  %v6015_v52 = vld [vmem:[%s12559_s6 + $0x168] sm:$0xff]  ;;  %v6080_v2 = vld [vmem:[%s12559_s6 + $0x320] sm:$0xff]  ;;  %v11897_v9 = vld [vmem:[%s12559_s6 + $0x158] sm:$0xf]  ;;  %v11905_v44 = vrot.slane %v11535_v13, 1 }
 0x2d6   : > { %9497 = vmatpush3.bf16.msra.mxu0 %v11528_v4  ;;  %9572 = vmatpush3.bf16.msra.mxu1 %v11530_v8  ;;  %v11907_v49 = vpack.c.bf16 %v6015_v52, %v6014_v7  ;;  %v11909_v50 = vpack.c.bf16 %v6080_v2, %v6079_v11  ;;  %v11935_v7 = vpack.c.bf16 %v6017_v54, %v6016_v45  ;;  %v6018_v11 = vld [vmem:[%s12559_s6 + $0x180] sm:$0xff]  ;;  %v6019_v2 = vld [vmem:[%s12559_s6 + $0x188] sm:$0xff] }
 0x2d7   : > { %9498 = vmatprep.subr.bf16.mxu0 %v10093_v3  ;;  %9573 = vmatprep.subr.bf16.mxu1 %v10093_v3  ;;  %v11937_v52 = vpack.c.bf16 %v6082_v25, %v6081_v63  ;;  %v6084_v45 = vld [vmem:[%s12559_s6 + $0x340] sm:$0xff]  ;;  %v11959_v54 = vpack.c.bf16 %v6019_v2, %v6018_v11  ;;  %v6020_v25 = vld [vmem:[%s12559_s6 + $0x190] sm:$0xff] }
 0x2d8   : > { %8134 = vmatprep.mubr.msk.f32.mxu0 %vm10094_vm0, %v12615_v23  ;;  %8259 = vmatprep.mubr.msk.f32.mxu1 %vm10094_vm0, %v12615_v23  ;;  %12631 = vst [vmem:[#allocation17_spill] sm:$0xff] %v11907_v49  ;;  %12632 = vst [vmem:[#allocation18_spill] sm:$0xff] %v11909_v50 }
 0x2d9   : > { %12633 = vst [vmem:[#allocation20_spill] sm:$0xff] %v11935_v7  ;;  %12634 = vst [vmem:[#allocation15_spill] sm:$0xff] %v11937_v52 }
 0x2da   : > { %9500 = vmatpush3.bf16.msra.mxu0 %v11552_v31  ;;  %9575 = vmatpush3.bf16.msra.mxu1 %v11554_v36 }
 0x2db   : > { %9501 = vmatprep.subr.bf16.mxu0 %v10093_v3  ;;  %9576 = vmatprep.subr.bf16.mxu1 %v10093_v3 }
 0x2de   : > { %9503 = vmatpush3.bf16.msra.mxu0 %v11576_v55  ;;  %9578 = vmatpush3.bf16.msra.mxu1 %v11578_v62 }
 0x2df   : > { %9504 = vmatprep.subr.bf16.mxu0 %v10093_v3  ;;  %9579 = vmatprep.subr.bf16.mxu1 %v10093_v3 }
 0x2e2   : > { %9506 = vmatpush3.bf16.msra.mxu0 %v11596_v34  ;;  %9581 = vmatpush3.bf16.msra.mxu1 %v11598_v35 }
 0x2e3   : > { %9507 = vmatprep.subr.bf16.mxu0 %v10093_v3  ;;  %9582 = vmatprep.subr.bf16.mxu1 %v10093_v3 }
 0x2e6   : > { %9509 = vmatpush3.bf16.msra.mxu0 %v11616_v10  ;;  %9584 = vmatpush3.bf16.msra.mxu1 %v11618_v29 }
 0x2e7   : > { %8132 = vmatprep.subr.mxu0 %v12615_v23  ;;  %8257 = vmatprep.subr.mxu1 %v12615_v23 }
 0x2ea   : > { %8133 = vmatpush3.msk.msra.mxu0 %vm3539_vm2, %v11644_v30  ;;  %8258 = vmatpush3.msk.msra.mxu1 %vm3539_vm2, %v11649_v37 }
 0x2eb   : > { %8135 = vmatmul.mubr.msk.f32.vlgmr.msra.gmra.mrb[8].mxu0 %vm3535_vm3, %v11651_v60  ;;  %9510 = vmatprep.subr.bf16.mxu0 %v10093_v3 }
 0x2ec   : > { %8260 = vmatmul.mubr.msk.f32.vlgmr.msra.gmra.mrb[8].mxu1 %vm3535_vm3, %v11651_v60  ;;  %9585 = vmatprep.subr.bf16.mxu1 %v10093_v3 }
 0x2ed   : > { %9512 = vmatpush3.bf16.msra.mxu0 %v11653_v21  ;;  %9587 = vmatpush3.bf16.msra.mxu1 %v11655_v1 }
 0x2ee   : > { %9513 = vmatprep.subr.bf16.mxu0 %v10093_v3  ;;  %9588 = vmatprep.subr.bf16.mxu1 %v10093_v3 }
 0x2ef   : > { %8159 = vmatprep.mubr.msk.f32.mxu0 %vm10094_vm0, %v12615_v23  ;;  %8284 = vmatprep.mubr.msk.f32.mxu1 %vm10094_vm0, %v12615_v23 }
 0x2f1   : > { %9515 = vmatpush3.bf16.msra.mxu0 %v11681_v22  ;;  %9590 = vmatpush3.bf16.msra.mxu1 %v11683_v33 }
 0x2f2   : > { %9516 = vmatprep.subr.bf16.mxu0 %v10093_v3  ;;  %9591 = vmatprep.subr.bf16.mxu1 %v10093_v3 }
 0x2f5   : > { %9518 = vmatpush3.bf16.msra.mxu0 %v11705_v42  ;;  %9593 = vmatpush3.bf16.msra.mxu1 %v11707_v58 }
 0x2f6   : > { %9519 = vmatprep.subr.bf16.mxu0 %v10093_v3  ;;  %9594 = vmatprep.subr.bf16.mxu1 %v10093_v3 }
 0x2f9   : > { %9521 = vmatpush3.bf16.msra.mxu0 %v11725_v24  ;;  %9596 = vmatpush3.bf16.msra.mxu1 %v11727_v43 }
 0x2fa   : > { %9522 = vmatprep.subr.bf16.mxu0 %v10093_v3  ;;  %9597 = vmatprep.subr.bf16.mxu1 %v10093_v3 }
 0x2fd   : > { %9524 = vmatpush3.bf16.msra.mxu0 %v11745_v6  ;;  %9599 = vmatpush3.bf16.msra.mxu1 %v11747_v15 }
 0x2fe   : > { %8157 = vmatprep.subr.mxu0 %v12615_v23  ;;  %8282 = vmatprep.subr.mxu1 %v12615_v23 }
 0x301   : > { %8158 = vmatpush3.msk.msra.mxu0 %vm3539_vm2, %v11770_v0  ;;  %8283 = vmatpush3.msk.msra.mxu1 %vm3539_vm2, %v11775_v32 }
 0x302   : > { %8160 = vmatmul.mubr.msk.f32.vlgmr.msra.gmra.mrb[8].mxu0 %vm3535_vm3, %v11778_v41  ;;  %9525 = vmatprep.subr.bf16.mxu0 %v10093_v3 }
 0x303   : > { %8285 = vmatmul.mubr.msk.f32.vlgmr.msra.gmra.mrb[8].mxu1 %vm3535_vm3, %v11778_v41  ;;  %9600 = vmatprep.subr.bf16.mxu1 %v10093_v3 }
 0x304   : > { %9527 = vmatpush3.bf16.msra.mxu0 %v11780_v59  ;;  %9602 = vmatpush3.bf16.msra.mxu1 %v11782_v57 }
 0x305   : > { %9528 = vmatprep.subr.bf16.mxu0 %v10093_v3  ;;  %9603 = vmatprep.subr.bf16.mxu1 %v10093_v3 }
 0x306   : > { %8184 = vmatprep.mubr.msk.f32.mxu0 %vm10094_vm0, %v12615_v23  ;;  %8309 = vmatprep.mubr.msk.f32.mxu1 %vm10094_vm0, %v12615_v23 }
 0x308   : > { %9530 = vmatpush3.bf16.msra.mxu0 %v11808_v20  ;;  %9605 = vmatpush3.bf16.msra.mxu1 %v11810_v51 }
 0x309   : > { %9531 = vmatprep.subr.bf16.mxu0 %v10093_v3  ;;  %9606 = vmatprep.subr.bf16.mxu1 %v10093_v3 }
 0x30c   : > { %9533 = vmatpush3.bf16.msra.mxu0 %v11832_v12  ;;  %9608 = vmatpush3.bf16.msra.mxu1 %v11834_v18 }
 0x30d   : > { %9534 = vmatprep.subr.bf16.mxu0 %v10093_v3  ;;  %9609 = vmatprep.subr.bf16.mxu1 %v10093_v3 }
 0x310   : > { %9536 = vmatpush3.bf16.msra.mxu0 %v11852_v5  ;;  %9611 = vmatpush3.bf16.msra.mxu1 %v11854_v27 }
 0x311   : > { %9537 = vmatprep.subr.bf16.mxu0 %v10093_v3  ;;  %9612 = vmatprep.subr.bf16.mxu1 %v10093_v3 }
 0x314   : > { %9539 = vmatpush3.bf16.msra.mxu0 %v11872_v40  ;;  %9614 = vmatpush3.bf16.msra.mxu1 %v11874_v48 }
 0x315   : > { %8182 = vmatprep.subr.mxu0 %v12615_v23  ;;  %8307 = vmatprep.subr.mxu1 %v12615_v23 }
 0x318   : > { %8183 = vmatpush3.msk.msra.mxu0 %vm3539_vm2, %v11897_v9  ;;  %8308 = vmatpush3.msk.msra.mxu1 %vm3539_vm2, %v11902_v19 }
 0x319   : > { %8185 = vmatmul.mubr.msk.f32.vlgmr.msra.gmra.mrb[8].mxu0 %vm3535_vm3, %v11905_v44  ;;  %9540 = vmatprep.subr.bf16.mxu0 %v10093_v3 }
 0x31a   : > { %8310 = vmatmul.mubr.msk.f32.vlgmr.msra.gmra.mrb[8].mxu1 %vm3535_vm3, %v11905_v44  ;;  %9615 = vmatprep.subr.bf16.mxu1 %v10093_v3 }
 0x31b   : > { %9542 = vmatpush3.bf16.msra.mxu0 %v11907_v49  ;;  %9617 = vmatpush3.bf16.msra.mxu1 %v11909_v50  ;;  %v6083_v50 = vld [vmem:[%s12559_s6 + $0x338] sm:$0xff] }
 0x31c   : > { %9543 = vmatprep.subr.bf16.mxu0 %v10093_v3  ;;  %9618 = vmatprep.subr.bf16.mxu1 %v10093_v3  ;;  %v11961_v63 = vpack.c.bf16 %v6084_v45, %v6083_v50  ;;  %v6021_v49 = vld [vmem:[%s12559_s6 + $0x198] sm:$0xff]  ;;  %v6086_v50 = vld [vmem:[%s12559_s6 + $0x350] sm:$0xff]  ;;  %v6022_v45 = vld [vmem:[%s12559_s6 + $0x1a0] sm:$0xff] }
 0x31d   : > { %8209 = vmatprep.mubr.msk.f32.mxu0 %vm10094_vm0, %v12615_v23  ;;  %8334 = vmatprep.mubr.msk.f32.mxu1 %vm10094_vm0, %v12615_v23  ;;  %v11979_v11 = vpack.c.bf16 %v6021_v49, %v6020_v25  ;;  %v6088_v49 = vld [vmem:[%s12559_s6 + $0x360] sm:$0xff] }
 0x31e   : > { %12635 = vst [vmem:[#allocation16_spill] sm:$0xff] %v11961_v63 }
 0x31f   : > { %9545 = vmatpush3.bf16.msra.mxu0 %v11935_v7  ;;  %9620 = vmatpush3.bf16.msra.mxu1 %v11937_v52  ;;  %v6085_v52 = vld [vmem:[%s12559_s6 + $0x348] sm:$0xff] }
 0x320   : > { %9546 = vmatprep.subr.bf16.mxu0 %v10093_v3  ;;  %9621 = vmatprep.subr.bf16.mxu1 %v10093_v3  ;;  %v11981_v2 = vpack.c.bf16 %v6086_v50, %v6085_v52  ;;  %v6023_v7 = vld [vmem:[%s12559_s6 + $0x1a8] sm:$0xff]  ;;  %v12012_v50 = vld [vmem:[%s12559_s6 + $0x1b0] sm:$0xf] }
 0x321   : > { %v11999_v52 = vpack.c.bf16 %v6023_v7, %v6022_v45  ;;  %v12017_v7 = vld [vmem:[%s12559_s6 + $0x368] sm:$0xf]  ;;  %v6138_v45 = vld [vmem:[%s12561_s8 + $0x100] sm:$0xff] }
 0x323   : > { %9548 = vmatpush3.bf16.msra.mxu0 %v11959_v54  ;;  %9623 = vmatpush3.bf16.msra.mxu1 %v11961_v63  ;;  %v6087_v63 = vld [vmem:[%s12559_s6 + $0x358] sm:$0xff] }
 0x324   : > { %9549 = vmatprep.subr.bf16.mxu0 %v10093_v3  ;;  %9624 = vmatprep.subr.bf16.mxu1 %v10093_v3  ;;  %v12001_v25 = vpack.c.bf16 %v6088_v49, %v6087_v63  ;;  %v12020_v63 = vrot.slane %v11651_v60, 2  ;;  %v5112_v60 = vld [vmem:[%s12561_s8 + $0x38] sm:$0xff]  ;;  %v6139_v49 = vld [vmem:[%s12561_s8 + $0x108] sm:$0xff] }
 0x327   : > { %9551 = vmatpush3.bf16.msra.mxu0 %v11979_v11  ;;  %9626 = vmatpush3.bf16.msra.mxu1 %v11981_v2 }
 0x328   : > { %9552 = vmatprep.subr.bf16.mxu0 %v10093_v3  ;;  %9627 = vmatprep.subr.bf16.mxu1 %v10093_v3 }
 0x32b   : > { %9554 = vmatpush3.bf16.msra.mxu0 %v11999_v52  ;;  %9629 = vmatpush3.bf16.msra.mxu1 %v12001_v25 }
 0x32c   : > { %8207 = vmatprep.subr.mxu0 %v12615_v23  ;;  %8332 = vmatprep.subr.mxu1 %v12615_v23 }
 0x32f   : > { %8208 = vmatpush3.msk.msra.mxu0 %vm3539_vm2, %v12012_v50  ;;  %8333 = vmatpush3.msk.msra.mxu1 %vm3539_vm2, %v12017_v7 }
 0x330   : > { %8210 = vmatmul.mubr.msk.f32.vlgmr.msra.gmra.mrb[8].mxu0 %vm3535_vm3, %v12020_v63  ;;  %8335 = vmatmul.mubr.msk.f32.vlgmr.msra.gmra.mrb[8].mxu1 %vm3535_vm3, %v12020_v63 }
 0x331   : > { %9630 = vmatprep.subr.bf16.mxu0 %v10093_v3  ;;  %9705 = vmatprep.subr.bf16.mxu1 %v10093_v3 }
 0x332   : > { %9632 = vmatpush3.bf16.msra.mxu0 %v11400_v56  ;;  %9707 = vmatpush3.bf16.msra.mxu1 %v11404_v61  ;;  %v12636_v56 = vld [vmem:[#allocation17_spill] sm:$0xff]  ;;  %v12637_v61 = vld [vmem:[#allocation18_spill] sm:$0xff] }
 0x333   : > { %9633 = vmatprep.subr.bf16.mxu0 %v10093_v3  ;;  %9708 = vmatprep.subr.bf16.mxu1 %v10093_v3 }
 0x334   : > { %8359 = vmatprep.mubr.msk.f32.mxu0 %vm10094_vm0, %v12615_v23  ;;  %8484 = vmatprep.mubr.msk.f32.mxu1 %vm10094_vm0, %v12615_v23 }
 0x336   : > { %9635 = vmatpush3.bf16.msra.mxu0 %v11422_v16  ;;  %9710 = vmatpush3.bf16.msra.mxu1 %v11426_v26  ;;  %v12638_v16 = vld [vmem:[#allocation20_spill] sm:$0xff]  ;;  %v12639_v26 = vld [vmem:[#allocation15_spill] sm:$0xff] }
 0x337   : > { %9636 = vmatprep.subr.bf16.mxu0 %v10093_v3  ;;  %9711 = vmatprep.subr.bf16.mxu1 %v10093_v3 }
 0x33a   : > { %9638 = vmatpush3.bf16.msra.mxu0 %v11446_v46  ;;  %9713 = vmatpush3.bf16.msra.mxu1 %v11450_v53  ;;  %v12640_v46 = vld [vmem:[#allocation16_spill] sm:$0xff]  ;;  %v5105_v53 = vld [vmem:[%s12561_s8] sm:$0xff] }
 0x33b   : > { %9639 = vmatprep.subr.bf16.mxu0 %v10093_v3  ;;  %9714 = vmatprep.subr.bf16.mxu1 %v10093_v3 }
 0x33e   : > { %9641 = vmatpush3.bf16.msra.mxu0 %v11466_v14  ;;  %9716 = vmatpush3.bf16.msra.mxu1 %v11470_v28  ;;  %v5106_v14 = vld [vmem:[%s12561_s8 + $0x8] sm:$0xff]  ;;  %v6113_v28 = vld [vmem:[%s12561_s8 + $0x50] sm:$0xff] }
 0x33f   : > { %9642 = vmatprep.subr.bf16.mxu0 %v10093_v3  ;;  %9717 = vmatprep.subr.bf16.mxu1 %v10093_v3 }
 0x342   : > { %9644 = vmatpush3.bf16.msra.mxu0 %v11486_v47  ;;  %9719 = vmatpush3.bf16.msra.mxu1 %v11491_v17  ;;  %v6114_v47 = vld [vmem:[%s12561_s8 + $0x58] sm:$0xff]  ;;  %v4667_v17 = vrot.slane %v11535_v13, 2 }
 0x343   : > { %8357 = vmatprep.subr.mxu0 %v12615_v23  ;;  %8482 = vmatprep.subr.mxu1 %v12615_v23 }
 0x346   : > { %8358 = vmatpush3.msk.msra.mxu0 %vm3539_vm2, %v11500_v38  ;;  %8483 = vmatpush3.msk.msra.mxu1 %vm3539_vm2, %v11505_v39  ;;  %v9796_v38 = vpack.c.bf16 %v5106_v14, %v5105_v53  ;;  %v9781_v39 = vpack.c.bf16 %v6114_v47, %v6113_v28  ;;  %v6142_v14 = vld [vmem:[%s12561_s8 + $0x120] sm:$0xff]  ;;  %v6143_v28 = vld [vmem:[%s12561_s8 + $0x128] sm:$0xff] }
 0x347   : > { %8360 = vmatmul.mubr.msk.f32.vlgmr.msra.gmra.mrb[10].mxu0 %vm3535_vm3, %v11778_v41  ;;  %9645 = vmatprep.subr.bf16.mxu0 %v10093_v3 }
 0x348   : > { %8485 = vmatmul.mubr.msk.f32.vlgmr.msra.gmra.mrb[10].mxu1 %vm3535_vm3, %v11778_v41  ;;  %9720 = vmatprep.subr.bf16.mxu1 %v10093_v3 }
 0x349   : > { %9647 = vmatpush3.bf16.msra.mxu0 %v11528_v4  ;;  %9722 = vmatpush3.bf16.msra.mxu1 %v11530_v8  ;;  %v5107_v4 = vld [vmem:[%s12561_s8 + $0x10] sm:$0xff]  ;;  %v5108_v8 = vld [vmem:[%s12561_s8 + $0x18] sm:$0xff] }
 0x34a   : > { %9648 = vmatprep.subr.bf16.mxu0 %v10093_v3  ;;  %9723 = vmatprep.subr.bf16.mxu1 %v10093_v3 }
 0x34b   : > { %8384 = vmatprep.mubr.msk.f32.mxu0 %vm10094_vm0, %v12615_v23  ;;  %8509 = vmatprep.mubr.msk.f32.mxu1 %vm10094_vm0, %v12615_v23 }
 0x34d   : > { %9650 = vmatpush3.bf16.msra.mxu0 %v11552_v31  ;;  %9725 = vmatpush3.bf16.msra.mxu1 %v11554_v36  ;;  %v6116_v31 = vld [vmem:[%s12561_s8 + $0x68] sm:$0xff]  ;;  %v9799_v36 = vpack.c.bf16 %v5108_v8, %v5107_v4  ;;  %v6144_v4 = vld [vmem:[%s12561_s8 + $0x130] sm:$0xff]  ;;  %v6145_v8 = vld [vmem:[%s12561_s8 + $0x138] sm:$0xff] }
 0x34e   : > { %9651 = vmatprep.subr.bf16.mxu0 %v10093_v3  ;;  %9726 = vmatprep.subr.bf16.mxu1 %v10093_v3 }
 0x351   : > { %9653 = vmatpush3.bf16.msra.mxu0 %v11576_v55  ;;  %9728 = vmatpush3.bf16.msra.mxu1 %v11578_v62  ;;  %v5109_v62 = vld [vmem:[%s12561_s8 + $0x20] sm:$0xff] }
 0x352   : > { %9654 = vmatprep.subr.bf16.mxu0 %v10093_v3  ;;  %9729 = vmatprep.subr.bf16.mxu1 %v10093_v3 }
 0x355   : > { %9656 = vmatpush3.bf16.msra.mxu0 %v11596_v34  ;;  %9731 = vmatpush3.bf16.msra.mxu1 %v11598_v35  ;;  %v5110_v34 = vld [vmem:[%s12561_s8 + $0x28] sm:$0xff]  ;;  %v6117_v35 = vld [vmem:[%s12561_s8 + $0x70] sm:$0xff] }
 0x356   : > { %9657 = vmatprep.subr.bf16.mxu0 %v10093_v3  ;;  %9732 = vmatprep.subr.bf16.mxu1 %v10093_v3 }
 0x359   : > { %9659 = vmatpush3.bf16.msra.mxu0 %v11616_v10  ;;  %9734 = vmatpush3.bf16.msra.mxu1 %v11618_v29  ;;  %v6118_v10 = vld [vmem:[%s12561_s8 + $0x78] sm:$0xff]  ;;  %v9802_v29 = vpack.c.bf16 %v5110_v34, %v5109_v62  ;;  %v6147_v34 = vld [vmem:[%s12561_s8 + $0x140] sm:$0xff] }
 0x35a   : > { %8382 = vmatprep.subr.mxu0 %v12615_v23  ;;  %8507 = vmatprep.subr.mxu1 %v12615_v23 }
 0x35d   : > { %8383 = vmatpush3.msk.msra.mxu0 %vm3539_vm2, %v11644_v30  ;;  %8508 = vmatpush3.msk.msra.mxu1 %vm3539_vm2, %v11649_v37  ;;  %v9787_v30 = vpack.c.bf16 %v6118_v10, %v6117_v35  ;;  %v5111_v37 = vld [vmem:[%s12561_s8 + $0x30] sm:$0xff]  ;;  %v6148_v35 = vld [vmem:[%s12561_s8 + $0x148] sm:$0xff] }
 0x35e   : > { %8385 = vmatmul.mubr.msk.f32.vlgmr.msra.gmra.mrb[10].mxu0 %vm3535_vm3, %v11535_v13  ;;  %9660 = vmatprep.subr.bf16.mxu0 %v10093_v3 }
 0x35f   : > { %8510 = vmatmul.mubr.msk.f32.vlgmr.msra.gmra.mrb[10].mxu1 %vm3535_vm3, %v11535_v13  ;;  %9735 = vmatprep.subr.bf16.mxu1 %v10093_v3  ;;  %v6115_v13 = vld [vmem:[%s12561_s8 + $0x60] sm:$0xff] }
 0x360   : > { %9662 = vmatpush3.bf16.msra.mxu0 %v11653_v21  ;;  %9737 = vmatpush3.bf16.msra.mxu1 %v11655_v1  ;;  %v9784_v55 = vpack.c.bf16 %v6116_v31, %v6115_v13  ;;  %v9805_v21 = vpack.c.bf16 %v5112_v60, %v5111_v37  ;;  %v6119_v1 = vld [vmem:[%s12561_s8 + $0x80] sm:$0xff]  ;;  %v6149_v37 = vld [vmem:[%s12561_s8 + $0x150] sm:$0xff]  ;;  %v6150_v60 = vld [vmem:[%s12561_s8 + $0x158] sm:$0xff] }
 0x361   : > { %9663 = vmatprep.subr.bf16.mxu0 %v10093_v3  ;;  %9738 = vmatprep.subr.bf16.mxu1 %v10093_v3  ;;  %v6133_v31 = vld [vmem:[%s12561_s8 + $0xe0] sm:$0xff] }
 0x362   : > { %8409 = vmatprep.mubr.msk.f32.mxu0 %vm10094_vm0, %v12615_v23  ;;  %8534 = vmatprep.mubr.msk.f32.mxu1 %vm10094_vm0, %v12615_v23 }
 0x364   : > { %9665 = vmatpush3.bf16.msra.mxu0 %v11681_v22  ;;  %9740 = vmatpush3.bf16.msra.mxu1 %v11683_v33  ;;  %v6120_v22 = vld [vmem:[%s12561_s8 + $0x88] sm:$0xff] }
 0x365   : > { %9666 = vmatprep.subr.bf16.mxu0 %v10093_v3  ;;  %9741 = vmatprep.subr.bf16.mxu1 %v10093_v3  ;;  %v9790_v33 = vpack.c.bf16 %v6120_v22, %v6119_v1  ;;  %v6151_v1 = vld [vmem:[%s12561_s8 + $0x160] sm:$0xff]  ;;  %v6152_v22 = vld [vmem:[%s12561_s8 + $0x168] sm:$0xff] }
 0x368   : > { %9668 = vmatpush3.bf16.msra.mxu0 %v11705_v42  ;;  %9743 = vmatpush3.bf16.msra.mxu1 %v11707_v58  ;;  %v5113_v42 = vld [vmem:[%s12561_s8 + $0x40] sm:$0xff]  ;;  %v5114_v58 = vld [vmem:[%s12561_s8 + $0x48] sm:$0xff] }
 0x369   : > { %9669 = vmatprep.subr.bf16.mxu0 %v10093_v3  ;;  %9744 = vmatprep.subr.bf16.mxu1 %v10093_v3 }
 0x36c   : > { %9671 = vmatpush3.bf16.msra.mxu0 %v11725_v24  ;;  %9746 = vmatpush3.bf16.msra.mxu1 %v11727_v43  ;;  %v9808_v24 = vpack.c.bf16 %v5114_v58, %v5113_v42  ;;  %v6121_v43 = vld [vmem:[%s12561_s8 + $0x90] sm:$0xff]  ;;  %v6154_v58 = vld [vmem:[%s12561_s8 + $0x178] sm:$0xff] }
 0x36d   : > { %9672 = vmatprep.subr.bf16.mxu0 %v10093_v3  ;;  %9747 = vmatprep.subr.bf16.mxu1 %v10093_v3  ;;  %v6153_v42 = vld [vmem:[%s12561_s8 + $0x170] sm:$0xff] }
 0x370   : > { %9674 = vmatpush3.bf16.msra.mxu0 %v11745_v6  ;;  %9749 = vmatpush3.bf16.msra.mxu1 %v11747_v15  ;;  %v6122_v6 = vld [vmem:[%s12561_s8 + $0x98] sm:$0xff] }
 0x371   : > { %8407 = vmatprep.subr.mxu0 %v12615_v23  ;;  %8532 = vmatprep.subr.mxu1 %v12615_v23  ;;  %v9793_v15 = vpack.c.bf16 %v6122_v6, %v6121_v43  ;;  %v6155_v43 = vld [vmem:[%s12561_s8 + $0x180] sm:$0xff]  ;;  %v6156_v6 = vld [vmem:[%s12561_s8 + $0x188] sm:$0xff] }
 0x374   : > { %8408 = vmatpush3.msk.msra.mxu0 %vm3539_vm2, %v11770_v0  ;;  %8533 = vmatpush3.msk.msra.mxu1 %vm3539_vm2, %v11775_v32 }
 0x375   : > { %8410 = vmatmul.mubr.msk.f32.vlgmr.msra.gmra.mrb[10].mxu0 %vm3535_vm3, %v11905_v44  ;;  %9675 = vmatprep.subr.bf16.mxu0 %v10093_v3 }
 0x376   : > { %8535 = vmatmul.mubr.msk.f32.vlgmr.msra.gmra.mrb[10].mxu1 %vm3535_vm3, %v11905_v44  ;;  %9750 = vmatprep.subr.bf16.mxu1 %v10093_v3  ;;  %v6125_v44 = vld [vmem:[%s12561_s8 + $0xa0] sm:$0xff] }
 0x377   : > { %9677 = vmatpush3.bf16.msra.mxu0 %v11780_v59  ;;  %9752 = vmatpush3.bf16.msra.mxu1 %v11782_v57 }
 0x378   : > { %9678 = vmatprep.subr.bf16.mxu0 %v10093_v3  ;;  %9753 = vmatprep.subr.bf16.mxu1 %v10093_v3 }
 0x379   : > { %8434 = vmatprep.mubr.msk.f32.mxu0 %vm10094_vm0, %v12615_v23  ;;  %8559 = vmatprep.mubr.msk.f32.mxu1 %vm10094_vm0, %v12615_v23 }
 0x37b   : > { %9680 = vmatpush3.bf16.msra.mxu0 %v11808_v20  ;;  %9755 = vmatpush3.bf16.msra.mxu1 %v11810_v51 }
 0x37c   : > { %9681 = vmatprep.subr.bf16.mxu0 %v10093_v3  ;;  %9756 = vmatprep.subr.bf16.mxu1 %v10093_v3 }
 0x37f   : > { %9683 = vmatpush3.bf16.msra.mxu0 %v11832_v12  ;;  %9758 = vmatpush3.bf16.msra.mxu1 %v11834_v18 }
 0x380   : > { %9684 = vmatprep.subr.bf16.mxu0 %v10093_v3  ;;  %9759 = vmatprep.subr.bf16.mxu1 %v10093_v3 }
 0x383   : > { %9686 = vmatpush3.bf16.msra.mxu0 %v11852_v5  ;;  %9761 = vmatpush3.bf16.msra.mxu1 %v11854_v27  ;;  %v6112_v27 = vld [vmem:[%s12560_s7] ss:$0 sm:$0xff] }
 0x384   : > { %9687 = vmatprep.subr.bf16.mxu0 %v10093_v3  ;;  %9762 = vmatprep.subr.bf16.mxu1 %v10093_v3 }
 0x387   : > { %9689 = vmatpush3.bf16.msra.mxu0 %v11872_v40  ;;  %9764 = vmatpush3.bf16.msra.mxu1 %v11874_v48  ;;  %v6136_v48 = vld [vmem:[%s12561_s8 + $0xf0] sm:$0xff] }
 0x388   : > { %8432 = vmatprep.subr.mxu0 %v12615_v23  ;;  %8557 = vmatprep.subr.mxu1 %v12615_v23 }
 0x38b   : > { %8433 = vmatpush3.msk.msra.mxu0 %vm3539_vm2, %v11897_v9  ;;  %8558 = vmatpush3.msk.msra.mxu1 %vm3539_vm2, %v11902_v19  ;;  %v6137_v9 = vld [vmem:[%s12561_s8 + $0xf8] sm:$0xff] }
 0x38c   : > { %8435 = vmatmul.mubr.msk.f32.vlgmr.msra.gmra.mrb[10].mxu0 %vm3535_vm3, %v12020_v63  ;;  %9690 = vmatprep.subr.bf16.mxu0 %v10093_v3 }
 0x38d   : > { %8560 = vmatmul.mubr.msk.f32.vlgmr.msra.gmra.mrb[10].mxu1 %vm3535_vm3, %v12020_v63  ;;  %9765 = vmatprep.subr.bf16.mxu1 %v10093_v3  ;;  %v9829_v63 = vpack.c.bf16 %v6139_v49, %v6138_v45  ;;  %v5543_v45 = vld [vmem:[%s12563_s10 + $0x60] sm:$0xff]  ;;  %v5544_v49 = vld [vmem:[%s12563_s10 + $0x68] sm:$0xff] }
 0x38e   : > { %9692 = vmatpush3.bf16.msra.mxu0 %v12636_v56  ;;  %9767 = vmatpush3.bf16.msra.mxu1 %v12637_v61  ;;  %v6140_v56 = vld [vmem:[%s12561_s8 + $0x110] sm:$0xff]  ;;  %v6141_v61 = vld [vmem:[%s12561_s8 + $0x118] sm:$0xff] }
 0x38f   : > { %9693 = vmatprep.subr.bf16.mxu0 %v10093_v3  ;;  %9768 = vmatprep.subr.bf16.mxu1 %v10093_v3  ;;  %v9832_v53 = vpack.c.bf16 %v6141_v61, %v6140_v56  ;;  %v5625_v61 = vld [vmem:[%s12565_s12 + $0x18] sm:$0xff] }
 0x390   : > { %8459 = vmatprep.mubr.msk.f32.mxu0 %vm10094_vm0, %v12615_v23  ;;  %8584 = vmatprep.mubr.msk.f32.mxu1 %vm10094_vm0, %v12615_v23 }
 0x392   : > { %9695 = vmatpush3.bf16.msra.mxu0 %v12638_v16  ;;  %9770 = vmatpush3.bf16.msra.mxu1 %v12639_v26  ;;  %v6129_v26 = vld [vmem:[%s12561_s8 + $0xc0] sm:$0xff] }
 0x393   : > { %9696 = vmatprep.subr.bf16.mxu0 %v10093_v3  ;;  %9771 = vmatprep.subr.bf16.mxu1 %v10093_v3 }
 0x396   : > { %9698 = vmatpush3.bf16.msra.mxu0 %v11959_v54  ;;  %9773 = vmatpush3.bf16.msra.mxu1 %v12640_v46  ;;  %v6126_v54 = vld [vmem:[%s12561_s8 + $0xa8] sm:$0xff] }
 0x397   : > { %9699 = vmatprep.subr.bf16.mxu0 %v10093_v3  ;;  %9774 = vmatprep.subr.bf16.mxu1 %v10093_v3  ;;  %v6130_v46 = vld [vmem:[%s12561_s8 + $0xc8] sm:$0xff] }
 0x398   : > { %v9817_v47 = vpack.c.bf16 %v6130_v46, %v6129_v26  ;;  %v5626_v26 = vld [vmem:[%s12565_s12 + $0x20] sm:$0xff]  ;;  %v5627_v46 = vld [vmem:[%s12565_s12 + $0x28] sm:$0xff] }
 0x39a   : > { %9701 = vmatpush3.bf16.msra.mxu0 %v11979_v11  ;;  %9776 = vmatpush3.bf16.msra.mxu1 %v11981_v2  ;;  %v9826_v11 = vpack.c.bf16 %v6137_v9, %v6136_v48  ;;  %v5539_v9 = vld [vmem:[%s12563_s10 + $0x40] sm:$0xff] }
 0x39b   : > { %9702 = vmatprep.subr.bf16.mxu0 %v10093_v3  ;;  %9777 = vmatprep.subr.bf16.mxu1 %v10093_v3 }
 0x39e   : > { %9704 = vmatpush3.bf16.msra.mxu0 %v11999_v52  ;;  %9779 = vmatpush3.bf16.msra.mxu1 %v12001_v25  ;;  %v9811_v52 = vpack.c.bf16 %v6126_v54, %v6125_v44  ;;  %v5541_v54 = vld [vmem:[%s12563_s10 + $0x50] sm:$0xff] }
 0x39f   : > { %8457 = vmatprep.subr.mxu0 %v12615_v23  ;;  %8582 = vmatprep.subr.mxu1 %v12615_v23 }
 0x3a2   : > { %8458 = vmatpush3.msk.msra.mxu0 %vm3539_vm2, %v12012_v50  ;;  %8583 = vmatpush3.msk.msra.mxu1 %vm3539_vm2, %v12017_v7  ;;  %v6127_v50 = vld [vmem:[%s12561_s8 + $0xb0] sm:$0xff]  ;;  %v6128_v7 = vld [vmem:[%s12561_s8 + $0xb8] sm:$0xff] }
 0x3a3   : > { %8460 = vmatmul.mubr.msk.f32.vlgmr.msra.gmra.mrb[10].mxu0 %vm3535_vm3, %v4667_v17  ;;  %8585 = vmatmul.mubr.msk.f32.vlgmr.msra.gmra.mrb[10].mxu1 %vm3535_vm3, %v4667_v17  ;;  %v9814_v16 = vpack.c.bf16 %v6128_v7, %v6127_v50  ;;  %v6131_v17 = vld [vmem:[%s12561_s8 + $0xd0] sm:$0xff]  ;;  %v5622_v50 = vld [vmem:[%s12565_s12] sm:$0xff]  ;;  %v5623_v7 = vld [vmem:[%s12565_s12 + $0x8] sm:$0xff] }
 0x3a4   : > { %9795 = vmatprep.subr.bf16.mxu1 %v10093_v3  ;;  %9780 = vmatprep.subr.bf16.mxu0 %v10093_v3  ;;  %v9877_v56 = vpack.c.bf16 %v5623_v7, %v5622_v50 }
 0x3a5   : > { %9797 = vmatpush3.bf16.msra.mxu1 %v9796_v38  ;;  %9782 = vmatpush3.bf16.msra.mxu0 %v9781_v39  ;;  %v6132_v38 = vld [vmem:[%s12561_s8 + $0xd8] sm:$0xff]  ;;  %v9835_v39 = vpack.c.bf16 %v6143_v28, %v6142_v14  ;;  %v5628_v14 = vld [vmem:[%s12565_s12 + $0x30] sm:$0xff] }
 0x3a6   : > { %9798 = vmatprep.subr.bf16.mxu1 %v10093_v3  ;;  %9783 = vmatprep.subr.bf16.mxu0 %v10093_v3  ;;  %v9820_v13 = vpack.c.bf16 %v6132_v38, %v6131_v17  ;;  %v5629_v28 = vld [vmem:[%s12565_s12 + $0x38] sm:$0xff] }
 0x3a7   : > { %8630 = vmatprep.mubr.msk.f32.mxu1 %vm10094_vm0, %v12615_v23  ;;  %8607 = vmatprep.mubr.msk.f32.mxu0 %vm10094_vm0, %v12615_v23 }
 0x3a9   : > { %9800 = vmatpush3.bf16.msra.mxu1 %v9799_v36  ;;  %9785 = vmatpush3.bf16.msra.mxu0 %v9784_v55  ;;  %v6134_v36 = vld [vmem:[%s12561_s8 + $0xe8] sm:$0xff]  ;;  %v9838_v55 = vpack.c.bf16 %v6145_v8, %v6144_v4 }
 0x3aa   : > { %9801 = vmatprep.subr.bf16.mxu1 %v10093_v3  ;;  %9786 = vmatprep.subr.bf16.mxu0 %v10093_v3  ;;  %v9823_v62 = vpack.c.bf16 %v6134_v36, %v6133_v31 }
 0x3ad   : > { %9803 = vmatpush3.bf16.msra.mxu1 %v9802_v29  ;;  %9788 = vmatpush3.bf16.msra.mxu0 %v9787_v30  ;;  %v9841_v29 = vpack.c.bf16 %v6148_v35, %v6147_v34 }
 0x3ae   : > { %9804 = vmatprep.subr.bf16.mxu1 %v10093_v3  ;;  %9789 = vmatprep.subr.bf16.mxu0 %v10093_v3 }
 0x3b1   : > { %9806 = vmatpush3.bf16.msra.mxu1 %v9805_v21  ;;  %9791 = vmatpush3.bf16.msra.mxu0 %v9790_v33  ;;  %v9844_v21 = vpack.c.bf16 %v6150_v60, %v6149_v37  ;;  %v9847_v33 = vpack.c.bf16 %v6152_v22, %v6151_v1  ;;  %v5630_v60 = vld [vmem:[%s12565_s12 + $0x40] sm:$0xff]  ;;  %v5632_v22 = vld [vmem:[%s12565_s12 + $0x50] sm:$0xf] }
 0x3b2   : > { %9807 = vmatprep.subr.bf16.mxu1 %v10093_v3  ;;  %9792 = vmatprep.subr.bf16.mxu0 %v10093_v3 }
 0x3b5   : > { %9809 = vmatpush3.bf16.msra.mxu1 %v9808_v24  ;;  %9794 = vmatpush3.bf16.msra.mxu0 %v9793_v15  ;;  %v9850_v24 = vpack.c.bf16 %v6154_v58, %v6153_v42  ;;  %v9853_v15 = vpack.c.bf16 %v6156_v6, %v6155_v43 }
 0x3b6   : > { %9825 = vmatprep.subr.bf16.mxu1 %v10093_v3  ;;  %9810 = vmatprep.subr.bf16.mxu0 %v10093_v3 }
 0x403   : > { %v3951_v0 = vpop.f32.mrb[8].mxu0  ;;  %v4379_v32 = vpop.f32.mrb[8].mxu1 }
 0x404   : > { %v4384_v41 = vmax.f32 %v3951_v0, %v4379_v32  ;;  %v8211_v59 = vpop.f32.mrb[9].mxu0  ;;  %v8336_v57 = vpop.f32.mrb[9].mxu1  ;;  %v5531_v32 = vld [vmem:[%s12563_s10] sm:$0xff] }
 0x405   : > { %v5533_v57 = vld [vmem:[%s12563_s10 + $0x10] sm:$0xff] }
 0x476   : > { %v4736_v20 = vpop.f32.mrb[10].mxu0  ;;  %v5090_v51 = vpop.f32.mrb[10].mxu1 }
 0x477   : > { %v4741_v12 = vmax.f32 %v4384_v41, %v4736_v20  ;;  %v8461_v18 = vpop.f32.mrb[11].mxu0  ;;  %v8586_v5 = vpop.f32.mrb[11].mxu1  ;;  %v5532_v41 = vld [vmem:[%s12563_s10 + $0x8] sm:$0xff]  ;;  %v5534_v20 = vld [vmem:[%s12563_s10 + $0x18] sm:$0xff] }
 0x478   : > { %v9856_v59 = vpack.c.bf16 %v5532_v41, %v5531_v32  ;;  %v5536_v18 = vld [vmem:[%s12563_s10 + $0x28] sm:$0xff] }
 0x479   : > { %v5095_v40 = vmax.f32 %v4741_v12, %v5090_v51  ;;  %v9859_v51 = vpack.c.bf16 %v5534_v20, %v5533_v57  ;;  %v5535_v12 = vld [vmem:[%s12563_s10 + $0x20] sm:$0xff] }
 0x47a   : > { %v9862_v5 = vpack.c.bf16 %v5536_v18, %v5535_v12 }
 0x47b   : > { %v5103_v19 = vadd.f32 %v6112_v27, %v5095_v40  ;;  %v5537_v27 = vld [vmem:[%s12563_s10 + $0x30] sm:$0xff]  ;;  %v5538_v40 = vld [vmem:[%s12563_s10 + $0x38] sm:$0xff] }
 0x47c   : > { %v9865_v48 = vpack.c.bf16 %v5538_v40, %v5537_v27 }
 0x47d   : > { %v12290_v2 = vmax.f32 %v5103_v19, 0.0  ;;  %v5540_v19 = vld [vmem:[%s12563_s10 + $0x48] sm:$0xff] }
 0x47e   : > { %v9868_v44 = vpack.c.bf16 %v5540_v19, %v5539_v9 }
 0x47f   : > { %8631 = vmatmul.mubr.msk.f32.vlgmr.msra.gmra.mrb[12].mxu1 %vm5128_vm4, %v12290_v2  ;;  %v5127_v25 = vrot.slane %v12290_v2, 1  ;;  %v5369_v10 = vrot.slane %v12290_v2, 3  ;;  %v5284_v30 = vrot.slane %v12290_v2, 2  ;;  %v5454_v0 = vrot.slane %v12290_v2, 4 }
 0x480   : > { %9827 = vmatpush3.bf16.msra.mxu1 %v9826_v11  ;;  %8676 = vmatprep.mubr.msk.f32.mxu1 %vm10094_vm0, %v12615_v23  ;;  %v5542_v11 = vld [vmem:[%s12563_s10 + $0x58] sm:$0xff] }
 0x481   : > { %8608 = vmatmul.mubr.msk.f32.vlgmr.msra.gmra.mrb[12].mxu0 %vm5128_vm4, %v5127_v25  ;;  %9828 = vmatprep.subr.bf16.mxu1 %v10093_v3  ;;  %v9871_v2 = vpack.c.bf16 %v5542_v11, %v5541_v54  ;;  %v5545_v25 = vld [vmem:[%s12563_s10 + $0x70] sm:$0xff] }
 0x482   : > { %9812 = vmatpush3.bf16.msra.mxu0 %v9811_v52  ;;  %8653 = vmatprep.mubr.msk.f32.mxu0 %vm10094_vm0, %v12615_v23  ;;  %v9874_v52 = vpack.c.bf16 %v5544_v49, %v5543_v45 }
 0x483   : > { %9813 = vmatprep.subr.bf16.mxu0 %v10093_v3 }
 0x484   : > { %9830 = vmatpush3.bf16.msra.mxu1 %v9829_v63  ;;  %v5624_v63 = vld [vmem:[%s12565_s12 + $0x10] sm:$0xff] }
 0x485   : > { %9831 = vmatprep.subr.bf16.mxu1 %v10093_v3 }
 0x486   : > { %9815 = vmatpush3.bf16.msra.mxu0 %v9814_v16  ;;  %v9880_v16 = vpack.c.bf16 %v5625_v61, %v5624_v63 }
 0x487   : > { %9816 = vmatprep.subr.bf16.mxu0 %v10093_v3 }
 0x488   : > { %9833 = vmatpush3.bf16.msra.mxu1 %v9832_v53  ;;  %v9883_v53 = vpack.c.bf16 %v5627_v46, %v5626_v26 }
 0x489   : > { %9834 = vmatprep.subr.bf16.mxu1 %v10093_v3 }
 0x48a   : > { %9818 = vmatpush3.bf16.msra.mxu0 %v9817_v47  ;;  %v9886_v47 = vpack.c.bf16 %v5629_v28, %v5628_v14 }
 0x48b   : > { %9819 = vmatprep.subr.bf16.mxu0 %v10093_v3 }
 0x48c   : > { %9836 = vmatpush3.bf16.msra.mxu1 %v9835_v39 }
 0x48d   : > { %9837 = vmatprep.subr.bf16.mxu1 %v10093_v3 }
 0x48e   : > { %9821 = vmatpush3.bf16.msra.mxu0 %v9820_v13 }
 0x48f   : > { %9822 = vmatprep.subr.bf16.mxu0 %v10093_v3 }
 0x490   : > { %9839 = vmatpush3.bf16.msra.mxu1 %v9838_v55 }
 0x491   : > { %9855 = vmatprep.subr.bf16.mxu1 %v10093_v3 }
 0x492   : > { %9824 = vmatpush3.bf16.msra.mxu0 %v9823_v62 }
 0x493   : > { %8677 = vmatmul.mubr.msk.f32.vlgmr.msra.gmra.mrb[14].mxu1 %vm5128_vm4, %v5369_v10  ;;  %9840 = vmatprep.subr.bf16.mxu0 %v10093_v3  ;;  %v5528_v10 = vld [vmem:[%s12562_s9] sm:$0x1] }
 0x494   : > { %8732 = vmatprep.mubr.msk.f32.mxu1 %vm10094_vm0, %v12615_v23  ;;  %9857 = vmatpush3.bf16.msra.mxu1 %v9856_v59 }
 0x495   : > { %8654 = vmatmul.mubr.msk.f32.vlgmr.msra.gmra.mrb[14].mxu0 %vm5128_vm4, %v5284_v30  ;;  %9858 = vmatprep.subr.bf16.mxu1 %v10093_v3 }
 0x496   : > { %9842 = vmatpush3.bf16.msra.mxu0 %v9841_v29  ;;  %8699 = vmatprep.mubr.msk.f32.mxu0 %vm10094_vm0, %v12615_v23 }
 0x497   : > { %9843 = vmatprep.subr.bf16.mxu0 %v10093_v3 }
 0x498   : > { %9860 = vmatpush3.bf16.msra.mxu1 %v9859_v51 }
 0x499   : > { %9861 = vmatprep.subr.bf16.mxu1 %v10093_v3 }
 0x49a   : > { %9845 = vmatpush3.bf16.msra.mxu0 %v9844_v21  ;;  %v5631_v21 = vld [vmem:[%s12565_s12 + $0x48] sm:$0xff] }
 0x49b   : > { %9846 = vmatprep.subr.bf16.mxu0 %v10093_v3  ;;  %v9889_v1 = vpack.c.bf16 %v5631_v21, %v5630_v60 }
 0x49c   : > { %9863 = vmatpush3.bf16.msra.mxu1 %v9862_v5 }
 0x49d   : > { %9864 = vmatprep.subr.bf16.mxu1 %v10093_v3 }
 0x49e   : > { %9848 = vmatpush3.bf16.msra.mxu0 %v9847_v33  ;;  %v5546_v33 = vld [vmem:[%s12564_s11] sm:$0x1] }
 0x49f   : > { %9849 = vmatprep.subr.bf16.mxu0 %v10093_v3 }
 0x4a0   : > { %9866 = vmatpush3.bf16.msra.mxu1 %v9865_v48 }
 0x4a1   : > { %9867 = vmatprep.subr.bf16.mxu1 %v10093_v3 }
 0x4a2   : > { %9851 = vmatpush3.bf16.msra.mxu0 %v9850_v24 }
 0x4a3   : > { %9852 = vmatprep.subr.bf16.mxu0 %v10093_v3 }
 0x4a4   : > { %9869 = vmatpush3.bf16.msra.mxu1 %v9868_v44 }
 0x4a5   : > { %9870 = vmatprep.subr.bf16.mxu1 %v10093_v3 }
 0x4a6   : > { %9854 = vmatpush3.bf16.msra.mxu0 %v9853_v15 }
 0x4a7   : > { %9876 = vmatprep.subr.bf16.mxu0 %v10093_v3 }
 0x4a8   : > { %9872 = vmatpush3.bf16.msra.mxu1 %v9871_v2 }
 0x4a9   : > { %8700 = vmatmul.mubr.msk.f32.vlgmr.msra.gmra.mrb[16].mxu0 %vm5128_vm4, %v5454_v0  ;;  %9873 = vmatprep.subr.bf16.mxu1 %v10093_v3 }
 0x4aa   : > { %8757 = vmatprep.mubr.msk.f32.mxu0 %vm10094_vm0, %v12615_v23  ;;  %9878 = vmatpush3.bf16.msra.mxu0 %v9877_v56 }
 0x4ab   : > { %9879 = vmatprep.subr.bf16.mxu0 %v10093_v3 }
 0x4ac   : > { %9875 = vmatpush3.bf16.msra.mxu1 %v9874_v52 }
 0x4ad   : > { %8730 = vmatprep.subr.mxu1 %v12615_v23 }
 0x4ae   : > { %9881 = vmatpush3.bf16.msra.mxu0 %v9880_v16 }
 0x4af   : > { %9882 = vmatprep.subr.bf16.mxu0 %v10093_v3 }
 0x4b0   : > { %8731 = vmatpush3.msra.mxu1 %v5545_v25 }
 0x4b2   : > { %9884 = vmatpush3.bf16.msra.mxu0 %v9883_v53 }
 0x4b3   : > { %9885 = vmatprep.subr.bf16.mxu0 %v10093_v3 }
 0x4b6   : > { %9887 = vmatpush3.bf16.msra.mxu0 %v9886_v47 }
 0x4b7   : > { %9888 = vmatprep.subr.bf16.mxu0 %v10093_v3 }
 0x4ba   : > { %9890 = vmatpush3.bf16.msra.mxu0 %v9889_v1 }
 0x4bb   : > { %8755 = vmatprep.subr.mxu0 %v12615_v23  ;;  %v5633_v23 = vld [vmem:[%s12566_s13] sm:$0x1] }
 0x4be   : > { %8756 = vmatpush3.msk.msra.mxu0 %vm3539_vm2, %v5632_v22 }
 0x552   : > { %v5269_v17 = vpop.f32.mrb[12].mxu1 }
 0x553   : > { %v8632_v38 = vpop.f32.mrb[13].mxu1 }
 0x554   : > { %v5197_v39 = vpop.f32.mrb[12].mxu0 }
 0x555   : > { %v5270_v4 = vadd.f32 %v5269_v17, %v5197_v39  ;;  %v8609_v8 = vpop.f32.mrb[13].mxu0 }
 0x566   : > { %v5438_v13 = vpop.f32.mrb[14].mxu1 }
 0x567   : > { %v8678_v31 = vpop.f32.mrb[15].mxu1 }
 0x568   : > { %v5353_v36 = vpop.f32.mrb[14].mxu0 }
 0x569   : > { %v5357_v55 = vadd.f32 %v5353_v36, %v5270_v4  ;;  %v8655_v62 = vpop.f32.mrb[15].mxu0 }
 0x56b   : > { %v5442_v34 = vadd.f32 %v5438_v13, %v5357_v55 }
 0x57c   : > { %v5523_v35 = vpop.f32.mrb[16].mxu0 }
 0x57d   : > { %v5527_v29 = vadd.f32 %v5523_v35, %v5442_v34  ;;  %v8701_v30 = vpop.f32.mrb[17].mxu0 }
 0x57f   : > { %v5529_v37 = vadd.f32 %v5528_v10, %v5527_v29 }
 0x581   : > { %v5530_v3 = vmax.f32 %v5529_v37, 0.0 }
 0x583   : > { %8733 = vmatmul.mubr.msk.f32.vlgmr.msra.gmra.mrb[16].mxu1 %vm5547_vm5, %v5530_v3 }
 0x656   : > { %v5617_v42 = vpop.f32.mrb[16].mxu1 }
 0x657   : > { %v5618_v58 = vadd.f32 %v5617_v42, %v5546_v33  ;;  %v8734_v24 = vpop.f32.mrb[17].mxu1 }
 0x659   : > { %v5621_v43 = vmax.f32 %v5618_v58, 0.0 }
 0x65b   : > { %8758 = vmatmul.mubr.msk.f32.vlgmr.msra.gmra.mrb[18].mxu0 %vm3535_vm3, %v5621_v43 }
 0x72e   : > { %v5706_v6 = vpop.f32.mrb[18].mxu0 }
 0x72f   : > { %v5707_v15 = vadd.f32 %v5706_v6, %v5633_v23  ;;  %v8759_v0 = vpop.f32.mrb[19].mxu0 }
 0x731   : > { %5711 = vst.msk [vmem:[%s496_s27] sm:$0x1] %vm5710_vm6, %v5707_v15 }
 0x732   : > { %10042 = shalt.err (!%p10039_p3)
}
 0x733   : > { %s10043_s22 = scalar_lea.hbm %s12511_s25, 16  ;;  %s10047_s27 = scalar_lea.hbm %s12567_s14, 32 }
 0x734   : > { %p10044_p4 = scmp.ne.s32.totalorder %s12511_s25, %s10043_s22  ;;  %p10048_p9 = scmp.lt.u32.totalorder %s12511_s25, %s12567_s14 }
 0x735   : > { %p10049_p10 = scmp.lt.u32.totalorder %s10047_s27, %s10043_s22  ;;  %p10051_p12 = scmp.lt.u32.totalorder %s10043_s22, %s12511_s25 }
 0x736   : > { %p10045_p7 = pnand %p10044_p4, %p10210_p5 }
 0x737   : > { %p10050_p11 = por %p10049_p10, %p10048_p9 }
 0x738   : > { %p10046_p8 = pneg %p10045_p7 }
 0x739   : > { %p10052_p13 = por %p10051_p12, %p10050_p11 }
 0x73b   : > { %p10053_p0 = pnand %p10052_p13, %p10046_p8 }
 0x73d   : > { %10056 = shalt.err (!%p10053_p0)
}
 0x73e   : > { %9987 = dma.vmem_to_hbm [thread:$0]  (%p10210_p5), %s12513_s29, 16, %s12511_s25, %s5713_s28  }
 0x73f PF: > { %s12641_s21 = sld [smem:[#allocation5_spill]]  ;;  %p9993_p1 = scmp.ge.s32.totalorder %s10091_s16, 2 }
 0x741   : > { %p9990_p2 = pnand %p9993_p1, %p10214_p6 }
 0x745   : > { %s5737_s15 = sand.u32 1, %s12641_s21  }
 0x746   : > { %s5738_s26 = scalar_lea.sflag [#allocation3], %s5737_s15 }
 0x747   : > { %10074 = dma.done.wait (!%p9990_p2), %s5738_s26, 16  }
 0x748   : > { %10076 = vsyncadd (!%p9990_p2), %s5738_s26, 4294967280  ;;  %s12643_s16 = sld [smem:[#allocation7_spill]]  ;;  %s12644_s22 = sld [smem:[#allocation6_spill]] }
 0x749   : > { %s12645_s15 = sld [smem:[#allocation8_spill]]  ;;  %s12646_s29 = smov %s10083_s30 }
 0x74e   : > { %p24_p3 = scmp.ge.s32.totalorder %s12643_s16, 4   ;;  %s12647_s30 = smov %s12644_s22 }
 0x750   :  { %26 = sbr.rel (!%p24_p3) target bundleno = 3 (0x3), region = 142 }
 0x757   :  { %5742 = vsyncpa [#allocation3], 1 }
 0x758   :  { %5744 = vsyncpa [#allocation3 + $0x1], 1 }

</bundles_post_ra>
